<compile_context>
chip_gen: v7x
topology: tpu7x:2x2x1
jax: 0.10.0
libtpu: 0.0.40
codegen_flags: <defaults>
</compile_context>

<pallas_src>
import functools
import math

import jax
import jax.numpy as jnp
from jax import lax
from jax.experimental import pallas as pl
from jax.experimental.pallas import tpu as pltpu


_MASK_VALUE = -1e30


def _round_up(x: int, m: int) -> int:
    return ((x + m - 1) // m) * m


def _choose_tile(total: int, max_tile: int, align: int = 128):
    """Largest align-multiple tile <= max_tile; returns (tile, padded_total).

    Guarantees padded_total - total < tile (no fully-padded tile), which the
    no-mask padding scheme in the kernel relies on.
    """
    padded = _round_up(total, align)
    n_tiles = -(-padded // max_tile)
    tile = _round_up(-(-padded // n_tiles), align)
    return tile, tile * n_tiles


@functools.lru_cache(maxsize=1)
def _vmem_capacity_bytes() -> int:
    try:
        return int(pltpu.get_tpu_info().vmem_capacity_bytes)
    except Exception:
        return 64 << 20   # v7x-safe fallback


# ---------------------------------------------------------------------------
# Pallas kernel: fused similarity matmul + online softmax + readout
# ---------------------------------------------------------------------------
def _read_memory_kernel(a_ref, bq_ref, mv_ref, out_ref, m_sc, l_sc, acc_sc):
    # Grid: (batch, CVt-tile, P-tile, N-tile); N-tile last ("arbitrary").
    #   a_ref : (1, K2p, Nt)   stacked/scaled memory-key operand
    #   bq_ref: (1, K2p, Pt)   stacked query operand
    #   mv_ref: (1, CVt_t, Nt) memory value tile
    #   out   : (1, CVt_t, Pt)
    nk = pl.program_id(3)

    @pl.when(nk == 0)
    def _init():
        m_sc[...] = jnp.full_like(m_sc, -jnp.inf)
        l_sc[...] = jnp.zeros_like(l_sc)
        acc_sc[...] = jnp.zeros_like(acc_sc)

    a = a_ref[0]      # (K2p, Nt)
    bq = bq_ref[0]    # (K2p, Pt)
    mv = mv_ref[0]    # (CVt_t, Nt)

    # sim[n, p] = sum_k a[k, n] * bq[k, p]; contract axis 0 of both operands
    # (no explicit transpose). bf16 operands, f32 accumulation.
    sim = lax.dot_general(
        a, bq, (((0,), (0,)), ((), ())),
        preferred_element_type=jnp.float32)                       # (Nt, Pt) f32

    # flash-style online softmax over the memory axis (rows)
    tile_max = jnp.max(sim, axis=0, keepdims=True)                # (1, Pt)
    m_new = jnp.maximum(m_sc[...], tile_max)                      # (1, Pt)
    alpha = jnp.exp(m_sc[...] - m_new)                            # (1, Pt)
    p = jnp.exp(sim - m_new)                                      # (Nt, Pt) f32
    l_sc[...] = alpha * l_sc[...] + jnp.sum(p, axis=0, keepdims=True)
    acc_sc[...] = alpha * acc_sc[...] + jnp.dot(
        mv, p.astype(mv.dtype),                                   # bf16 readout matmul
        preferred_element_type=jnp.float32)                       # (CVt_t, Pt) f32
    m_sc[...] = m_new

    @pl.when(nk == pl.num_programs(3) - 1)
    def _finalize():
        inv_l = pl.reciprocal(l_sc[...], approx=True)             # (1, Pt), EUP
        out_ref[0] = (acc_sc[...] * inv_l).astype(out_ref.dtype)


@functools.partial(jax.jit,
                   static_argnames=("compute_dtype", "max_nt", "max_pt", "max_cvt"))
def read_memory_pallas(mk, ms, qk, qe, mv, *, compute_dtype=jnp.bfloat16,
                       max_nt=1024, max_pt=512, max_cvt=512):
    """mk:(B,CK,N) ms:(B,1,N) qk,qe:(B,CK,P) mv:(B,CVt,N) -> (B,CVt,P) f32."""
    B, CK, N = mk.shape
    P = qk.shape[-1]
    CVt = mv.shape[1]
    f32 = jnp.float32
    in_bytes = jnp.dtype(compute_dtype).itemsize
    k_align = 16 if in_bytes == 2 else 8
    assert max_nt % 128 == 0 and max_pt % 128 == 0

    mk = mk.astype(f32)
    ms = ms.astype(f32)
    qk = qk.astype(f32)
    qe = qe.astype(f32)
    mv = mv.astype(f32)

    # Fold shrinkage and 1/sqrt(CK) into the stacked LHS operand (one MXU pass).
    ms_scaled = ms * (1.0 / math.sqrt(CK))                              # (B,1,N)
    a = jnp.concatenate(
        [-(mk * mk), 2.0 * mk, jnp.ones((B, 1, N), f32)], axis=1) * ms_scaled
    b_sq = jnp.sum(qe * qk * qk, axis=1, keepdims=True)                 # (B,1,P)
    bq = jnp.concatenate([qe, qk * qe, -b_sq], axis=1)                  # (B,2CK+1,P)

    K2 = a.shape[1] + 1                      # + padding-indicator row
    K2p = _round_up(K2, k_align)

    # ------- VMEM-budget-driven tile selection (per-generation capacity) -----
    cap = _vmem_capacity_bytes()
    limit_ceiling = max(32 << 20, min(cap - (16 << 20), 100 << 20))
    budget = int(0.8 * limit_ceiling)

    cvt = CVt if CVt <= max_cvt else max_cvt            # CVt tile (whole if small)
    c_pad = _round_up(CVt, cvt)
    while True:
        nt, n_pad = _choose_tile(N, max_nt)
        pt, p_pad = _choose_tile(P, max_pt)
        est = (2 * K2p * nt * in_bytes          # a   (double-buffered)
               + 2 * K2p * pt * in_bytes        # bq
               + 2 * cvt * nt * in_bytes        # mv
               + 2 * cvt * pt * 4               # out (f32)
               + cvt * pt * 4                   # acc scratch
               + 4 * pt * 4                     # m / l scratch
               + 3 * nt * pt * 4)               # sim / p intermediates
        if est <= budget or (max_nt <= 256 and cvt <= 128 and max_pt <= 256):
            break
        if max_nt > 256:                        # shrink the non-output dim first
            max_nt //= 2
        elif cvt > 128:
            cvt = _round_up(max(128, cvt // 2), 16)
            c_pad = _round_up(CVt, cvt)
        else:
            max_pt //= 2
    vmem_limit = int(min(limit_ceiling, max(32 << 20, est + (8 << 20))))

    # Invariant the no-mask padding scheme relies on: no N tile is all padding.
    assert n_pad - N < nt, (n_pad, N, nt)

    # ------- padding + mask rows (done once on the host side) ---------------
    a = jnp.pad(a, ((0, 0), (0, 0), (0, n_pad - N)))
    pad_ind = jnp.broadcast_to(
        (jnp.arange(n_pad) >= N).astype(f32)[None, None, :], (B, 1, n_pad))
    a = jnp.concatenate([a, pad_ind], axis=1)                           # (B,K2,n_pad)
    bq = jnp.concatenate(
        [bq, jnp.full((B, 1, P), _MASK_VALUE, f32)], axis=1)            # (B,K2,P)
    if K2p != K2:
        a = jnp.pad(a, ((0, 0), (0, K2p - K2), (0, 0)))
        bq = jnp.pad(bq, ((0, 0), (0, K2p - K2), (0, 0)))
    bq = jnp.pad(bq, ((0, 0), (0, 0), (0, p_pad - P)))
    mv = jnp.pad(mv, ((0, 0), (0, c_pad - CVt), (0, n_pad - N)))

    # bf16 MXU operands (f32 accumulation inside the kernel).
    a = a.astype(compute_dtype)
    bq = bq.astype(compute_dtype)
    mv = mv.astype(compute_dtype)

    n_c, n_p, n_n = c_pad // cvt, p_pad // pt, n_pad // nt
    grid = (B, n_c, n_p, n_n)

    cost = pl.CostEstimate(
        flops=2 * B * n_c * K2p * n_pad * p_pad + 2 * B * c_pad * n_pad * p_pad,
        transcendentals=B * n_c * n_pad * p_pad,
        bytes_accessed=(B * n_c * n_p * K2p * n_pad * in_bytes      # a re-reads
                        + B * n_c * K2p * p_pad * in_bytes          # bq
                        + B * n_p * c_pad * n_pad * in_bytes        # mv re-reads
                        + B * c_pad * p_pad * 4))                   # out

    out = pl.pallas_call(
        _read_memory_kernel,
        out_shape=jax.ShapeDtypeStruct((B, c_pad, p_pad), jnp.float32),
        grid_spec=pltpu.PrefetchScalarGridSpec(
            num_scalar_prefetch=0,
            grid=grid,
            in_specs=[
                pl.BlockSpec((1, K2p, nt), lambda b, cj, pj, nk: (b, 0, nk)),
                pl.BlockSpec((1, K2p, pt), lambda b, cj, pj, nk: (b, 0, pj)),
                pl.BlockSpec((1, cvt, nt), lambda b, cj, pj, nk: (b, cj, nk)),
            ],
            out_specs=pl.BlockSpec((1, cvt, pt), lambda b, cj, pj, nk: (b, cj, pj)),
            scratch_shapes=[
                pltpu.VMEM((1, pt), jnp.float32),     # running max
                pltpu.VMEM((1, pt), jnp.float32),     # running sum
                pltpu.VMEM((cvt, pt), jnp.float32),   # readout accumulator
            ],
        ),
        compiler_params=pltpu.CompilerParams(
            dimension_semantics=("parallel", "parallel", "parallel", "arbitrary"),
            vmem_limit_bytes=vmem_limit),
        cost_estimate=cost,
    )(a, bq, mv)
    return out[:, :CVt, :P]


# ---------------------------------------------------------------------------
# Plain-JAX references for verification
# ---------------------------------------------------------------------------
def read_memory_reference(mk, ms, qk, qe, mv):
    """Exact f32 mirror of XMem's get_affinity + readout."""
    CK = mk.shape[1]
    a_sq = jnp.einsum("bcn,bcp->bnp", jnp.square(mk), qe)
    two_ab = 2.0 * jnp.einsum("bcn,bcp->bnp", mk, qk * qe)
    b_sq = jnp.sum(qe * jnp.square(qk), axis=1, keepdims=True)        # (B,1,P)
    sim = (-a_sq + two_ab - b_sq) * jnp.swapaxes(ms, 1, 2) / math.sqrt(CK)
    m = jnp.max(sim, axis=1, keepdims=True)
    e = jnp.exp(sim - m)
    aff = e / jnp.sum(e, axis=1, keepdims=True)
    return jnp.einsum("bcn,bnp->bcp", mv, aff)


def read_memory_emulated(mk, ms, qk, qe, mv, compute_dtype):
    """Reference emulating the kernel's reduced-precision operand math."""
    CK = mk.shape[1]
    B, _, N = mk.shape
    ms_scaled = ms * (1.0 / math.sqrt(CK))
    a = jnp.concatenate(
        [-(mk * mk), 2.0 * mk, jnp.ones((B, 1, N), jnp.float32)], axis=1) * ms_scaled
    b_sq = jnp.sum(qe * qk * qk, axis=1, keepdims=True)
    bq = jnp.concatenate([qe, qk * qe, -b_sq], axis=1)
    sim = jnp.einsum("bkn,bkp->bnp", a.astype(compute_dtype),
                     bq.astype(compute_dtype),
                     preferred_element_type=jnp.float32)
    m = jnp.max(sim, axis=1, keepdims=True)
    e = jnp.exp(sim - m)
    acc = jnp.einsum("bcn,bnp->bcp", mv.astype(compute_dtype),
                     e.astype(compute_dtype),
                     preferred_element_type=jnp.float32)
    return acc / jnp.sum(e, axis=1, keepdims=True)


# ---------------------------------------------------------------------------
# XMem wrapper (hyperparameter init mirrors the PyTorch module)
# ---------------------------------------------------------------------------
class XMem:
    def __init__(self, config, compute_dtype=jnp.bfloat16):
        # mirrors init_hyperparameters() defaults (no checkpoint loading here)
        self.key_dim = config.get("key_dim", 64)
        self.value_dim = config.get("value_dim", 512)
        self.hidden_dim = config.get("hidden_dim", 64)
        self.disable_hidden = self.hidden_dim <= 0
        self.single_object = config.get("single_object", False)
        self.compute_dtype = compute_dtype
        config["key_dim"] = self.key_dim
        config["value_dim"] = self.value_dim
        config["hidden_dim"] = self.hidden_dim
        # TODO(synk): key_encoder / value_encoder / key_proj / decoder parameters
        # belong to external submodules not defined in the provided snippet.

    def read_memory(self, query_key, query_selection, memory_key,
                    memory_shrinkage, memory_value):
        """
        query_key       : B x CK x H x W
        query_selection : B x CK x H x W
        memory_key      : B x CK x T x H x W
        memory_shrinkage: B x 1  x T x H x W
        memory_value    : B x num_objects x CV x T x H x W
        returns         : B x num_objects x CV x H x W
        """
        B, num_objects = memory_value.shape[:2]
        CK = memory_key.shape[1]
        H, W = query_key.shape[-2:]
        P = H * W
        N = memory_key.shape[2] * memory_key.shape[3] * memory_key.shape[4]

        mk = memory_key.reshape(B, CK, N)
        ms = memory_shrinkage.reshape(B, 1, N)
        qk = query_key.reshape(B, CK, P)
        qe = query_selection.reshape(B, CK, P)
        mv = memory_value.reshape(B, num_objects * self.value_dim, N)

        mem = read_memory_pallas(mk, ms, qk, qe, mv,
                                 compute_dtype=self.compute_dtype)
        return mem.reshape(B, num_objects, self.value_dim, H, W)

    def forward(self, mode, *args, **kwargs):
        if mode == "read_memory":
            return self.read_memory(*args, **kwargs)
        # TODO(synk): encode_key / encode_value / segment require the external
        # KeyEncoder / ValueEncoder / KeyProjection / Decoder definitions.
        raise NotImplementedError(f"mode '{mode}' not implemented in Pallas port")

    __call__ = forward


# ---------------------------------------------------------------------------
if __name__ == "__main__":
    key = jax.random.PRNGKey(0)
    B, num_objects = 2, 2
    CK, CV = 8, 8              # small key_dim / value_dim for the synthetic run
    T, H, W = 3, 15, 15        # N=675 (padded to 768), P=225 (padded to 256)

    config = {"key_dim": CK, "value_dim": CV, "hidden_dim": 8}
    model = XMem(config)       # default bf16 MXU operands

    k1, k2, k3, k4, k5 = jax.random.split(key, 5)
    query_key = jax.random.normal(k1, (B, CK, H, W), dtype=jnp.float32)
    # selection is a sigmoid output in XMem -> values in (0, 1)
    query_selection = jax.nn.sigmoid(
        jax.random.normal(k2, (B, CK, H, W), dtype=jnp.float32))
    memory_key = jax.random.normal(k3, (B, CK, T, H, W), dtype=jnp.float32)
    # shrinkage is (x^2 + 1) in XMem -> values >= 1
    memory_shrinkage = (
        jnp.square(jax.random.normal(k4, (B, 1, T, H, W), dtype=jnp.float32)) + 1.0)
    memory_value = jax.random.normal(
        k5, (B, num_objects, CV, T, H, W), dtype=jnp.float32)

    out = model("read_memory", query_key, query_selection, memory_key,
                memory_shrinkage, memory_value)
    out = jax.block_until_ready(out)
    assert out.shape == (B, num_objects, CV, H, W), out.shape

    # flattened inputs for the references
    N = T * H * W
    P = H * W
    mk = memory_key.reshape(B, CK, N)
    ms = memory_shrinkage.reshape(B, 1, N)
    qk = query_key.reshape(B, CK, P)
    qe = query_selection.reshape(B, CK, P)
    mv = memory_value.reshape(B, num_objects * CV, N)

    # 1) exact-semantics check: f32 compute path vs XMem's get_affinity+readout
    out_f32 = jax.block_until_ready(
        read_memory_pallas(mk, ms, qk, qe, mv, compute_dtype=jnp.float32))
    ref = read_memory_reference(mk, ms, qk, qe, mv)
    err_f32 = float(jnp.max(jnp.abs(out_f32 - ref)))
    assert jnp.allclose(out_f32, ref, rtol=5e-3, atol=1e-3), err_f32

    # 2) optimized bf16 path vs a bf16-operand emulated reference
    ref_bf16 = read_memory_emulated(mk, ms, qk, qe, mv, jnp.bfloat16).reshape(
        B, num_objects, CV, H, W)
    err_bf16 = float(jnp.max(jnp.abs(out - ref_bf16)))
    assert jnp.allclose(out, ref_bf16, rtol=2e-2, atol=2e-2), err_bf16

    print("KERNEL_OK")
</pallas_src>

<mosaic_0001>
module attributes {stable_mosaic.version = 11 : i64} {
  func.func @_read_memory_kernel(%arg0: i32, %arg1: i32, %arg2: i32, %arg3: i32, %arg4: memref<1x32x768xbf16, #tpu.memory_space<vmem>>, %arg5: memref<1x32x256xbf16, #tpu.memory_space<vmem>>, %arg6: memref<1x16x768xbf16, #tpu.memory_space<vmem>>, %arg7: memref<1x16x256xf32, #tpu.memory_space<vmem>>, %arg8: memref<1x256xf32, #tpu.memory_space<vmem>>, %arg9: memref<1x256xf32, #tpu.memory_space<vmem>>, %arg10: memref<16x256xf32, #tpu.memory_space<vmem>>) attributes {dimension_semantics = [#tpu.dimension_semantics<parallel>, #tpu.dimension_semantics<parallel>, #tpu.dimension_semantics<parallel>, #tpu.dimension_semantics<arbitrary>], iteration_bounds = array<i64: 2, 1, 1, 1>, scalar_prefetch = 0 : i64, scratch_operands = 3 : i64, tpu.core_type = #tpu.core_type<tc>, window_params = [{transform_indices = @transform_0, window_bounds = array<i64: 1, 32, 768>}, {transform_indices = @transform_1, window_bounds = array<i64: 1, 32, 256>}, {transform_indices = @transform_2, window_bounds = array<i64: 1, 16, 768>}, {transform_indices = @transform_3, window_bounds = array<i64: 1, 16, 256>}]} {
    %c0_i32 = arith.constant 0 : i32
    %0 = arith.cmpi eq, %arg3, %c0_i32 : i32
    %1 = arith.extui %0 : i1 to i32
    %c0_i32_0 = arith.constant 0 : i32
    %2 = arith.cmpi ne, %1, %c0_i32_0 : i32
    scf.if %2 {
      %cst_28 = arith.constant 0xFF800000 : f32
      %37 = vector.broadcast %cst_28 : f32 to vector<1x256xf32>
      %c0_29 = arith.constant 0 : index
      %c0_30 = arith.constant 0 : index
      %38 = vector.load %arg8[%c0_29, %c0_30] : memref<1x256xf32, #tpu.memory_space<vmem>>, vector<1x256xf32>
      tpu.vector_store %arg8[%c0_29, %c0_30], %37 {strides = array<i32>} : memref<1x256xf32, #tpu.memory_space<vmem>>, vector<1x256xf32>,
      %cst_31 = arith.constant 0.000000e+00 : f32
      %39 = vector.broadcast %cst_31 : f32 to vector<1x256xf32>
      %c0_32 = arith.constant 0 : index
      %c0_33 = arith.constant 0 : index
      %40 = vector.load %arg9[%c0_32, %c0_33] : memref<1x256xf32, #tpu.memory_space<vmem>>, vector<1x256xf32>
      tpu.vector_store %arg9[%c0_32, %c0_33], %39 {strides = array<i32>} : memref<1x256xf32, #tpu.memory_space<vmem>>, vector<1x256xf32>,
      %cst_34 = arith.constant 0.000000e+00 : f32
      %41 = vector.broadcast %cst_34 : f32 to vector<16x256xf32>
      %c0_35 = arith.constant 0 : index
      %c0_36 = arith.constant 0 : index
      %42 = vector.load %arg10[%c0_35, %c0_36] : memref<16x256xf32, #tpu.memory_space<vmem>>, vector<16x256xf32>
      tpu.vector_store %arg10[%c0_35, %c0_36], %41 {strides = array<i32>} : memref<16x256xf32, #tpu.memory_space<vmem>>, vector<16x256xf32>,
    } else {
    }
    %c0 = arith.constant 0 : index
    %c0_1 = arith.constant 0 : index
    %c0_2 = arith.constant 0 : index
    %3 = vector.load %arg4[%c0, %c0_1, %c0_2] : memref<1x32x768xbf16, #tpu.memory_space<vmem>>, vector<1x32x768xbf16>
    %4 = vector.shape_cast %3 : vector<1x32x768xbf16> to vector<32x768xbf16>
    %c0_3 = arith.constant 0 : index
    %c0_4 = arith.constant 0 : index
    %c0_5 = arith.constant 0 : index
    %5 = vector.load %arg5[%c0_3, %c0_4, %c0_5] : memref<1x32x256xbf16, #tpu.memory_space<vmem>>, vector<1x32x256xbf16>
    %6 = vector.shape_cast %5 : vector<1x32x256xbf16> to vector<32x256xbf16>
    %c0_6 = arith.constant 0 : index
    %c0_7 = arith.constant 0 : index
    %c0_8 = arith.constant 0 : index
    %7 = vector.load %arg6[%c0_6, %c0_7, %c0_8] : memref<1x16x768xbf16, #tpu.memory_space<vmem>>, vector<1x16x768xbf16>
    %8 = vector.shape_cast %7 : vector<1x16x768xbf16> to vector<16x768xbf16>
    %cst = arith.constant dense<0.000000e+00> : vector<768x256xf32>
    %9 = tpu.matmul %4, %6, %cst {dimension_numbers = #tpu.dot_dimension_numbers<[0], [0], [1], [1], [0, 1, 1, 1], [], []>} : vector<32x768xbf16>, vector<32x256xbf16>, vector<768x256xf32> -> vector<768x256xf32>
    %cst_9 = arith.constant dense<0xFF800000> : vector<256xf32>
    %10 = vector.multi_reduction <maximumf>, %9, %cst_9 [0] : vector<768x256xf32> to vector<256xf32>
    %11 = vector.shape_cast %10 : vector<256xf32> to vector<1x256xf32>
    %c0_10 = arith.constant 0 : index
    %c0_11 = arith.constant 0 : index
    %12 = vector.load %arg8[%c0_10, %c0_11] : memref<1x256xf32, #tpu.memory_space<vmem>>, vector<1x256xf32>
    %13 = arith.maximumf %12, %11 : vector<1x256xf32>
    %c0_12 = arith.constant 0 : index
    %c0_13 = arith.constant 0 : index
    %14 = vector.load %arg8[%c0_12, %c0_13] : memref<1x256xf32, #tpu.memory_space<vmem>>, vector<1x256xf32>
    %15 = arith.subf %14, %13 : vector<1x256xf32>
    %16 = math.exp %15 : vector<1x256xf32>
    %17 = vector.broadcast %13 : vector<1x256xf32> to vector<768x256xf32>
    %18 = arith.subf %9, %17 : vector<768x256xf32>
    %19 = math.exp %18 : vector<768x256xf32>
    %c0_14 = arith.constant 0 : index
    %c0_15 = arith.constant 0 : index
    %20 = vector.load %arg9[%c0_14, %c0_15] : memref<1x256xf32, #tpu.memory_space<vmem>>, vector<1x256xf32>
    %21 = arith.mulf %16, %20 : vector<1x256xf32>
    %cst_16 = arith.constant dense<0.000000e+00> : vector<256xf32>
    %22 = vector.multi_reduction <add>, %19, %cst_16 [0] : vector<768x256xf32> to vector<256xf32>
    %23 = vector.shape_cast %22 : vector<256xf32> to vector<1x256xf32>
    %24 = arith.addf %21, %23 : vector<1x256xf32>
    %c0_17 = arith.constant 0 : index
    %c0_18 = arith.constant 0 : index
    %25 = vector.load %arg9[%c0_17, %c0_18] : memref<1x256xf32, #tpu.memory_space<vmem>>, vector<1x256xf32>
    tpu.vector_store %arg9[%c0_17, %c0_18], %24 {strides = array<i32>} : memref<1x256xf32, #tpu.memory_space<vmem>>, vector<1x256xf32>,
    %c0_19 = arith.constant 0 : index
    %c0_20 = arith.constant 0 : index
    %26 = vector.load %arg10[%c0_19, %c0_20] : memref<16x256xf32, #tpu.memory_space<vmem>>, vector<16x256xf32>
    %27 = vector.broadcast %16 : vector<1x256xf32> to vector<16x256xf32>
    %28 = arith.mulf %27, %26 : vector<16x256xf32>
    %29 = arith.truncf %19 : vector<768x256xf32> to vector<768x256xbf16>
    %cst_21 = arith.constant dense<0.000000e+00> : vector<16x256xf32>
    %30 = tpu.matmul %8, %29, %cst_21 {dimension_numbers = #tpu.dot_dimension_numbers<[1], [0], [0], [1], [0, 0, 1, 1], [], []>} : vector<16x768xbf16>, vector<768x256xbf16>, vector<16x256xf32> -> vector<16x256xf32>
    %31 = arith.addf %28, %30 : vector<16x256xf32>
    %c0_22 = arith.constant 0 : index
    %c0_23 = arith.constant 0 : index
    %32 = vector.load %arg10[%c0_22, %c0_23] : memref<16x256xf32, #tpu.memory_space<vmem>>, vector<16x256xf32>
    tpu.vector_store %arg10[%c0_22, %c0_23], %31 {strides = array<i32>} : memref<16x256xf32, #tpu.memory_space<vmem>>, vector<16x256xf32>,
    %c0_24 = arith.constant 0 : index
    %c0_25 = arith.constant 0 : index
    %33 = vector.load %arg8[%c0_24, %c0_25] : memref<1x256xf32, #tpu.memory_space<vmem>>, vector<1x256xf32>
    tpu.vector_store %arg8[%c0_24, %c0_25], %13 {strides = array<i32>} : memref<1x256xf32, #tpu.memory_space<vmem>>, vector<1x256xf32>,
    %c0_i32_26 = arith.constant 0 : i32
    %34 = arith.cmpi eq, %arg3, %c0_i32_26 : i32
    %35 = arith.extui %34 : i1 to i32
    %c0_i32_27 = arith.constant 0 : i32
    %36 = arith.cmpi ne, %35, %c0_i32_27 : i32
    scf.if %36 {
      %c0_28 = arith.constant 0 : index
      %c0_29 = arith.constant 0 : index
      %37 = vector.load %arg9[%c0_28, %c0_29] : memref<1x256xf32, #tpu.memory_space<vmem>>, vector<1x256xf32>
      %38 = tpu.reciprocal %37 {approx = true} : vector<1x256xf32> -> vector<1x256xf32>
      %c0_30 = arith.constant 0 : index
      %c0_31 = arith.constant 0 : index
      %39 = vector.load %arg10[%c0_30, %c0_31] : memref<16x256xf32, #tpu.memory_space<vmem>>, vector<16x256xf32>
      %40 = vector.broadcast %38 : vector<1x256xf32> to vector<16x256xf32>
      %41 = arith.mulf %39, %40 : vector<16x256xf32>
      %c0_32 = arith.constant 0 : index
      %c0_33 = arith.constant 0 : index
      %c0_34 = arith.constant 0 : index
      %42 = vector.load %arg7[%c0_32, %c0_33, %c0_34] : memref<1x16x256xf32, #tpu.memory_space<vmem>>, vector<1x16x256xf32>
      %43 = vector.shape_cast %42 : vector<1x16x256xf32> to vector<16x256xf32>
      %44 = vector.shape_cast %41 : vector<16x256xf32> to vector<1x16x256xf32>
      tpu.vector_store %arg7[%c0_32, %c0_33, %c0_34], %44 {strides = array<i32>} : memref<1x16x256xf32, #tpu.memory_space<vmem>>, vector<1x16x256xf32>,
    } else {
    }
    return
  }
  func.func @transform_0(%arg0: i32, %arg1: i32, %arg2: i32, %arg3: i32) -> (i32, i32, i32) {
    %c0_i32 = arith.constant 0 : i32
    %c0_i32_0 = arith.constant 0 : i32
    return %arg0, %c0_i32, %arg3 : i32, i32, i32
  }
  func.func @transform_1(%arg0: i32, %arg1: i32, %arg2: i32, %arg3: i32) -> (i32, i32, i32) {
    %c0_i32 = arith.constant 0 : i32
    %c0_i32_0 = arith.constant 0 : i32
    return %arg0, %c0_i32, %arg2 : i32, i32, i32
  }
  func.func @transform_2(%arg0: i32, %arg1: i32, %arg2: i32, %arg3: i32) -> (i32, i32, i32) {
    %c0_i32 = arith.constant 0 : i32
    return %arg0, %arg1, %arg3 : i32, i32, i32
  }
  func.func @transform_3(%arg0: i32, %arg1: i32, %arg2: i32, %arg3: i32) -> (i32, i32, i32) {
    %c0_i32 = arith.constant 0 : i32
    return %arg0, %arg1, %arg2 : i32, i32, i32
  }
}

</mosaic_0001>

<bundles_post_ra>
// kernel: read_memory_pallas.1
= control target key start
LH: loop header
LB: loop body
LE: loop exit
PB: predicated region body
PF: predicated region fallthrough
CT: control target
= control target key end

     0   :  { %8 = vsyncpa [#allocation6], 0  ;;  %s6312_s0 = inlined_call_operand.vmem [shape: bf16[2,32,768], index: 0, kind: input, shape index: {}]   ;;  %s6313_s1 = inlined_call_operand.vmem [shape: bf16[2,32,256], index: 1, kind: input, shape index: {}]   ;;  %s6314_s2 = inlined_call_operand.vmem [shape: bf16[2,16,768], index: 2, kind: input, shape index: {}]   ;;  %s6315_s3 = inlined_call_operand.hbm [shape: f32[2,16,256], index: 3, kind: output, shape index: {}]  }
   0x1   :  { %10 = vsyncpa [#allocation6 + $0x1], 0  ;;  %s3368_s12 = smov 0   ;;  %s3370_s13 = smov 0  }
   0x2   :  { %s3372_s14 = smov 0   ;;  %s3374_s15 = smov 0  }
   0x3   :  { %s3376_s16 = smov 0   ;;  %s3378_s17 = smov 0  }
   0x4 LB: > { %s2678_s18 = sadd.s32 4294967295, %s3339_s17   ;;  %s2679_s19 = sadd.s32 4294967294, %s3339_s17   ;;  %s3339_s17 = sphi %s3378_s17, %s16_s17   ;;  %s3335_s16 = sphi %s3376_s16, %s7711_s16   ;;  %s3331_s15 = sphi %s3374_s15, %s7710_s15   ;;  %s3327_s14 = sphi %s3372_s14, %s7709_s14   ;;  %s3323_s13 = sphi %s3370_s13, %s7708_s13   ;;  %s3319_s12 = sphi %s3368_s12, %s7707_s12  }
   0x5   : > { %s42_s20 = sadd.s32 1, %s3335_s16  ;;  %s139_s21 = sadd.s32 1, %s3327_s14 }
   0x6   : > { %p44_p0 = scmp.ge.s32.totalorder %s42_s20, 2  ;;  %p149_p1 = scmp.ne.s32.totalorder %s3327_s14, %s3323_s13 }
   0x7   : > { %p150_p2 = scmp.eq.s32.totalorder %s2678_s18, 1  ;;  %p155_p3 = scmp.ne.s32.totalorder %s3323_s13, %s3319_s12 }
   0x8   : > { %s7713_s20 = smov (%p44_p0, %s42_s20), 0  ;;  %p156_p5 = scmp.eq.s32.totalorder %s2679_s19, 1 }
   0x9   : > { %p3408_p4 = por %p150_p2, %p149_p1  ;;  %s132_s23 = ssub.s32 %s3335_s16, %s7713_s20 }
   0xa   : > { %p2682_p6 = scmp.ge.s32.totalorder %s3339_s17, 1  ;;  %p137_p7 = scmp.eq.s32.totalorder %s132_s23, 0 }
   0xb   : > { %p3415_p8 = por %p156_p5, %p155_p3  ;;  %p219_p9 = scmp.lt.s32.totalorder %s3339_s17, 3 }
   0xc   : > { %s3421_s25 = scalar_select %p137_p7, %s3327_s14, %s139_s21  }
   0xd   : > { %p220_p10 = pnand %p2682_p6, %p219_p9 }
   0xf   : > { %223 = sbr.rel (%p220_p10) target bundleno = 1178 (0x49a), region = 32 }
  0x16   : > { %p271_p11 = scmp.lt.s32.totalorder %s3331_s15, 1  ;;  %v3341_v0 = vmov 0   ;;  %vm521_vm0 = vcmask 261120   ;;  %s267_s18 = sand.u32 1, %s3323_s13  }
  0x17   : > { %698 = vmatprep.mubr.bf16.mxu0 %v3341_v0  ;;  %1028 = vmatprep.mubr.bf16.mxu1 %v3341_v0  ;;  %s2683_s19 = sshll.u32 %s267_s18, 5 }
  0x18   : > { %s3427_s26 = scalar_select %p271_p11, %s3331_s15, 1 }
  0x19   : > { %s269_s21 = scalar_lea.vmem [#allocation5], %s2683_s19 }
  0x1a   : > { %s2777_s27 = smul.u32 96, %s3427_s26  ;;  %s2763_s28 = sshll.u32 %s3427_s26, 5 }
  0x1b   : > { %s288_s4 = scalar_lea.vmem %s6313_s1, %s2763_s28  ;;  %s2778_s8 = smul.u32 48, %s3427_s26 }
  0x1c   : > { %s3437_s7 = scalar_lea.vmem %s6312_s0, %s2777_s27  ;;  %v2846_v1 = vld [vmem:[%s288_s4 + $0x4] ss:$8 sps:$4 sm:$0xff]   ;;  %v2848_v6 = vld [vmem:[%s288_s4] ss:$8 sps:$4 sm:$0xff]   ;;  %v2849_v7 = vld [vmem:[%s288_s4 + $0x14] ss:$8 sps:$4 sm:$0xff]  }
  0x1d   : > { %v2840_v2 = vld [vmem:[%s3437_s7] ss:$24 sps:$4 sm:$0xff]   ;;  %v2842_v3 = vld [vmem:[%s3437_s7 + $0x30] ss:$24 sps:$4 sm:$0xff]   ;;  %666 = vmatprep.subr.bf16.mxu0 %v2846_v1  ;;  %2765 = vmatprep.subr.bf16.mxu1 %v2846_v1  ;;  %v2844_v4 = vld [vmem:[%s3437_s7 + $0x4] ss:$24 sps:$4 sm:$0xff]   ;;  %s5576_s11 = scalar_lea.vmem %s6314_s2, %s2778_s8 }
  0x1e   : > { %405 = vxpose.xlu0.c.b16.start [1/2] (short) %v2840_v2, 128  ;;  %v2845_v5 = vld [vmem:[%s3437_s7 + $0x34] ss:$24 sps:$4 sm:$0xff]   ;;  %421 = vxpose.xlu1.c.b16.start [1/2] (short) %v2844_v4, 128  ;;  %v2851_v8 = vld [vmem:[%s288_s4 + $0x10] ss:$8 sps:$4 sm:$0xff]   ;;  %v2852_v9 = vld [vmem:[%s3437_s7 + $0x8] ss:$24 sps:$4 sm:$0xff]  }
  0x1f   : > { %667 = vmatpush1.bf16.msra.mxu0 %v2848_v6  ;;  %2767 = vmatpush1.bf16.msra.mxu1 %v2848_v6  ;;  %v2856_v10 = vld [vmem:[%s3437_s7 + $0x10] ss:$24 sps:$4 sm:$0xff]   ;;  %v2858_v12 = vld [vmem:[%s3437_s7 + $0x40] ss:$24 sps:$4 sm:$0xff]   ;;  %v2862_v13 = vld [vmem:[%s3437_s7 + $0x14] ss:$24 sps:$4 sm:$0xff]  }
  0x20   : > { %668 = vmatprep.subr.bf16.mxu0 %v2849_v7  ;;  %2766 = vmatprep.subr.bf16.mxu1 %v2849_v7  ;;  %v2854_v11 = vld [vmem:[%s3437_s7 + $0x38] ss:$24 sps:$4 sm:$0xff]   ;;  %v2863_v14 = vld [vmem:[%s3437_s7 + $0x44] ss:$24 sps:$4 sm:$0xff]   ;;  %s2549_s23 = sshll.u32 %s269_s21, 4  ;;  %s2764_s26 = sshll.u32 %s3331_s15, 9  ;;  %s6257_s23 = int_to_ptr.vmem [resolvable:$true] %s2549_s23 }
  0x21   : > { %v2860_v15 = vld [vmem:[%s3437_s7 + $0xc] ss:$24 sps:$4 sm:$0xff]   ;;  %v2861_v16 = vld [vmem:[%s3437_s7 + $0x3c] ss:$24 sps:$4 sm:$0xff]   ;;  %s6262_s29 = scalar_lea.hbm %s6315_s3, %s2764_s26  ;;  %s6266_s15 = scalar_lea.sflag [#allocation6], %s267_s18 }
  0x22   : > { %406 = vxpose.xlu0.c.b16.end [2/2] (short) %v2842_v3, 128  ;;  %422 = vxpose.xlu1.c.b16.end [2/2] (short) %v2845_v5, 128  ;;  %s3261_s30 = scalar_lea.vmem %s6257_s23, 512  ;;  %s3345_s4 = smov [#allocation5]  }
  0x23   : > { %669 = vmatpush1.bf16.msra.mxu0 %v2851_v8  ;;  %2768 = vmatpush1.bf16.msra.mxu1 %v2851_v8  ;;  %p3262_p12 = scmp.ne.s32.totalorder %s6257_s23, %s3261_s30  ;;  %s3265_s5 = sshll.u32 %s3345_s4, 4  ;;  %s3266_s5 = int_to_ptr.vmem [resolvable:$false] %s3265_s5 }
  0x24   : > { %s3267_s6 = scalar_lea.vmem %s3266_s5, 1024  ;;  %p3268_p1 = scmp.lt.s32.totalorder %s6257_s23, %s3266_s5 }
  0x25   : > { %p3263_p13 = pnand %p3262_p12, %p3408_p4  ;;  %p3269_p2 = scmp.lt.s32.totalorder %s3267_s6, %s3261_s30 }
  0x27   : > { %p3264_p0 = pneg %p3263_p13  ;;  %p3270_p3 = por %p3269_p2, %p3268_p1 }
  0x29   : > { %p3271_p5 = pnand %p3270_p3, %p3264_p0 }
  0x3b   : > { %437 = vxpose.xlu0.c.b16.start [1/2] (short) %v2852_v9, 128  ;;  %469 = vxpose.xlu1.c.b16.start [1/2] (short) %v2856_v10, 128 }
  0x3f   : > { %438 = vxpose.xlu0.c.b16.end [2/2] (short) %v2854_v11, 128  ;;  %470 = vxpose.xlu1.c.b16.end [2/2] (short) %v2858_v12, 128 }
  0x58   : > { %485 = vxpose.xlu1.c.b16.start [1/2] (short) %v2862_v13, 128  ;;  %453 = vxpose.xlu0.c.b16.start [1/2] (short) %v2860_v15, 128 }
  0x5c   : > { %486 = vxpose.xlu1.c.b16.end [2/2] (short) %v2863_v14, 128  ;;  %454 = vxpose.xlu0.c.b16.end [2/2] (short) %v2861_v16, 128 }
  0x84   : > { %v413_v17 = vpop.trf.xlu0  ;;  %v429_v18 = vpop.trf.xlu1 }
  0x85   : > { %2704 = vmatmul.mubr.msk.bf16.vlgmr.msra.gmra.mrb[0].mxu0 %vm521_vm0, %v413_v17 }
  0x86   : > { %708 = vmatprep.mubr.bf16.mxu0 %v3341_v0 }
  0x88   : > { %v414_v19 = vpop.trf.xlu0  ;;  %v430_v20 = vpop.trf.xlu1 }
  0x8c   : > { %v431_v21 = vpop.trf.xlu1  ;;  %v415_v22 = vpop.trf.xlu0 }
  0x8d   : > { %2705 = vmatmul.mubr.msk.bf16.gmra.mrb[4].mxu0 %vm521_vm0, %v414_v19 }
  0x8e   : > { %718 = vmatprep.mubr.bf16.mxu0 %v3341_v0 }
  0x90   : > { %v432_v23 = vpop.trf.xlu1  ;;  %v416_v25 = vpop.trf.xlu0 }
  0x94   : > { %v433_v24 = vpop.trf.xlu1  ;;  %v417_v28 = vpop.trf.xlu0 }
  0x95   : > { %2706 = vmatmul.mubr.msk.bf16.gmra.mrb[8].mxu0 %vm521_vm0, %v415_v22 }
  0x96   : > { %728 = vmatprep.mubr.bf16.mxu0 %v3341_v0 }
  0x98   : > { %v434_v26 = vpop.trf.xlu1  ;;  %v418_v31 = vpop.trf.xlu0 }
  0x9c   : > { %v435_v27 = vpop.trf.xlu1  ;;  %v419_v34 = vpop.trf.xlu0 }
  0x9d   : > { %2707 = vmatmul.mubr.msk.bf16.gmra.mrb[12].mxu0 %vm521_vm0, %v416_v25 }
  0x9e   : > { %738 = vmatprep.mubr.bf16.mxu0 %v3341_v0 }
  0xa0   : > { %v436_v29 = vpop.trf.xlu1  ;;  %v420_v36 = vpop.trf.xlu0 }
  0xa4   : > { %v3461_v30 = vpop.trf.xlu1  ;;  %v445_v46 = vpop.trf.xlu0 }
  0xa5   : > { %2708 = vmatmul.mubr.msk.bf16.gmra.mrb[16].mxu0 %vm521_vm0, %v417_v28 }
  0xa6   : > { %748 = vmatprep.mubr.bf16.mxu0 %v3341_v0 }
  0xa8   : > { %v478_v32 = vpop.trf.xlu1  ;;  %v446_v48 = vpop.trf.xlu0 }
  0xa9   : > { %2737 = vmatmul.mubr.msk.bf16.vlgmr.msra.gmra.mrb[0].mxu1 %vm521_vm0, %v478_v32 }
  0xaa   : > { %1038 = vmatprep.mubr.bf16.mxu1 %v3341_v0 }
  0xac   : > { %v479_v33 = vpop.trf.xlu1  ;;  %v447_v50 = vpop.trf.xlu0 }
  0xad   : > { %2709 = vmatmul.mubr.msk.bf16.gmra.mrb[20].mxu0 %vm521_vm0, %v418_v31 }
  0xae   : > { %758 = vmatprep.mubr.bf16.mxu0 %v3341_v0 }
  0xb0   : > { %v480_v35 = vpop.trf.xlu1  ;;  %v448_v52 = vpop.trf.xlu0 }
  0xb1   : > { %2738 = vmatmul.mubr.msk.bf16.gmra.mrb[4].mxu1 %vm521_vm0, %v479_v33 }
  0xb2   : > { %1048 = vmatprep.mubr.bf16.mxu1 %v3341_v0 }
  0xb4   : > { %v481_v37 = vpop.trf.xlu1  ;;  %v449_v53 = vpop.trf.xlu0 }
  0xb5   : > { %2710 = vmatmul.mubr.msk.bf16.gmra.mrb[24].mxu0 %vm521_vm0, %v419_v34 }
  0xb6   : > { %768 = vmatprep.mubr.bf16.mxu0 %v3341_v0 }
  0xb8   : > { %v482_v38 = vpop.trf.xlu1  ;;  %v450_v54 = vpop.trf.xlu0 }
  0xb9   : > { %2739 = vmatmul.mubr.msk.bf16.gmra.mrb[8].mxu1 %vm521_vm0, %v480_v35 }
  0xba   : > { %1058 = vmatprep.mubr.bf16.mxu1 %v3341_v0 }
  0xbc   : > { %v483_v39 = vpop.trf.xlu1  ;;  %v451_v55 = vpop.trf.xlu0 }
  0xbd   : > { %2711 = vmatmul.mubr.msk.bf16.gmra.mrb[28].mxu0 %vm521_vm0, %v420_v36 }
  0xbe   : > { %778 = vmatprep.mubr.bf16.mxu0 %v3341_v0 }
  0xc0   : > { %v484_v40 = vpop.trf.xlu1  ;;  %v452_v56 = vpop.trf.xlu0 }
  0xc1   : > { %2740 = vmatmul.mubr.msk.bf16.gmra.mrb[12].mxu1 %vm521_vm0, %v481_v37 }
  0xc2   : > { %1068 = vmatprep.mubr.bf16.mxu1 %v3341_v0 }
  0xc4   : > { %v493_v41 = vpop.trf.xlu1  ;;  %v461_v57 = vpop.trf.xlu0 }
  0xc5   : > { %2712 = vmatmul.mubr.msk.bf16.gmra.mrb[32].mxu0 %vm521_vm0, %v429_v18 }
  0xc6   : > { %788 = vmatprep.mubr.bf16.mxu0 %v3341_v0 }
  0xc8   : > { %v494_v42 = vpop.trf.xlu1  ;;  %v462_v58 = vpop.trf.xlu0 }
  0xc9   : > { %2741 = vmatmul.mubr.msk.bf16.gmra.mrb[16].mxu1 %vm521_vm0, %v482_v38 }
  0xca   : > { %1078 = vmatprep.mubr.bf16.mxu1 %v3341_v0 }
  0xcc   : > { %v495_v43 = vpop.trf.xlu1  ;;  %v463_v59 = vpop.trf.xlu0 }
  0xcd   : > { %2713 = vmatmul.mubr.msk.bf16.gmra.mrb[36].mxu0 %vm521_vm0, %v430_v20 }
  0xce   : > { %798 = vmatprep.mubr.bf16.mxu0 %v3341_v0 }
  0xd0   : > { %v496_v44 = vpop.trf.xlu1  ;;  %v464_v63 = vpop.trf.xlu0 }
  0xd1   : > { %2742 = vmatmul.mubr.msk.bf16.gmra.mrb[20].mxu1 %vm521_vm0, %v483_v39 }
  0xd2   : > { %1088 = vmatprep.mubr.bf16.mxu1 %v3341_v0 }
  0xd4   : > { %v497_v45 = vpop.trf.xlu1  ;;  %v465_v7 = vpop.trf.xlu0 }
  0xd5   : > { %2714 = vmatmul.mubr.msk.bf16.gmra.mrb[40].mxu0 %vm521_vm0, %v431_v21 }
  0xd6   : > { %808 = vmatprep.mubr.bf16.mxu0 %v3341_v0 }
  0xd8   : > { %v498_v47 = vpop.trf.xlu1  ;;  %v466_v16 = vpop.trf.xlu0 }
  0xd9   : > { %2743 = vmatmul.mubr.msk.bf16.gmra.mrb[24].mxu1 %vm521_vm0, %v484_v40 }
  0xda   : > { %1098 = vmatprep.mubr.bf16.mxu1 %v3341_v0 }
  0xdc   : > { %v499_v49 = vpop.trf.xlu1  ;;  %v467_v25 = vpop.trf.xlu0 }
  0xdd   : > { %2715 = vmatmul.mubr.msk.bf16.gmra.mrb[44].mxu0 %vm521_vm0, %v432_v23 }
  0xde   : > { %818 = vmatprep.mubr.bf16.mxu0 %v3341_v0 }
  0xe0   : > { %v500_v51 = vpop.trf.xlu1  ;;  %v468_v35 = vpop.trf.xlu0 }
  0xe1   : > { %2744 = vmatmul.mubr.msk.bf16.gmra.mrb[28].mxu1 %vm521_vm0, %v493_v41 }
  0xe2   : > { %1108 = vmatprep.mubr.bf16.mxu1 %v3341_v0 }
  0xe5   : > { %2716 = vmatmul.mubr.msk.bf16.gmra.mrb[48].mxu0 %vm521_vm0, %v433_v24 }
  0xe6   : > { %828 = vmatprep.mubr.bf16.mxu0 %v3341_v0 }
  0xe9   : > { %2745 = vmatmul.mubr.msk.bf16.gmra.mrb[32].mxu1 %vm521_vm0, %v494_v42 }
  0xea   : > { %1118 = vmatprep.mubr.bf16.mxu1 %v3341_v0 }
  0xed   : > { %2717 = vmatmul.mubr.msk.bf16.gmra.mrb[52].mxu0 %vm521_vm0, %v434_v26 }
  0xee   : > { %838 = vmatprep.mubr.bf16.mxu0 %v3341_v0 }
  0xf1   : > { %2746 = vmatmul.mubr.msk.bf16.gmra.mrb[36].mxu1 %vm521_vm0, %v495_v43 }
  0xf2   : > { %1128 = vmatprep.mubr.bf16.mxu1 %v3341_v0 }
  0xf5   : > { %2718 = vmatmul.mubr.msk.bf16.gmra.mrb[56].mxu0 %vm521_vm0, %v435_v27 }
  0xf6   : > { %848 = vmatprep.mubr.bf16.mxu0 %v3341_v0 }
  0xf9   : > { %2747 = vmatmul.mubr.msk.bf16.gmra.mrb[40].mxu1 %vm521_vm0, %v496_v44 }
  0xfa   : > { %1138 = vmatprep.mubr.bf16.mxu1 %v3341_v0 }
  0xfd   : > { %2719 = vmatmul.mubr.msk.bf16.gmra.mrb[60].mxu0 %vm521_vm0, %v436_v29 }
  0xfe   : > { %858 = vmatprep.mubr.bf16.mxu0 %v3341_v0 }
 0x101   : > { %2748 = vmatmul.mubr.msk.bf16.gmra.mrb[44].mxu1 %vm521_vm0, %v497_v45 }
 0x102   : > { %1148 = vmatprep.mubr.bf16.mxu1 %v3341_v0 }
 0x105   : > { %2720 = vmatmul.mubr.msk.bf16.gmra.mrb[64].mxu0 %vm521_vm0, %v445_v46 }
 0x106   : > { %868 = vmatprep.mubr.bf16.mxu0 %v3341_v0 }
 0x109   : > { %2749 = vmatmul.mubr.msk.bf16.gmra.mrb[48].mxu1 %vm521_vm0, %v498_v47 }
 0x10a   : > { %1158 = vmatprep.mubr.bf16.mxu1 %v3341_v0 }
 0x10d   : > { %2721 = vmatmul.mubr.msk.bf16.gmra.mrb[68].mxu0 %vm521_vm0, %v446_v48 }
 0x10e   : > { %878 = vmatprep.mubr.bf16.mxu0 %v3341_v0 }
 0x111   : > { %2750 = vmatmul.mubr.msk.bf16.gmra.mrb[52].mxu1 %vm521_vm0, %v499_v49 }
 0x112   : > { %1168 = vmatprep.mubr.bf16.mxu1 %v3341_v0 }
 0x115   : > { %2722 = vmatmul.mubr.msk.bf16.gmra.mrb[72].mxu0 %vm521_vm0, %v447_v50 }
 0x116   : > { %888 = vmatprep.mubr.bf16.mxu0 %v3341_v0 }
 0x119   : > { %2751 = vmatmul.mubr.msk.bf16.gmra.mrb[56].mxu1 %vm521_vm0, %v500_v51 }
 0x11d   : > { %2723 = vmatmul.mubr.msk.bf16.gmra.mrb[76].mxu0 %vm521_vm0, %v448_v52 }
 0x11e   : > { %898 = vmatprep.mubr.bf16.mxu0 %v3341_v0 }
 0x125   : > { %2724 = vmatmul.mubr.msk.bf16.gmra.mrb[80].mxu0 %vm521_vm0, %v449_v53 }
 0x126   : > { %908 = vmatprep.mubr.bf16.mxu0 %v3341_v0 }
 0x12d   : > { %2725 = vmatmul.mubr.msk.bf16.gmra.mrb[84].mxu0 %vm521_vm0, %v450_v54 }
 0x12e   : > { %918 = vmatprep.mubr.bf16.mxu0 %v3341_v0 }
 0x135   : > { %2726 = vmatmul.mubr.msk.bf16.gmra.mrb[88].mxu0 %vm521_vm0, %v451_v55 }
 0x136   : > { %928 = vmatprep.mubr.bf16.mxu0 %v3341_v0 }
 0x13d   : > { %2727 = vmatmul.mubr.msk.bf16.gmra.mrb[92].mxu0 %vm521_vm0, %v452_v56 }
 0x13e   : > { %938 = vmatprep.mubr.bf16.mxu0 %v3341_v0 }
 0x145   : > { %2728 = vmatmul.mubr.msk.bf16.gmra.mrb[96].mxu0 %vm521_vm0, %v461_v57 }
 0x146   : > { %948 = vmatprep.mubr.bf16.mxu0 %v3341_v0 }
 0x14d   : > { %2729 = vmatmul.mubr.msk.bf16.gmra.mrb[100].mxu0 %vm521_vm0, %v462_v58 }
 0x14e   : > { %958 = vmatprep.mubr.bf16.mxu0 %v3341_v0 }
 0x155   : > { %2730 = vmatmul.mubr.msk.bf16.gmra.mrb[104].mxu0 %vm521_vm0, %v463_v59 }
 0x156   : > { %968 = vmatprep.mubr.bf16.mxu0 %v3341_v0 }
 0x158   : > { %v3536_v60 = vpop.f32.mrb[0].mxu0 }
 0x159   : > { %v3538_v61 = vpop.f32.mrb[1].mxu0 }
 0x15a   : > { %v3540_v62 = vpop.f32.mrb[2].mxu0 }
 0x15b   : > { %v3542_v1 = vpop.f32.mrb[3].mxu0 }
 0x15d   : > { %2731 = vmatmul.mubr.msk.bf16.gmra.mrb[108].mxu0 %vm521_vm0, %v464_v63 }
 0x15e   : > { %978 = vmatprep.mubr.bf16.mxu0 %v3341_v0 }
 0x160   : > { %v3546_v2 = vpop.f32.mrb[4].mxu0 }
 0x161   : > { %v1179_v3 = vmax.f32 %v3536_v60, %v3546_v2  ;;  %v3550_v4 = vpop.f32.mrb[5].mxu0 }
 0x162   : > { %v1280_v5 = vmax.f32 %v3538_v61, %v3550_v4  ;;  %v3554_v6 = vpop.f32.mrb[6].mxu0 }
 0x163   : > { %v1180_v8 = vmax.f32 %v3540_v62, %v3554_v6  ;;  %v3558_v9 = vpop.f32.mrb[7].mxu0 }
 0x164   : > { %v1281_v10 = vmax.f32 %v3542_v1, %v3558_v9 }
 0x165   : > { %2732 = vmatmul.mubr.msk.bf16.gmra.mrb[112].mxu0 %vm521_vm0, %v465_v7 }
 0x166   : > { %988 = vmatprep.mubr.bf16.mxu0 %v3341_v0 }
 0x168   : > { %v3564_v11 = vpop.f32.mrb[8].mxu0 }
 0x169   : > { %v1181_v12 = vmax.f32 %v1179_v3, %v3564_v11  ;;  %v3567_v13 = vpop.f32.mrb[9].mxu0 }
 0x16a   : > { %v1282_v14 = vmax.f32 %v1280_v5, %v3567_v13  ;;  %v3570_v15 = vpop.f32.mrb[10].mxu0 }
 0x16b   : > { %v1182_v17 = vmax.f32 %v1180_v8, %v3570_v15  ;;  %v3573_v18 = vpop.f32.mrb[11].mxu0 }
 0x16c   : > { %v1283_v19 = vmax.f32 %v1281_v10, %v3573_v18 }
 0x16d   : > { %2733 = vmatmul.mubr.msk.bf16.gmra.mrb[116].mxu0 %vm521_vm0, %v466_v16 }
 0x16e   : > { %998 = vmatprep.mubr.bf16.mxu0 %v3341_v0 }
 0x170   : > { %v3578_v20 = vpop.f32.mrb[12].mxu0 }
 0x171   : > { %v1183_v21 = vmax.f32 %v1181_v12, %v3578_v20  ;;  %v3581_v22 = vpop.f32.mrb[13].mxu0 }
 0x172   : > { %v1284_v23 = vmax.f32 %v1282_v14, %v3581_v22  ;;  %v3584_v24 = vpop.f32.mrb[14].mxu0 }
 0x173   : > { %v1184_v26 = vmax.f32 %v1182_v17, %v3584_v24  ;;  %v3587_v27 = vpop.f32.mrb[15].mxu0 }
 0x174   : > { %v1285_v28 = vmax.f32 %v1283_v19, %v3587_v27 }
 0x175   : > { %2734 = vmatmul.mubr.msk.bf16.gmra.mrb[120].mxu0 %vm521_vm0, %v467_v25 }
 0x176   : > { %1008 = vmatprep.mubr.bf16.mxu0 %v3341_v0 }
 0x178   : > { %v3592_v29 = vpop.f32.mrb[16].mxu0 }
 0x179   : > { %v1185_v31 = vmax.f32 %v1183_v21, %v3592_v29  ;;  %v3595_v32 = vpop.f32.mrb[17].mxu0 }
 0x17a   : > { %v1286_v33 = vmax.f32 %v1284_v23, %v3595_v32  ;;  %v3598_v34 = vpop.f32.mrb[18].mxu0 }
 0x17b   : > { %v1186_v36 = vmax.f32 %v1184_v26, %v3598_v34  ;;  %v3601_v37 = vpop.f32.mrb[19].mxu0 }
 0x17c   : > { %v1287_v38 = vmax.f32 %v1285_v28, %v3601_v37  ;;  %v3606_v39 = vpop.f32.mrb[0].mxu1 }
 0x17d   : > { %2735 = vmatmul.mubr.msk.bf16.gmra.mrb[124].mxu0 %vm521_vm0, %v468_v35  ;;  %6760 = vst [vmem:[#allocation8_spill] sm:$0xff] %v3606_v39  ;;  %v3608_v40 = vpop.f32.mrb[1].mxu1 }
 0x17e   : > { %1018 = vmatprep.mubr.bf16.mxu0 %v3341_v0  ;;  %6761 = vst [vmem:[#allocation9_spill] sm:$0xff] %v3608_v40  ;;  %v3612_v42 = vpop.f32.mrb[2].mxu1 }
 0x17f   : > { %6762 = vst [vmem:[#allocation10_spill] sm:$0xff] %v3612_v42  ;;  %v1243_v45 = vmax.f32 %v3612_v42, %v3606_v39  ;;  %v3619_v46 = vpop.f32.mrb[3].mxu1 }
 0x180   : > { %v3610_v41 = vpop.f32.mrb[20].mxu0  ;;  %6763 = vst [vmem:[#allocation11_spill] sm:$0xff] %v3619_v46  ;;  %v1344_v48 = vmax.f32 %v3619_v46, %v3608_v40 }
 0x181   : > { %v1187_v43 = vmax.f32 %v1185_v31, %v3610_v41  ;;  %v3615_v44 = vpop.f32.mrb[21].mxu0 }
 0x182   : > { %v1288_v47 = vmax.f32 %v1286_v33, %v3615_v44  ;;  %v3622_v0 = vpop.f32.mrb[22].mxu0 }
 0x183   : > { %v1188_v49 = vmax.f32 %v1186_v36, %v3622_v0  ;;  %v3627_v50 = vpop.f32.mrb[23].mxu0 }
 0x184   : > { %v1289_v51 = vmax.f32 %v1287_v38, %v3627_v50  ;;  %v3632_v52 = vpop.f32.mrb[4].mxu1 }
 0x185   : > { %2736 = vmatmul.mubr.msk.bf16.gmra.mrb[128].mxu0 %vm521_vm0, %v3461_v30  ;;  %6764 = vst [vmem:[#allocation12_spill] sm:$0xff] %v3632_v52  ;;  %v1245_v53 = vmax.f32 %v1243_v45, %v3632_v52  ;;  %v3635_v54 = vpop.f32.mrb[5].mxu1 }
 0x186   : > { %6765 = vst [vmem:[#allocation13_spill] sm:$0xff] %v3635_v54  ;;  %v1346_v56 = vmax.f32 %v1344_v48, %v3635_v54  ;;  %v3640_v57 = vpop.f32.mrb[6].mxu1 }
 0x187   : > { %6766 = vst [vmem:[#allocation14_spill] sm:$0xff] %v3640_v57  ;;  %v1247_v63 = vmax.f32 %v1245_v53, %v3640_v57  ;;  %v3646_v3 = vpop.f32.mrb[7].mxu1 }
 0x188   : > { %v3637_v55 = vpop.f32.mrb[24].mxu0  ;;  %6767 = vst [vmem:[#allocation15_spill] sm:$0xff] %v3646_v3  ;;  %v1348_v7 = vmax.f32 %v1346_v56, %v3646_v3 }
 0x189   : > { %v1189_v58 = vmax.f32 %v1187_v43, %v3637_v55  ;;  %v3643_v59 = vpop.f32.mrb[25].mxu0 }
 0x18a   : > { %v1290_v30 = vmax.f32 %v1288_v47, %v3643_v59  ;;  %v3649_v5 = vpop.f32.mrb[26].mxu0 }
 0x18b   : > { %6768 = vst [vmem:[#allocation16_spill] sm:$0xff] %v3649_v5  ;;  %v1190_v8 = vmax.f32 %v1188_v49, %v3649_v5  ;;  %v3653_v10 = vpop.f32.mrb[27].mxu0 }
 0x18c   : > { %6769 = vst [vmem:[#allocation17_spill] sm:$0xff] %v3653_v10  ;;  %v1291_v12 = vmax.f32 %v1289_v51, %v3653_v10  ;;  %v3656_v14 = vpop.f32.mrb[8].mxu1 }
 0x18d   : > { %6770 = vst [vmem:[#allocation18_spill] sm:$0xff] %v3656_v14  ;;  %v1249_v16 = vmax.f32 %v1247_v63, %v3656_v14  ;;  %v3659_v17 = vpop.f32.mrb[9].mxu1 }
 0x18e   : > { %6771 = vst [vmem:[#allocation19_spill] sm:$0xff] %v3659_v17  ;;  %v1350_v21 = vmax.f32 %v1348_v7, %v3659_v17  ;;  %v3664_v23 = vpop.f32.mrb[10].mxu1 }
 0x18f   : > { %6773 = vst [vmem:[#allocation21_spill] sm:$0xff] %v3664_v23  ;;  %v1251_v28 = vmax.f32 %v1249_v16, %v3664_v23  ;;  %v3670_v31 = vpop.f32.mrb[11].mxu1 }
 0x190   : > { %v3661_v19 = vpop.f32.mrb[28].mxu0  ;;  %6775 = vst [vmem:[#allocation23_spill] sm:$0xff] %v3670_v31  ;;  %v1352_v36 = vmax.f32 %v1350_v21, %v3670_v31 }
 0x191   : > { %6772 = vst [vmem:[#allocation20_spill] sm:$0xff] %v3661_v19  ;;  %v1191_v25 = vmax.f32 %v1189_v58, %v3661_v19  ;;  %v3667_v26 = vpop.f32.mrb[29].mxu0 }
 0x192   : > { %6774 = vst [vmem:[#allocation22_spill] sm:$0xff] %v3667_v26  ;;  %v1292_v33 = vmax.f32 %v1290_v30, %v3667_v26  ;;  %v3673_v35 = vpop.f32.mrb[30].mxu0 }
 0x193   : > { %6776 = vst [vmem:[#allocation24_spill] sm:$0xff] %v3673_v35  ;;  %v1192_v38 = vmax.f32 %v1190_v8, %v3673_v35  ;;  %v3677_v43 = vpop.f32.mrb[31].mxu0 }
 0x194   : > { %6777 = vst [vmem:[#allocation25_spill] sm:$0xff] %v3677_v43  ;;  %v1293_v45 = vmax.f32 %v1291_v12, %v3677_v43  ;;  %v3680_v47 = vpop.f32.mrb[12].mxu1  ;;  %v6500_v43 = vlaneseq }
 0x195   : > { %6778 = vst [vmem:[#allocation26_spill] sm:$0xff] %v3680_v47  ;;  %v1244_v48 = vmax.f32 %v3680_v47, %v1251_v28  ;;  %v3683_v49 = vpop.f32.mrb[13].mxu1 }
 0x196   : > { %6779 = vst [vmem:[#allocation27_spill] sm:$0xff] %v3683_v49  ;;  %v1345_v53 = vmax.f32 %v3683_v49, %v1352_v36  ;;  %v3688_v56 = vpop.f32.mrb[14].mxu1  ;;  %vm3964_vm1 = vcmp.lt.s32.totalorder %v6500_v43, 256 }
 0x197   : > { %6781 = vst [vmem:[#allocation29_spill] sm:$0xff] %v3688_v56  ;;  %v1246_v30 = vmax.f32 %v1244_v48, %v3688_v56  ;;  %v3694_v7 = vpop.f32.mrb[15].mxu1 }
 0x198   : > { %v3685_v51 = vpop.f32.mrb[32].mxu0  ;;  %6783 = vst [vmem:[#allocation31_spill] sm:$0xff] %v3694_v7  ;;  %v1347_v16 = vmax.f32 %v1345_v53, %v3694_v7 }
 0x199   : > { %6780 = vst [vmem:[#allocation28_spill] sm:$0xff] %v3685_v51  ;;  %v1193_v58 = vmax.f32 %v1191_v25, %v3685_v51  ;;  %v3691_v63 = vpop.f32.mrb[33].mxu0 }
 0x19a   : > { %6782 = vst [vmem:[#allocation30_spill] sm:$0xff] %v3691_v63  ;;  %v1294_v8 = vmax.f32 %v1292_v33, %v3691_v63  ;;  %v3697_v12 = vpop.f32.mrb[34].mxu0 }
 0x19b   : > { %6784 = vst [vmem:[#allocation32_spill] sm:$0xff] %v3697_v12  ;;  %v1194_v21 = vmax.f32 %v1192_v38, %v3697_v12  ;;  %v3701_v28 = vpop.f32.mrb[35].mxu0 }
 0x19c   : > { %6785 = vst [vmem:[#allocation33_spill] sm:$0xff] %v3701_v28  ;;  %v1295_v36 = vmax.f32 %v1293_v45, %v3701_v28  ;;  %v3704_v49 = vpop.f32.mrb[16].mxu1 }
 0x19d   : > { %6786 = vst [vmem:[#allocation34_spill] sm:$0xff] %v3704_v49  ;;  %v1248_v25 = vmax.f32 %v1246_v30, %v3704_v49  ;;  %v3707_v47 = vpop.f32.mrb[17].mxu1 }
 0x19e   : > { %6787 = vst [vmem:[#allocation35_spill] sm:$0xff] %v3707_v47  ;;  %v1349_v33 = vmax.f32 %v1347_v16, %v3707_v47  ;;  %v3712_v56 = vpop.f32.mrb[18].mxu1 }
 0x19f   : > { %6789 = vst [vmem:[#allocation37_spill] sm:$0xff] %v3712_v56  ;;  %v1250_v38 = vmax.f32 %v1248_v25, %v3712_v56  ;;  %v3718_v31 = vpop.f32.mrb[19].mxu1 }
 0x1a0   : > { %v3709_v48 = vpop.f32.mrb[36].mxu0  ;;  %6791 = vst [vmem:[#allocation39_spill] sm:$0xff] %v3718_v31  ;;  %v1351_v30 = vmax.f32 %v1349_v33, %v3718_v31 }
 0x1a1   : > { %6788 = vst [vmem:[#allocation36_spill] sm:$0xff] %v3709_v48  ;;  %v1195_v53 = vmax.f32 %v1193_v58, %v3709_v48  ;;  %v3715_v7 = vpop.f32.mrb[37].mxu0 }
 0x1a2   : > { %6790 = vst [vmem:[#allocation38_spill] sm:$0xff] %v3715_v7  ;;  %v1296_v45 = vmax.f32 %v1294_v8, %v3715_v7  ;;  %v3721_v23 = vpop.f32.mrb[38].mxu0 }
 0x1a3   : > { %6792 = vst [vmem:[#allocation40_spill] sm:$0xff] %v3721_v23  ;;  %v1196_v49 = vmax.f32 %v1194_v21, %v3721_v23  ;;  %v3725_v17 = vpop.f32.mrb[39].mxu0 }
 0x1a4   : > { %6793 = vst [vmem:[#allocation41_spill] sm:$0xff] %v3725_v17  ;;  %v1297_v16 = vmax.f32 %v1295_v36, %v3725_v17  ;;  %v3728_v47 = vpop.f32.mrb[20].mxu1 }
 0x1a5   : > { %6794 = vst [vmem:[#allocation42_spill] sm:$0xff] %v3728_v47  ;;  %v1252_v58 = vmax.f32 %v1250_v38, %v3728_v47  ;;  %v3731_v14 = vpop.f32.mrb[21].mxu1 }
 0x1a6   : > { %6795 = vst [vmem:[#allocation43_spill] sm:$0xff] %v3731_v14  ;;  %v1353_v8 = vmax.f32 %v1351_v30, %v3731_v14  ;;  %v3736_v56 = vpop.f32.mrb[22].mxu1 }
 0x1a7   : > { %6797 = vst [vmem:[#allocation45_spill] sm:$0xff] %v3736_v56  ;;  %v1253_v21 = vmax.f32 %v3736_v56, %v1252_v58  ;;  %v3742_v3 = vpop.f32.mrb[23].mxu1 }
 0x1a8   : > { %v3733_v25 = vpop.f32.mrb[40].mxu0  ;;  %6799 = vst [vmem:[#allocation47_spill] sm:$0xff] %v3742_v3  ;;  %v1355_v38 = vmax.f32 %v1353_v8, %v3742_v3 }
 0x1a9   : > { %6796 = vst [vmem:[#allocation44_spill] sm:$0xff] %v3733_v25  ;;  %v1197_v33 = vmax.f32 %v1195_v53, %v3733_v25  ;;  %v3739_v31 = vpop.f32.mrb[41].mxu0 }
 0x1aa   : > { %6798 = vst [vmem:[#allocation46_spill] sm:$0xff] %v3739_v31  ;;  %v1298_v36 = vmax.f32 %v1296_v45, %v3739_v31  ;;  %v3745_v57 = vpop.f32.mrb[42].mxu0 }
 0x1ab   : > { %6800 = vst [vmem:[#allocation48_spill] sm:$0xff] %v3745_v57  ;;  %v1198_v47 = vmax.f32 %v1196_v49, %v3745_v57  ;;  %v3749_v54 = vpop.f32.mrb[43].mxu0 }
 0x1ac   : > { %6801 = vst [vmem:[#allocation49_spill] sm:$0xff] %v3749_v54  ;;  %v1299_v30 = vmax.f32 %v1297_v16, %v3749_v54  ;;  %v3752_v14 = vpop.f32.mrb[24].mxu1 }
 0x1ad   : > { %6802 = vst [vmem:[#allocation50_spill] sm:$0xff] %v3752_v14  ;;  %v1255_v53 = vmax.f32 %v1253_v21, %v3752_v14  ;;  %v3755_v52 = vpop.f32.mrb[25].mxu1 }
 0x1ae   : > { %6803 = vst [vmem:[#allocation51_spill] sm:$0xff] %v3755_v52  ;;  %v1354_v45 = vmax.f32 %v3755_v52, %v1355_v38  ;;  %v3760_v56 = vpop.f32.mrb[26].mxu1 }
 0x1af   : > { %6805 = vst [vmem:[#allocation53_spill] sm:$0xff] %v3760_v56  ;;  %v1257_v49 = vmax.f32 %v1255_v53, %v3760_v56  ;;  %v3766_v46 = vpop.f32.mrb[27].mxu1 }
 0x1b0   : > { %v3757_v58 = vpop.f32.mrb[44].mxu0  ;;  %6807 = vst [vmem:[#allocation55_spill] sm:$0xff] %v3766_v46  ;;  %v1356_v21 = vmax.f32 %v1354_v45, %v3766_v46 }
 0x1b1   : > { %6804 = vst [vmem:[#allocation52_spill] sm:$0xff] %v3757_v58  ;;  %v1199_v8 = vmax.f32 %v1197_v33, %v3757_v58  ;;  %v3763_v3 = vpop.f32.mrb[45].mxu0 }
 0x1b2   : > { %6806 = vst [vmem:[#allocation54_spill] sm:$0xff] %v3763_v3  ;;  %v1300_v16 = vmax.f32 %v1298_v36, %v3763_v3  ;;  %v3769_v42 = vpop.f32.mrb[46].mxu0 }
 0x1b3   : > { %6808 = vst [vmem:[#allocation56_spill] sm:$0xff] %v3769_v42  ;;  %v1200_v14 = vmax.f32 %v1198_v47, %v3769_v42  ;;  %v3773_v40 = vpop.f32.mrb[47].mxu0 }
 0x1b4   : > { %6809 = vst [vmem:[#allocation57_spill] sm:$0xff] %v3773_v40  ;;  %v1301_v38 = vmax.f32 %v1299_v30, %v3773_v40  ;;  %v3776_v52 = vpop.f32.mrb[28].mxu1 }
 0x1b5   : > { %6810 = vst [vmem:[#allocation58_spill] sm:$0xff] %v3776_v52  ;;  %v1259_v33 = vmax.f32 %v1257_v49, %v3776_v52  ;;  %v3779_v39 = vpop.f32.mrb[29].mxu1 }
 0x1b6   : > { %6811 = vst [vmem:[#allocation59_spill] sm:$0xff] %v3779_v39  ;;  %v1358_v36 = vmax.f32 %v1356_v21, %v3779_v39  ;;  %v3784_v56 = vpop.f32.mrb[30].mxu1 }
 0x1b7   : > { %6813 = vst [vmem:[#allocation61_spill] sm:$0xff] %v3784_v56  ;;  %v1261_v47 = vmax.f32 %v1259_v33, %v3784_v56  ;;  %v3790_v42 = vpop.f32.mrb[31].mxu1 }
 0x1b8   : > { %v3781_v53 = vpop.f32.mrb[48].mxu0  ;;  %6815 = vst [vmem:[#allocation63_spill] sm:$0xff] %v3790_v42  ;;  %v1360_v49 = vmax.f32 %v1358_v36, %v3790_v42 }
 0x1b9   : > { %6812 = vst [vmem:[#allocation60_spill] sm:$0xff] %v3781_v53  ;;  %v1201_v45 = vmax.f32 %v1199_v8, %v3781_v53  ;;  %v3787_v46 = vpop.f32.mrb[49].mxu0 }
 0x1ba   : > { %6814 = vst [vmem:[#allocation62_spill] sm:$0xff] %v3787_v46  ;;  %v1302_v30 = vmax.f32 %v1300_v16, %v3787_v46  ;;  %v3793_v40 = vpop.f32.mrb[50].mxu0 }
 0x1bb   : > { %6816 = vst [vmem:[#allocation64_spill] sm:$0xff] %v3793_v40  ;;  %v1202_v52 = vmax.f32 %v1200_v14, %v3793_v40  ;;  %v3797_v3 = vpop.f32.mrb[51].mxu0 }
 0x1bc   : > { %6817 = vst [vmem:[#allocation65_spill] sm:$0xff] %v3797_v3  ;;  %v1303_v21 = vmax.f32 %v1301_v38, %v3797_v3  ;;  %v3800_v39 = vpop.f32.mrb[32].mxu1 }
 0x1bd   : > { %6818 = vst [vmem:[#allocation66_spill] sm:$0xff] %v3800_v39  ;;  %v1263_v8 = vmax.f32 %v1261_v47, %v3800_v39  ;;  %v3803_v53 = vpop.f32.mrb[33].mxu1 }
 0x1be   : > { %6819 = vst [vmem:[#allocation67_spill] sm:$0xff] %v3803_v53  ;;  %v1362_v16 = vmax.f32 %v1360_v49, %v3803_v53  ;;  %v3808_v56 = vpop.f32.mrb[34].mxu1 }
 0x1bf   : > { %6821 = vst [vmem:[#allocation69_spill] sm:$0xff] %v3808_v56  ;;  %v1265_v14 = vmax.f32 %v1263_v8, %v3808_v56  ;;  %v3814_v40 = vpop.f32.mrb[35].mxu1 }
 0x1c0   : > { %v3805_v33 = vpop.f32.mrb[52].mxu0  ;;  %6823 = vst [vmem:[#allocation71_spill] sm:$0xff] %v3814_v40  ;;  %v1364_v47 = vmax.f32 %v1362_v16, %v3814_v40 }
 0x1c1   : > { %6820 = vst [vmem:[#allocation68_spill] sm:$0xff] %v3805_v33  ;;  %v1203_v36 = vmax.f32 %v1201_v45, %v3805_v33  ;;  %v3811_v42 = vpop.f32.mrb[53].mxu0 }
 0x1c2   : > { %6822 = vst [vmem:[#allocation70_spill] sm:$0xff] %v3811_v42  ;;  %v1304_v38 = vmax.f32 %v1302_v30, %v3811_v42  ;;  %v3817_v3 = vpop.f32.mrb[54].mxu0 }
 0x1c3   : > { %6824 = vst [vmem:[#allocation72_spill] sm:$0xff] %v3817_v3  ;;  %v1204_v39 = vmax.f32 %v1202_v52, %v3817_v3  ;;  %v3821_v46 = vpop.f32.mrb[55].mxu0 }
 0x1c4   : > { %6825 = vst [vmem:[#allocation73_spill] sm:$0xff] %v3821_v46  ;;  %v1305_v49 = vmax.f32 %v1303_v21, %v3821_v46  ;;  %v3824_v53 = vpop.f32.mrb[36].mxu1 }
 0x1c5   : > { %6826 = vst [vmem:[#allocation74_spill] sm:$0xff] %v3824_v53  ;;  %v1254_v45 = vmax.f32 %v3824_v53, %v1265_v14  ;;  %v3827_v33 = vpop.f32.mrb[37].mxu1 }
 0x1c6   : > { %6827 = vst [vmem:[#allocation75_spill] sm:$0xff] %v3827_v33  ;;  %v1366_v30 = vmax.f32 %v1364_v47, %v3827_v33  ;;  %v3832_v56 = vpop.f32.mrb[38].mxu1 }
 0x1c7   : > { %6829 = vst [vmem:[#allocation77_spill] sm:$0xff] %v3832_v56  ;;  %v1256_v52 = vmax.f32 %v1254_v45, %v3832_v56  ;;  %v3838_v3 = vpop.f32.mrb[39].mxu1 }
 0x1c8   : > { %v3829_v8 = vpop.f32.mrb[56].mxu0  ;;  %6831 = vst [vmem:[#allocation79_spill] sm:$0xff] %v3838_v3  ;;  %v1357_v14 = vmax.f32 %v3838_v3, %v1366_v30 }
 0x1c9   : > { %6828 = vst [vmem:[#allocation76_spill] sm:$0xff] %v3829_v8  ;;  %v1205_v16 = vmax.f32 %v1203_v36, %v3829_v8  ;;  %v3835_v40 = vpop.f32.mrb[57].mxu0 }
 0x1ca   : > { %6830 = vst [vmem:[#allocation78_spill] sm:$0xff] %v3835_v40  ;;  %v1306_v21 = vmax.f32 %v1304_v38, %v3835_v40  ;;  %v3841_v46 = vpop.f32.mrb[58].mxu0 }
 0x1cb   : > { %6832 = vst [vmem:[#allocation80_spill] sm:$0xff] %v3841_v46  ;;  %v1206_v53 = vmax.f32 %v1204_v39, %v3841_v46  ;;  %v3845_v42 = vpop.f32.mrb[59].mxu0 }
 0x1cc   : > { %6833 = vst [vmem:[#allocation81_spill] sm:$0xff] %v3845_v42  ;;  %v1307_v47 = vmax.f32 %v1305_v49, %v3845_v42  ;;  %v3848_v33 = vpop.f32.mrb[40].mxu1 }
 0x1cd   : > { %6834 = vst [vmem:[#allocation82_spill] sm:$0xff] %v3848_v33  ;;  %v3851_v36 = vmax.f32 %v1256_v52, %v3848_v33  ;;  %v3853_v45 = vpop.f32.mrb[41].mxu1 }
 0x1ce   : > { %6835 = vst [vmem:[#allocation83_spill] sm:$0xff] %v3853_v45  ;;  %v3858_v38 = vmax.f32 %v1357_v14, %v3853_v45  ;;  %v3860_v40 = vpop.f32.mrb[42].mxu1 }
 0x1cf   : > { %6837 = vst [vmem:[#allocation85_spill] sm:$0xff] %v3860_v40  ;;  %v3867_v3 = vpop.f32.mrb[43].mxu1 }
 0x1d0   : > { %v3855_v56 = vpop.f32.mrb[60].mxu0  ;;  %6839 = vst [vmem:[#allocation87_spill] sm:$0xff] %v3867_v3 }
 0x1d1   : > { %6836 = vst [vmem:[#allocation84_spill] sm:$0xff] %v3855_v56  ;;  %v1207_v39 = vmax.f32 %v1205_v16, %v3855_v56  ;;  %v3863_v30 = vpop.f32.mrb[61].mxu0 }
 0x1d2   : > { %6838 = vst [vmem:[#allocation86_spill] sm:$0xff] %v3863_v30  ;;  %v1308_v52 = vmax.f32 %v1306_v21, %v3863_v30  ;;  %v3870_v33 = vpop.f32.mrb[62].mxu0 }
 0x1d3   : > { %6840 = vst [vmem:[#allocation88_spill] sm:$0xff] %v3870_v33  ;;  %v1208_v14 = vmax.f32 %v1206_v53, %v3870_v33  ;;  %v3875_v45 = vpop.f32.mrb[63].mxu0 }
 0x1d4   : > { %6841 = vst [vmem:[#allocation89_spill] sm:$0xff] %v3875_v45  ;;  %v1309_v16 = vmax.f32 %v1307_v47, %v3875_v45  ;;  %v3878_v56 = vpop.f32.mrb[44].mxu1 }
 0x1d5   : > { %6842 = vst [vmem:[#allocation90_spill] sm:$0xff] %v3878_v56  ;;  %v3880_v46 = vpop.f32.mrb[45].mxu1 }
 0x1d6   : > { %6843 = vst [vmem:[#allocation91_spill] sm:$0xff] %v3880_v46  ;;  %v3884_v8 = vpop.f32.mrb[46].mxu1 }
 0x1d7   : > { %6845 = vst [vmem:[#allocation93_spill] sm:$0xff] %v3884_v8  ;;  %v3889_v58 = vpop.f32.mrb[47].mxu1 }
 0x1d8   : > { %v3882_v49 = vpop.f32.mrb[64].mxu0  ;;  %6847 = vst [vmem:[#allocation95_spill] sm:$0xff] %v3889_v58 }
 0x1d9   : > { %6844 = vst [vmem:[#allocation92_spill] sm:$0xff] %v3882_v49  ;;  %v1209_v21 = vmax.f32 %v1207_v39, %v3882_v49  ;;  %v3887_v30 = vpop.f32.mrb[65].mxu0 }
 0x1da   : > { %6846 = vst [vmem:[#allocation94_spill] sm:$0xff] %v3887_v30  ;;  %v1310_v53 = vmax.f32 %v1308_v52, %v3887_v30  ;;  %v3892_v42 = vpop.f32.mrb[66].mxu0 }
 0x1db   : > { %6848 = vst [vmem:[#allocation96_spill] sm:$0xff] %v3892_v42  ;;  %v1210_v47 = vmax.f32 %v1208_v14, %v3892_v42  ;;  %v3895_v45 = vpop.f32.mrb[67].mxu0 }
 0x1dc   : > { %6849 = vst [vmem:[#allocation97_spill] sm:$0xff] %v3895_v45  ;;  %v1311_v33 = vmax.f32 %v1309_v16, %v3895_v45  ;;  %v3898_v54 = vpop.f32.mrb[48].mxu1 }
 0x1dd   : > { %6850 = vst [vmem:[#allocation98_spill] sm:$0xff] %v3898_v54  ;;  %v3900_v57 = vpop.f32.mrb[49].mxu1 }
 0x1de   : > { %6851 = vst [vmem:[#allocation99_spill] sm:$0xff] %v3900_v57  ;;  %v3904_v39 = vpop.f32.mrb[50].mxu1 }
 0x1df   : > { %6853 = vst [vmem:[#allocation101_spill] sm:$0xff] %v3904_v39  ;;  %v3909_v52 = vpop.f32.mrb[51].mxu1 }
 0x1e0   : > { %v3902_v31 = vpop.f32.mrb[68].mxu0  ;;  %6855 = vst [vmem:[#allocation103_spill] sm:$0xff] %v3909_v52 }
 0x1e1   : > { %6852 = vst [vmem:[#allocation100_spill] sm:$0xff] %v3902_v31  ;;  %v1211_v49 = vmax.f32 %v1209_v21, %v3902_v31  ;;  %v3907_v25 = vpop.f32.mrb[69].mxu0 }
 0x1e2   : > { %6854 = vst [vmem:[#allocation102_spill] sm:$0xff] %v3907_v25  ;;  %v1312_v14 = vmax.f32 %v1310_v53, %v3907_v25  ;;  %v3912_v42 = vpop.f32.mrb[70].mxu0 }
 0x1e3   : > { %6856 = vst [vmem:[#allocation104_spill] sm:$0xff] %v3912_v42  ;;  %v1212_v16 = vmax.f32 %v1210_v47, %v3912_v42  ;;  %v3915_v45 = vpop.f32.mrb[71].mxu0 }
 0x1e4   : > { %6857 = vst [vmem:[#allocation105_spill] sm:$0xff] %v3915_v45  ;;  %v1313_v30 = vmax.f32 %v1311_v33, %v3915_v45  ;;  %v3918_v17 = vpop.f32.mrb[52].mxu1 }
 0x1e5   : > { %6858 = vst [vmem:[#allocation106_spill] sm:$0xff] %v3918_v17  ;;  %v3920_v23 = vpop.f32.mrb[53].mxu1 }
 0x1e6   : > { %6859 = vst [vmem:[#allocation107_spill] sm:$0xff] %v3920_v23  ;;  %v3924_v21 = vpop.f32.mrb[54].mxu1 }
 0x1e7   : > { %6861 = vst [vmem:[#allocation109_spill] sm:$0xff] %v3924_v21  ;;  %v3929_v53 = vpop.f32.mrb[55].mxu1 }
 0x1e8   : > { %v3922_v7 = vpop.f32.mrb[72].mxu0  ;;  %6863 = vst [vmem:[#allocation111_spill] sm:$0xff] %v3929_v53 }
 0x1e9   : > { %6860 = vst [vmem:[#allocation108_spill] sm:$0xff] %v3922_v7  ;;  %v1213_v31 = vmax.f32 %v1211_v49, %v3922_v7  ;;  %v3927_v48 = vpop.f32.mrb[73].mxu0 }
 0x1ea   : > { %6862 = vst [vmem:[#allocation110_spill] sm:$0xff] %v3927_v48  ;;  %v1314_v47 = vmax.f32 %v1312_v14, %v3927_v48  ;;  %v3932_v42 = vpop.f32.mrb[74].mxu0 }
 0x1eb   : > { %6864 = vst [vmem:[#allocation112_spill] sm:$0xff] %v3932_v42  ;;  %v1214_v33 = vmax.f32 %v1212_v16, %v3932_v42  ;;  %v3935_v45 = vpop.f32.mrb[75].mxu0 }
 0x1ec   : > { %6865 = vst [vmem:[#allocation113_spill] sm:$0xff] %v3935_v45  ;;  %v1315_v25 = vmax.f32 %v1313_v30, %v3935_v45  ;;  %v3938_v28 = vpop.f32.mrb[56].mxu1 }
 0x1ed   : > { %6866 = vst [vmem:[#allocation114_spill] sm:$0xff] %v3938_v28  ;;  %v3940_v12 = vpop.f32.mrb[57].mxu1 }
 0x1ee   : > { %6867 = vst [vmem:[#allocation115_spill] sm:$0xff] %v3940_v12  ;;  %v3944_v49 = vpop.f32.mrb[58].mxu1 }
 0x1ef   : > { %6869 = vst [vmem:[#allocation117_spill] sm:$0xff] %v3944_v49  ;;  %v3949_v14 = vpop.f32.mrb[59].mxu1 }
 0x1f0   : > { %v3942_v63 = vpop.f32.mrb[76].mxu0  ;;  %6871 = vst [vmem:[#allocation119_spill] sm:$0xff] %v3949_v14 }
 0x1f1   : > { %6868 = vst [vmem:[#allocation116_spill] sm:$0xff] %v3942_v63  ;;  %v1215_v7 = vmax.f32 %v1213_v31, %v3942_v63  ;;  %v3947_v51 = vpop.f32.mrb[77].mxu0  ;;  %v6876_v63 = vmov 0 }
 0x1f2   : > { %6870 = vst [vmem:[#allocation118_spill] sm:$0xff] %v3947_v51  ;;  %v1316_v16 = vmax.f32 %v1314_v47, %v3947_v51  ;;  %v3952_v42 = vpop.f32.mrb[78].mxu0  ;;  %v6877_v63 = vsel %vm3964_vm1, 4294967295, %v6876_v63 }
 0x1f3   : > { %6872 = vst [vmem:[#allocation120_spill] sm:$0xff] %v3952_v42  ;;  %v1216_v30 = vmax.f32 %v1214_v33, %v3952_v42  ;;  %v3955_v45 = vpop.f32.mrb[79].mxu0  ;;  %6878 = vst [vmem:[#allocation124_spill] sm:$0xff] %v6877_v63  ;;  %v3342_v33 = vmov -inf  }
 0x1f4   : > { %6873 = vst [vmem:[#allocation121_spill] sm:$0xff] %v3955_v45  ;;  %v1317_v48 = vmax.f32 %v1315_v25, %v3955_v45  ;;  %317 = vst.msk [vmem:[#allocation2] sm:$0x3] %vm3964_vm1, %v3342_v33  ;;  %v3343_v25 = vmov 0.0  }
 0x1f5   : > { %318 = vst.msk [vmem:[#allocation3] sm:$0x3] %vm3964_vm1, %v3343_v25 }
 0x1f8   : > { %v3958_v35 = vpop.f32.mrb[80].mxu0 }
 0x1f9   : > { %6874 = vst [vmem:[#allocation122_spill] sm:$0xff] %v3958_v35  ;;  %v1217_v26 = vmax.f32 %v1215_v7, %v3958_v35  ;;  %v3961_v31 = vpop.f32.mrb[81].mxu0 }
 0x1fa   : > { %6875 = vst [vmem:[#allocation123_spill] sm:$0xff] %v3961_v31  ;;  %v1318_v47 = vmax.f32 %v1316_v16, %v3961_v31  ;;  %v3969_v51 = vpop.f32.mrb[82].mxu0 }
 0x1fb   : > { %6879 = vst [vmem:[#allocation125_spill] sm:$0xff] %v3969_v51  ;;  %v1218_v7 = vmax.f32 %v1216_v30, %v3969_v51  ;;  %v3976_v35 = vpop.f32.mrb[83].mxu0 }
 0x1fc   : > { %6880 = vst [vmem:[#allocation126_spill] sm:$0xff] %v3976_v35  ;;  %v1319_v43 = vmax.f32 %v1317_v48, %v3976_v35 }
 0x200   : > { %v3979_v45 = vpop.f32.mrb[84].mxu0 }
 0x201   : > { %6881 = vst [vmem:[#allocation127_spill] sm:$0xff] %v3979_v45  ;;  %v1219_v16 = vmax.f32 %v1217_v26, %v3979_v45  ;;  %v3982_v31 = vpop.f32.mrb[85].mxu0 }
 0x202   : > { %6882 = vst [vmem:[#allocation128_spill] sm:$0xff] %v3982_v31  ;;  %v1320_v42 = vmax.f32 %v1318_v47, %v3982_v31  ;;  %v3985_v19 = vpop.f32.mrb[86].mxu0 }
 0x203   : > { %6883 = vst [vmem:[#allocation129_spill] sm:$0xff] %v3985_v19  ;;  %v1220_v33 = vmax.f32 %v1218_v7, %v3985_v19  ;;  %v3988_v10 = vpop.f32.mrb[87].mxu0 }
 0x204   : > { %6884 = vst [vmem:[#allocation130_spill] sm:$0xff] %v3988_v10  ;;  %v1321_v30 = vmax.f32 %v1319_v43, %v3988_v10 }
 0x208   : > { %v3991_v25 = vpop.f32.mrb[88].mxu0 }
 0x209   : > { %6885 = vst [vmem:[#allocation131_spill] sm:$0xff] %v3991_v25  ;;  %v1221_v48 = vmax.f32 %v1219_v16, %v3991_v25  ;;  %v3994_v35 = vpop.f32.mrb[89].mxu0 }
 0x20a   : > { %6886 = vst [vmem:[#allocation132_spill] sm:$0xff] %v3994_v35  ;;  %v1322_v26 = vmax.f32 %v1320_v42, %v3994_v35  ;;  %v3997_v45 = vpop.f32.mrb[90].mxu0 }
 0x20b   : > { %6887 = vst [vmem:[#allocation133_spill] sm:$0xff] %v3997_v45  ;;  %v1222_v47 = vmax.f32 %v1220_v33, %v3997_v45  ;;  %v4000_v31 = vpop.f32.mrb[91].mxu0 }
 0x20c   : > { %6888 = vst [vmem:[#allocation134_spill] sm:$0xff] %v4000_v31  ;;  %v1323_v7 = vmax.f32 %v1321_v30, %v4000_v31 }
 0x210   : > { %v4003_v19 = vpop.f32.mrb[92].mxu0 }
 0x211   : > { %6889 = vst [vmem:[#allocation135_spill] sm:$0xff] %v4003_v19  ;;  %v1223_v43 = vmax.f32 %v1221_v48, %v4003_v19  ;;  %v4006_v10 = vpop.f32.mrb[93].mxu0 }
 0x212   : > { %6890 = vst [vmem:[#allocation136_spill] sm:$0xff] %v4006_v10  ;;  %v1324_v16 = vmax.f32 %v1322_v26, %v4006_v10  ;;  %v4009_v25 = vpop.f32.mrb[94].mxu0 }
 0x213   : > { %6891 = vst [vmem:[#allocation137_spill] sm:$0xff] %v4009_v25  ;;  %v1224_v42 = vmax.f32 %v1222_v47, %v4009_v25  ;;  %v4012_v35 = vpop.f32.mrb[95].mxu0 }
 0x214   : > { %6892 = vst [vmem:[#allocation138_spill] sm:$0xff] %v4012_v35  ;;  %v1325_v33 = vmax.f32 %v1323_v7, %v4012_v35 }
 0x218   : > { %v4015_v45 = vpop.f32.mrb[96].mxu0 }
 0x219   : > { %6893 = vst [vmem:[#allocation139_spill] sm:$0xff] %v4015_v45  ;;  %v1225_v30 = vmax.f32 %v1223_v43, %v4015_v45  ;;  %v4018_v31 = vpop.f32.mrb[97].mxu0 }
 0x21a   : > { %6894 = vst [vmem:[#allocation140_spill] sm:$0xff] %v4018_v31  ;;  %v1326_v48 = vmax.f32 %v1324_v16, %v4018_v31  ;;  %v4021_v19 = vpop.f32.mrb[98].mxu0 }
 0x21b   : > { %6895 = vst [vmem:[#allocation141_spill] sm:$0xff] %v4021_v19  ;;  %v1226_v26 = vmax.f32 %v1224_v42, %v4021_v19  ;;  %v4024_v10 = vpop.f32.mrb[99].mxu0 }
 0x21c   : > { %6896 = vst [vmem:[#allocation142_spill] sm:$0xff] %v4024_v10  ;;  %v1327_v47 = vmax.f32 %v1325_v33, %v4024_v10 }
 0x220   : > { %v4027_v25 = vpop.f32.mrb[100].mxu0 }
 0x221   : > { %6897 = vst [vmem:[#allocation143_spill] sm:$0xff] %v4027_v25  ;;  %v1227_v7 = vmax.f32 %v1225_v30, %v4027_v25  ;;  %v4030_v35 = vpop.f32.mrb[101].mxu0 }
 0x222   : > { %6898 = vst [vmem:[#allocation144_spill] sm:$0xff] %v4030_v35  ;;  %v1328_v43 = vmax.f32 %v1326_v48, %v4030_v35  ;;  %v4033_v45 = vpop.f32.mrb[102].mxu0 }
 0x223   : > { %6899 = vst [vmem:[#allocation145_spill] sm:$0xff] %v4033_v45  ;;  %v1228_v16 = vmax.f32 %v1226_v26, %v4033_v45  ;;  %v4036_v31 = vpop.f32.mrb[103].mxu0 }
 0x224   : > { %6900 = vst [vmem:[#allocation146_spill] sm:$0xff] %v4036_v31  ;;  %v1329_v42 = vmax.f32 %v1327_v47, %v4036_v31 }
 0x228   : > { %v4039_v19 = vpop.f32.mrb[104].mxu0 }
 0x229   : > { %6901 = vst [vmem:[#allocation147_spill] sm:$0xff] %v4039_v19  ;;  %v1229_v33 = vmax.f32 %v1227_v7, %v4039_v19  ;;  %v4042_v10 = vpop.f32.mrb[105].mxu0 }
 0x22a   : > { %6902 = vst [vmem:[#allocation148_spill] sm:$0xff] %v4042_v10  ;;  %v1330_v30 = vmax.f32 %v1328_v43, %v4042_v10  ;;  %v4045_v25 = vpop.f32.mrb[106].mxu0 }
 0x22b   : > { %6903 = vst [vmem:[#allocation149_spill] sm:$0xff] %v4045_v25  ;;  %v1230_v48 = vmax.f32 %v1228_v16, %v4045_v25  ;;  %v4048_v35 = vpop.f32.mrb[107].mxu0 }
 0x22c   : > { %6904 = vst [vmem:[#allocation150_spill] sm:$0xff] %v4048_v35  ;;  %v1331_v26 = vmax.f32 %v1329_v42, %v4048_v35 }
 0x230   : > { %v4051_v45 = vpop.f32.mrb[108].mxu0 }
 0x231   : > { %6905 = vst [vmem:[#allocation151_spill] sm:$0xff] %v4051_v45  ;;  %v1231_v47 = vmax.f32 %v1229_v33, %v4051_v45  ;;  %v4054_v31 = vpop.f32.mrb[109].mxu0 }
 0x232   : > { %6906 = vst [vmem:[#allocation152_spill] sm:$0xff] %v4054_v31  ;;  %v1332_v7 = vmax.f32 %v1330_v30, %v4054_v31  ;;  %v4057_v19 = vpop.f32.mrb[110].mxu0 }
 0x233   : > { %6907 = vst [vmem:[#allocation153_spill] sm:$0xff] %v4057_v19  ;;  %v1232_v43 = vmax.f32 %v1230_v48, %v4057_v19  ;;  %v4060_v10 = vpop.f32.mrb[111].mxu0 }
 0x234   : > { %6908 = vst [vmem:[#allocation154_spill] sm:$0xff] %v4060_v10  ;;  %v1333_v16 = vmax.f32 %v1331_v26, %v4060_v10 }
 0x238   : > { %v4063_v25 = vpop.f32.mrb[112].mxu0 }
 0x239   : > { %6909 = vst [vmem:[#allocation155_spill] sm:$0xff] %v4063_v25  ;;  %v1233_v42 = vmax.f32 %v1231_v47, %v4063_v25  ;;  %v4066_v35 = vpop.f32.mrb[113].mxu0 }
 0x23a   : > { %6910 = vst [vmem:[#allocation156_spill] sm:$0xff] %v4066_v35  ;;  %v1334_v33 = vmax.f32 %v1332_v7, %v4066_v35  ;;  %v4069_v45 = vpop.f32.mrb[114].mxu0 }
 0x23b   : > { %6911 = vst [vmem:[#allocation157_spill] sm:$0xff] %v4069_v45  ;;  %v1234_v30 = vmax.f32 %v1232_v43, %v4069_v45  ;;  %v4072_v31 = vpop.f32.mrb[115].mxu0 }
 0x23c   : > { %6912 = vst [vmem:[#allocation158_spill] sm:$0xff] %v4072_v31  ;;  %v1335_v48 = vmax.f32 %v1333_v16, %v4072_v31 }
 0x240   : > { %v4075_v19 = vpop.f32.mrb[116].mxu0 }
 0x241   : > { %6913 = vst [vmem:[#allocation159_spill] sm:$0xff] %v4075_v19  ;;  %v1235_v26 = vmax.f32 %v1233_v42, %v4075_v19  ;;  %v4078_v10 = vpop.f32.mrb[117].mxu0 }
 0x242   : > { %6914 = vst [vmem:[#allocation160_spill] sm:$0xff] %v4078_v10  ;;  %v1336_v47 = vmax.f32 %v1334_v33, %v4078_v10  ;;  %v4081_v25 = vpop.f32.mrb[118].mxu0 }
 0x243   : > { %6915 = vst [vmem:[#allocation161_spill] sm:$0xff] %v4081_v25  ;;  %v1236_v7 = vmax.f32 %v1234_v30, %v4081_v25  ;;  %v4084_v35 = vpop.f32.mrb[119].mxu0 }
 0x244   : > { %6916 = vst [vmem:[#allocation162_spill] sm:$0xff] %v4084_v35  ;;  %v1337_v43 = vmax.f32 %v1335_v48, %v4084_v35 }
 0x248   : > { %v4087_v45 = vpop.f32.mrb[120].mxu0 }
 0x249   : > { %6917 = vst [vmem:[#allocation163_spill] sm:$0xff] %v4087_v45  ;;  %v1237_v16 = vmax.f32 %v1235_v26, %v4087_v45  ;;  %v4090_v31 = vpop.f32.mrb[121].mxu0 }
 0x24a   : > { %6918 = vst [vmem:[#allocation164_spill] sm:$0xff] %v4090_v31  ;;  %v1338_v42 = vmax.f32 %v1336_v47, %v4090_v31  ;;  %v4093_v19 = vpop.f32.mrb[122].mxu0 }
 0x24b   : > { %6919 = vst [vmem:[#allocation165_spill] sm:$0xff] %v4093_v19  ;;  %v1238_v33 = vmax.f32 %v1236_v7, %v4093_v19  ;;  %v4096_v10 = vpop.f32.mrb[123].mxu0 }
 0x24c   : > { %6920 = vst [vmem:[#allocation166_spill] sm:$0xff] %v4096_v10  ;;  %v1339_v30 = vmax.f32 %v1337_v43, %v4096_v10 }
 0x250   : > { %v4099_v25 = vpop.f32.mrb[124].mxu0 }
 0x251   : > { %6921 = vst [vmem:[#allocation167_spill] sm:$0xff] %v4099_v25  ;;  %v1239_v48 = vmax.f32 %v1237_v16, %v4099_v25  ;;  %v4102_v35 = vpop.f32.mrb[125].mxu0 }
 0x252   : > { %6922 = vst [vmem:[#allocation168_spill] sm:$0xff] %v4102_v35  ;;  %v1340_v26 = vmax.f32 %v1338_v42, %v4102_v35  ;;  %v4105_v45 = vpop.f32.mrb[126].mxu0  ;;  %v6928_v42 = vmax.f32 %v3851_v36, %v3860_v40 }
 0x253   : > { %6923 = vst [vmem:[#allocation169_spill] sm:$0xff] %v4105_v45  ;;  %v1240_v47 = vmax.f32 %v1238_v33, %v4105_v45  ;;  %v4108_v31 = vpop.f32.mrb[127].mxu0 }
 0x254   : > { %6924 = vst [vmem:[#allocation170_spill] sm:$0xff] %v4108_v31  ;;  %v1341_v7 = vmax.f32 %v1339_v30, %v4108_v31  ;;  %v6930_v30 = vmax.f32 %v3858_v38, %v3867_v3 }
 0x258   : > { %v4111_v19 = vpop.f32.mrb[128].mxu0 }
 0x259   : > { %6925 = vst [vmem:[#allocation171_spill] sm:$0xff] %v4111_v19  ;;  %v1241_v43 = vmax.f32 %v1239_v48, %v4111_v19  ;;  %v4114_v10 = vpop.f32.mrb[129].mxu0 }
 0x25a   : > { %6926 = vst [vmem:[#allocation172_spill] sm:$0xff] %v4114_v10  ;;  %v1342_v16 = vmax.f32 %v1340_v26, %v4114_v10  ;;  %v4117_v25 = vpop.f32.mrb[130].mxu0 }
 0x25b   : > { %6927 = vst [vmem:[#allocation173_spill] sm:$0xff] %v4117_v25  ;;  %v1262_v35 = vmax.f32 %v6928_v42, %v1241_v43  ;;  %v1242_v33 = vmax.f32 %v1240_v47, %v4117_v25  ;;  %v4123_v45 = vpop.f32.mrb[131].mxu0 }
 0x25c   : > { %6929 = vst [vmem:[#allocation174_spill] sm:$0xff] %v4123_v45  ;;  %v1363_v31 = vmax.f32 %v6930_v30, %v1342_v16  ;;  %v1343_v48 = vmax.f32 %v1341_v7, %v4123_v45 }
 0x25d   : > { %v1264_v19 = vmax.f32 %v1262_v35, %v1242_v33 }
 0x25e   : > { %v1365_v51 = vmax.f32 %v1363_v31, %v1343_v48 }
 0x25f   : > { %v1266_v26 = vmax.f32 %v1264_v19, %v3878_v56 }
 0x260   : > { %v1367_v10 = vmax.f32 %v1365_v51, %v3880_v46 }
 0x261   : > { %v1267_v5 = vmax.f32 %v3884_v8, %v1266_v26 }
 0x262   : > { %v1368_v36 = vmax.f32 %v3889_v58, %v1367_v10 }
 0x263   : > { %v1268_v47 = vmax.f32 %v3898_v54, %v1267_v5 }
 0x264   : > { %v1369_v43 = vmax.f32 %v3900_v57, %v1368_v36  ;;  %v3344_v36 = vmov 1966171168  }
 0x265   : > { %v1269_v42 = vmax.f32 %v3904_v39, %v1268_v47  ;;  %v1386_v47 = vunpack.c.l.s4 %v3344_v36 }
 0x266   : > { %v1370_v38 = vmax.f32 %v3909_v52, %v1369_v43 }
 0x267   : > { %v1270_v7 = vmax.f32 %v3918_v17, %v1269_v42 }
 0x268   : > { %v1371_v35 = vmax.f32 %v3920_v23, %v1370_v38 }
 0x269   : > { %v1271_v19 = vmax.f32 %v3924_v21, %v1270_v7  ;;  %v1387_v21 = vunpack.c.0.s8 %v1386_v47 }
 0x26a   : > { %v1372_v51 = vmax.f32 %v3929_v53, %v1371_v35  ;;  %v6931_v35 = vlaneseq }
 0x26b   : > { %v1272_v31 = vmax.f32 %v3938_v28, %v1271_v19 }
 0x26c   : > { %v1373_v10 = vmax.f32 %v3940_v12, %v1372_v51  ;;  %v1389_v53 = vshrl.u32 %v6931_v35, 7  ;;  %v6941_v35 = vld [vmem:[#allocation24_spill] sm:$0xff] }
 0x26d   : > { %v1273_v5 = vmax.f32 %v3944_v49, %v1272_v31 }
 0x26e   : > { %v1374_v16 = vmax.f32 %v3949_v14, %v1373_v10  ;;  %v4146_v31 = vsub.s32 %v1387_v21, %v1389_v53 }
 0x26f   : > { %v1274_v33 = vrot.slane %v1273_v5, 4 }
 0x270   : > { %v1375_v30 = vrot.slane %v1374_v16, 4  ;;  %6932 = vst [vmem:[#allocation175_spill] sm:$0xff] %v4146_v31 }
 0x271   : > { %v1275_v48 = vmax.f32 %v1273_v5, %v1274_v33  ;;  %v4149_v5 = vld [vmem:[#allocation2] sm:$0x3]  ;;  %v4152_v33 = vsub.s32 0, %v1389_v53 }
 0x272   : > { %v1376_v26 = vmax.f32 %v1374_v16, %v1375_v30  ;;  %6933 = vst [vmem:[#allocation176_spill] sm:$0xff] %v4149_v5  ;;  %v4154_v30 = vsub.s32 1, %v1389_v53 }
 0x273   : > { %v1276_v43 = vrot.slane %v1275_v48, 2  ;;  %6934 = vst [vmem:[#allocation177_spill] sm:$0xff] %v4152_v33 }
 0x274   : > { %v1377_v42 = vrot.slane %v1376_v26, 2  ;;  %6935 = vst [vmem:[#allocation178_spill] sm:$0xff] %v4154_v30 }
 0x275   : > { %v1277_v38 = vmax.f32 %v1275_v48, %v1276_v43 }
 0x276   : > { %v1378_v7 = vmax.f32 %v1376_v26, %v1377_v42  ;;  %v6939_v26 = vld [vmem:[#allocation20_spill] sm:$0xff] }
 0x277   : > { %v1278_v19 = vrot.slane %v1277_v38, 1 }
 0x278   : > { %v1379_v28 = vrot.slane %v1378_v7, 1 }
 0x279   : > { %v1279_v51 = vmax.f32 %v1277_v38, %v1278_v19  ;;  %v6942_v19 = vld [vmem:[#allocation25_spill] sm:$0xff] }
 0x27a   : > { %v1380_v12 = vmax.f32 %v1378_v7, %v1379_v28  ;;  %v6940_v7 = vld [vmem:[#allocation22_spill] sm:$0xff] }
 0x27c   : > { %v1384_v10 = vcombine.low %v1279_v51, %v1380_v12  ;;  %v6943_v51 = vld [vmem:[#allocation28_spill] sm:$0xff] }
 0x27e   : > { %v1391_v14 = vrot.slane %v1384_v10, %v4146_v31  ;;  %v6937_v10 = vld [vmem:[#allocation16_spill] sm:$0xff] }
 0x280   : > { %v1398_v16 = vrot.slane %v1391_v14, %v4146_v31 }
 0x282   : > { %v4157_v48 = vmax.f32 %v4149_v5, %v1398_v16  ;;  %v6938_v16 = vld [vmem:[#allocation17_spill] sm:$0xff] }
 0x284   : > { %6936 = vst [vmem:[#allocation179_spill] sm:$0xff] %v4157_v48  ;;  %v4163_v28 = vrot.slane %v4157_v48, %v4152_v33  ;;  %v4167_v12 = vrot.slane %v4157_v48, %v4154_v30  ;;  %2501 = vst.msk [vmem:[#allocation2] sm:$0x3] %vm3964_vm1, %v4157_v48 }
 0x286   : > { %v7088_v14 = vsub.f32 %v3536_v60, %v4163_v28  ;;  %v7089_v58 = vsub.f32 %v3538_v61, %v4167_v12  ;;  %v7090_v57 = vsub.f32 %v3540_v62, %v4163_v28  ;;  %v7091_v39 = vsub.f32 %v3542_v1, %v4167_v12 }
 0x287   : > { %v7092_v17 = vsub.f32 %v3546_v2, %v4163_v28  ;;  %v7093_v60 = vsub.f32 %v3550_v4, %v4167_v12  ;;  %v7094_v61 = vsub.f32 %v3554_v6, %v4163_v28  ;;  %v7095_v1 = vsub.f32 %v3558_v9, %v4167_v12 }
 0x288   : > { %v1607_v23 = vmul.f32 1.442695, %v7088_v14  ;;  %v1609_v54 = vmul.f32 1.442695, %v7089_v58  ;;  %v1611_v42 = vmul.f32 1.442695, %v7090_v57  ;;  %v7096_v2 = vsub.f32 %v3564_v11, %v4163_v28 }
 0x289   : > { %v1613_v43 = vmul.f32 1.442695, %v7091_v39  ;;  %v1615_v47 = vmul.f32 1.442695, %v7092_v17  ;;  %v1617_v14 = vmul.f32 1.442695, %v7093_v60  ;;  %v7097_v4 = vsub.f32 %v3567_v13, %v4167_v12 }
 0x28a   : > { %2873 = vpow2.f32 %v1607_v23  ;;  %v1619_v62 = vmul.f32 1.442695, %v7094_v61  ;;  %v1621_v57 = vmul.f32 1.442695, %v7095_v1  ;;  %v1623_v17 = vmul.f32 1.442695, %v7096_v2 }
 0x28b   : > { %2875 = vpow2.f32 %v1609_v54  ;;  %v1625_v54 = vmul.f32 1.442695, %v7097_v4  ;;  %v7098_v6 = vsub.f32 %v3570_v15, %v4163_v28  ;;  %v7099_v9 = vsub.f32 %v3573_v18, %v4167_v12 }
 0x28c   : > { %2877 = vpow2.f32 %v1611_v42  ;;  %v7100_v11 = vsub.f32 %v3578_v20, %v4163_v28  ;;  %v7101_v13 = vsub.f32 %v3581_v22, %v4167_v12  ;;  %v7102_v15 = vsub.f32 %v3584_v24, %v4163_v28 }
 0x28d   : > { %2879 = vpow2.f32 %v1613_v43  ;;  %v1627_v23 = vmul.f32 1.442695, %v7098_v6  ;;  %v1629_v58 = vmul.f32 1.442695, %v7099_v9  ;;  %v7103_v18 = vsub.f32 %v3587_v27, %v4167_v12 }
 0x28e   : > { %2881 = vpow2.f32 %v1615_v47  ;;  %v1631_v39 = vmul.f32 1.442695, %v7100_v11  ;;  %v1633_v47 = vmul.f32 1.442695, %v7101_v13  ;;  %v1635_v42 = vmul.f32 1.442695, %v7102_v15 }
 0x28f   : > { %2883 = vpow2.f32 %v1617_v14  ;;  %v1637_v20 = vmul.f32 1.442695, %v7103_v18  ;;  %v7104_v22 = vsub.f32 %v3592_v29, %v4163_v28  ;;  %v7105_v24 = vsub.f32 %v3595_v32, %v4167_v12 }
 0x290   : > { %2885 = vpow2.f32 %v1619_v62  ;;  %v7106_v27 = vsub.f32 %v3598_v34, %v4163_v28  ;;  %v7107_v29 = vsub.f32 %v3601_v37, %v4167_v12  ;;  %v7108_v32 = vsub.f32 %v3610_v41, %v4163_v28 }
 0x291   : > { %2887 = vpow2.f32 %v1621_v57  ;;  %v1639_v61 = vmul.f32 1.442695, %v7104_v22  ;;  %v1641_v1 = vmul.f32 1.442695, %v7105_v24  ;;  %v7109_v34 = vsub.f32 %v3615_v44, %v4167_v12 }
 0x292   : > { %2889 = vpow2.f32 %v1623_v17  ;;  %v1643_v2 = vmul.f32 1.442695, %v7106_v27  ;;  %v1645_v4 = vmul.f32 1.442695, %v7107_v29  ;;  %v1647_v6 = vmul.f32 1.442695, %v7108_v32 }
 0x293   : > { %2891 = vpow2.f32 %v1625_v54  ;;  %v1649_v9 = vmul.f32 1.442695, %v7109_v34  ;;  %v7110_v37 = vsub.f32 %v3622_v0, %v4163_v28  ;;  %v7111_v41 = vsub.f32 %v3627_v50, %v4167_v12 }
 0x294   : > { %v4598_v43 = vpop.eup %2873  ;;  %2893 = vpow2.f32 %v1627_v23  ;;  %v7112_v44 = vsub.f32 %v3637_v55, %v4163_v28  ;;  %v7113_v0 = vsub.f32 %v3643_v59, %v4167_v12  ;;  %v7114_v50 = vsub.f32 %v6937_v10, %v4163_v28 }
 0x295   : > { %v4603_v60 = vpop.eup %2875  ;;  %2895 = vpow2.f32 %v1629_v58  ;;  %v1651_v11 = vmul.f32 1.442695, %v7110_v37  ;;  %v1653_v13 = vmul.f32 1.442695, %v7111_v41  ;;  %v7115_v55 = vsub.f32 %v6938_v16, %v4167_v12  ;;  %v7121_v41 = vld [vmem:[#allocation30_spill] sm:$0xff] }
 0x296   : > { %v4608_v14 = vpop.eup %2877  ;;  %2897 = vpow2.f32 %v1631_v39  ;;  %v1655_v15 = vmul.f32 1.442695, %v7112_v44  ;;  %v1657_v18 = vmul.f32 1.442695, %v7113_v0  ;;  %v1659_v22 = vmul.f32 1.442695, %v7114_v50 }
 0x297   : > { %v4613_v62 = vpop.eup %2879  ;;  %2899 = vpow2.f32 %v1633_v47  ;;  %v1661_v24 = vmul.f32 1.442695, %v7115_v55  ;;  %v7116_v59 = vsub.f32 %v6939_v26, %v4163_v28  ;;  %v7117_v10 = vsub.f32 %v6940_v7, %v4167_v12  ;;  %v7125_v50 = vld [vmem:[#allocation33_spill] sm:$0xff] }
 0x298   : > { %v4618_v57 = vpop.eup %2881  ;;  %2901 = vpow2.f32 %v1635_v42  ;;  %v7118_v16 = vsub.f32 %v6941_v35, %v4163_v28  ;;  %v7119_v26 = vsub.f32 %v6942_v19, %v4167_v12  ;;  %v7120_v7 = vsub.f32 %v6943_v51, %v4163_v28 }
 0x299   : > { %v4623_v17 = vpop.eup %2883  ;;  %2903 = vpow2.f32 %v1637_v20  ;;  %v1663_v27 = vmul.f32 1.442695, %v7116_v59  ;;  %v1665_v29 = vmul.f32 1.442695, %v7117_v10  ;;  %v7122_v35 = vsub.f32 %v7121_v41, %v4167_v12 }
 0x29a   : > { %v4628_v54 = vpop.eup %2885  ;;  %2905 = vpow2.f32 %v1639_v61  ;;  %v1667_v32 = vmul.f32 1.442695, %v7118_v16  ;;  %v1669_v34 = vmul.f32 1.442695, %v7119_v26  ;;  %v1671_v37 = vmul.f32 1.442695, %v7120_v7 }
 0x29b   : > { %v4633_v23 = vpop.eup %2887  ;;  %2907 = vpow2.f32 %v1641_v1  ;;  %v7126_v51 = vsub.f32 %v7125_v50, %v4167_v12 }
 0x29c   : > { %v4638_v58 = vpop.eup %2889  ;;  %2909 = vpow2.f32 %v1643_v2 }
 0x29d   : > { %v4643_v39 = vpop.eup %2891  ;;  %2911 = vpow2.f32 %v1645_v4 }
 0x29e   : > { %v4648_v47 = vpop.eup %2893  ;;  %2913 = vpow2.f32 %v1647_v6 }
 0x29f   : > { %v4653_v42 = vpop.eup %2895  ;;  %2915 = vpow2.f32 %v1649_v9 }
 0x2a0   : > { %v4658_v20 = vpop.eup %2897  ;;  %2917 = vpow2.f32 %v1651_v11 }
 0x2a1   : > { %v4663_v61 = vpop.eup %2899  ;;  %2919 = vpow2.f32 %v1653_v13  ;;  %v1673_v13 = vmul.f32 1.442695, %v7122_v35 }
 0x2a2   : > { %v4668_v1 = vpop.eup %2901  ;;  %2921 = vpow2.f32 %v1655_v15  ;;  %v7123_v15 = vld [vmem:[#allocation32_spill] sm:$0xff] }
 0x2a3   : > { %v4673_v2 = vpop.eup %2903  ;;  %2923 = vpow2.f32 %v1657_v18  ;;  %v7124_v19 = vsub.f32 %v7123_v15, %v4163_v28 }
 0x2a4   : > { %v4678_v4 = vpop.eup %2905  ;;  %2925 = vpow2.f32 %v1659_v22  ;;  %v1677_v22 = vmul.f32 1.442695, %v7126_v51 }
 0x2a5   : > { %v4683_v6 = vpop.eup %2907  ;;  %2927 = vpow2.f32 %v1661_v24  ;;  %v1675_v0 = vmul.f32 1.442695, %v7124_v19  ;;  %v7127_v24 = vld [vmem:[#allocation36_spill] sm:$0xff] }
 0x2a6   : > { %v4688_v9 = vpop.eup %2909  ;;  %2929 = vpow2.f32 %v1663_v27  ;;  %v7128_v59 = vsub.f32 %v7127_v24, %v4163_v28 }
 0x2a7   : > { %v4693_v11 = vpop.eup %2911  ;;  %2931 = vpow2.f32 %v1665_v29  ;;  %v7129_v29 = vld [vmem:[#allocation38_spill] sm:$0xff] }
 0x2a8   : > { %v4698_v44 = vpop.eup %2913  ;;  %2933 = vpow2.f32 %v1667_v32  ;;  %v1679_v27 = vmul.f32 1.442695, %v7128_v59  ;;  %v7130_v16 = vsub.f32 %v7129_v29, %v4167_v12 }
 0x2a9   : > { %v4703_v18 = vpop.eup %2915  ;;  %2935 = vpow2.f32 %v1669_v34  ;;  %v7131_v34 = vld [vmem:[#allocation40_spill] sm:$0xff] }
 0x2aa   : > { %v4708_v55 = vpop.eup %2917  ;;  %2937 = vpow2.f32 %v1671_v37  ;;  %v1681_v32 = vmul.f32 1.442695, %v7130_v16  ;;  %v7132_v7 = vsub.f32 %v7131_v34, %v4163_v28  ;;  %v7133_v37 = vld [vmem:[#allocation41_spill] sm:$0xff] }
 0x2ab   : > { %v4713_v10 = vpop.eup %2919  ;;  %2939 = vpow2.f32 %v1673_v13  ;;  %v7134_v15 = vsub.f32 %v7133_v37, %v4167_v12  ;;  %v7135_v13 = vld [vmem:[#allocation44_spill] sm:$0xff] }
 0x2ac   : > { %v4718_v26 = vpop.eup %2921  ;;  %2941 = vpow2.f32 %v1675_v0  ;;  %v1683_v41 = vmul.f32 1.442695, %v7132_v7  ;;  %v7136_v51 = vsub.f32 %v7135_v13, %v4163_v28  ;;  %v7137_v0 = vld [vmem:[#allocation46_spill] sm:$0xff] }
 0x2ad   : > { %v4723_v35 = vpop.eup %2923  ;;  %2943 = vpow2.f32 %v1677_v22  ;;  %v1685_v19 = vmul.f32 1.442695, %v7134_v15  ;;  %v7138_v29 = vsub.f32 %v7137_v0, %v4167_v12  ;;  %v7139_v22 = vld [vmem:[#allocation48_spill] sm:$0xff] }
 0x2ae   : > { %v4728_v50 = vpop.eup %2925  ;;  %2945 = vpow2.f32 %v1679_v27  ;;  %v1687_v24 = vmul.f32 1.442695, %v7136_v51  ;;  %v7140_v7 = vsub.f32 %v7139_v22, %v4163_v28  ;;  %v7141_v27 = vld [vmem:[#allocation49_spill] sm:$0xff] }
 0x2af   : > { %v4733_v59 = vpop.eup %2927  ;;  %2947 = vpow2.f32 %v1681_v32  ;;  %v1689_v16 = vmul.f32 1.442695, %v7138_v29  ;;  %v7142_v13 = vsub.f32 %v7141_v27, %v4167_v12  ;;  %v7143_v32 = vld [vmem:[#allocation52_spill] sm:$0xff] }
 0x2b0   : > { %v4738_v34 = vpop.eup %2929  ;;  %2949 = vpow2.f32 %v1683_v41  ;;  %v1691_v37 = vmul.f32 1.442695, %v7140_v7  ;;  %v7144_v0 = vsub.f32 %v7143_v32, %v4163_v28  ;;  %v7146_v41 = vld [vmem:[#allocation54_spill] sm:$0xff] }
 0x2b1   : > { %v4743_v15 = vpop.eup %2931  ;;  %2951 = vpow2.f32 %v1685_v19  ;;  %v1693_v51 = vmul.f32 1.442695, %v7142_v13  ;;  %v7147_v22 = vsub.f32 %v7146_v41, %v4167_v12  ;;  %v7149_v19 = vld [vmem:[#allocation56_spill] sm:$0xff] }
 0x2b2   : > { %v4748_v36 = vpop.eup %2933  ;;  %2953 = vpow2.f32 %v1687_v24  ;;  %v1695_v29 = vmul.f32 1.442695, %v7144_v0  ;;  %v7150_v27 = vsub.f32 %v7149_v19, %v4163_v28  ;;  %v7152_v24 = vld [vmem:[#allocation57_spill] sm:$0xff] }
 0x2b3   : > { %v4753_v49 = vpop.eup %2935  ;;  %2955 = vpow2.f32 %v1689_v16  ;;  %v1697_v7 = vmul.f32 1.442695, %v7147_v22  ;;  %v7153_v32 = vsub.f32 %v7152_v24, %v4167_v12  ;;  %v7155_v16 = vld [vmem:[#allocation60_spill] sm:$0xff] }
 0x2b4   : > { %7145 = vst [vmem:[#allocation16_spill] sm:$0xff] %v4753_v49  ;;  %v4758_v38 = vpop.eup %2937  ;;  %2957 = vpow2.f32 %v1691_v37  ;;  %v1699_v13 = vmul.f32 1.442695, %v7150_v27  ;;  %v7156_v41 = vsub.f32 %v7155_v16, %v4163_v28  ;;  %v7158_v37 = vld [vmem:[#allocation62_spill] sm:$0xff] }
 0x2b5   : > { %7148 = vst [vmem:[#allocation17_spill] sm:$0xff] %v4758_v38  ;;  %v4763_v5 = vpop.eup %2939  ;;  %2959 = vpow2.f32 %v1693_v51  ;;  %v1701_v0 = vmul.f32 1.442695, %v7153_v32  ;;  %v7159_v19 = vsub.f32 %v7158_v37, %v4167_v12  ;;  %v7161_v51 = vld [vmem:[#allocation64_spill] sm:$0xff]  ;;  %v7257_v38 = vld [vmem:[#allocation129_spill] sm:$0xff] }
 0x2b6   : > { %7151 = vst [vmem:[#allocation20_spill] sm:$0xff] %v4763_v5  ;;  %v4768_v52 = vpop.eup %2941  ;;  %2961 = vpow2.f32 %v1695_v29  ;;  %v1703_v22 = vmul.f32 1.442695, %v7156_v41  ;;  %v7162_v24 = vsub.f32 %v7161_v51, %v4163_v28  ;;  %v7164_v29 = vld [vmem:[#allocation65_spill] sm:$0xff] }
 0x2b7   : > { %7154 = vst [vmem:[#allocation22_spill] sm:$0xff] %v4768_v52  ;;  %v4773_v8 = vpop.eup %2943  ;;  %2963 = vpow2.f32 %v1697_v7  ;;  %v1705_v27 = vmul.f32 1.442695, %v7159_v19  ;;  %v7165_v16 = vsub.f32 %v7164_v29, %v4167_v12  ;;  %v7167_v7 = vld [vmem:[#allocation68_spill] sm:$0xff] }
 0x2b8   : > { %7157 = vst [vmem:[#allocation24_spill] sm:$0xff] %v4773_v8  ;;  %v4778_v46 = vpop.eup %2945  ;;  %2965 = vpow2.f32 %v1699_v13  ;;  %v1707_v32 = vmul.f32 1.442695, %v7162_v24  ;;  %v7168_v37 = vsub.f32 %v7167_v7, %v4163_v28  ;;  %v7170_v13 = vld [vmem:[#allocation70_spill] sm:$0xff] }
 0x2b9   : > { %7160 = vst [vmem:[#allocation25_spill] sm:$0xff] %v4778_v46  ;;  %v4783_v56 = vpop.eup %2947  ;;  %2967 = vpow2.f32 %v1701_v0  ;;  %v1709_v41 = vmul.f32 1.442695, %v7165_v16  ;;  %v7171_v51 = vsub.f32 %v7170_v13, %v4167_v12  ;;  %v7173_v0 = vld [vmem:[#allocation72_spill] sm:$0xff] }
 0x2ba   : > { %7163 = vst [vmem:[#allocation28_spill] sm:$0xff] %v4783_v56  ;;  %v4788_v3 = vpop.eup %2949  ;;  %2969 = vpow2.f32 %v1703_v22  ;;  %v1711_v19 = vmul.f32 1.442695, %v7168_v37  ;;  %v7174_v29 = vsub.f32 %v7173_v0, %v4163_v28  ;;  %v7176_v22 = vld [vmem:[#allocation73_spill] sm:$0xff] }
 0x2bb   : > { %7166 = vst [vmem:[#allocation30_spill] sm:$0xff] %v4788_v3  ;;  %v4793_v40 = vpop.eup %2951  ;;  %2971 = vpow2.f32 %v1705_v27  ;;  %v1713_v24 = vmul.f32 1.442695, %v7171_v51  ;;  %v7177_v7 = vsub.f32 %v7176_v22, %v4167_v12  ;;  %v7179_v27 = vld [vmem:[#allocation76_spill] sm:$0xff] }
 0x2bc   : > { %7169 = vst [vmem:[#allocation32_spill] sm:$0xff] %v4793_v40  ;;  %v4798_v45 = vpop.eup %2953  ;;  %2973 = vpow2.f32 %v1707_v32  ;;  %v1715_v16 = vmul.f32 1.442695, %v7174_v29  ;;  %v7180_v13 = vsub.f32 %v7179_v27, %v4163_v28  ;;  %v7182_v32 = vld [vmem:[#allocation78_spill] sm:$0xff] }
 0x2bd   : > { %7172 = vst [vmem:[#allocation33_spill] sm:$0xff] %v4798_v45  ;;  %v4803_v25 = vpop.eup %2955  ;;  %2975 = vpow2.f32 %v1709_v41  ;;  %v1717_v37 = vmul.f32 1.442695, %v7177_v7  ;;  %v7183_v0 = vsub.f32 %v7182_v32, %v4167_v12  ;;  %v7185_v41 = vld [vmem:[#allocation80_spill] sm:$0xff] }
 0x2be   : > { %7175 = vst [vmem:[#allocation36_spill] sm:$0xff] %v4803_v25  ;;  %v4808_v48 = vpop.eup %2957  ;;  %2977 = vpow2.f32 %v1711_v19  ;;  %v1719_v51 = vmul.f32 1.442695, %v7180_v13  ;;  %v7186_v22 = vsub.f32 %v7185_v41, %v4163_v28  ;;  %v7188_v19 = vld [vmem:[#allocation81_spill] sm:$0xff] }
 0x2bf   : > { %7178 = vst [vmem:[#allocation38_spill] sm:$0xff] %v4808_v48  ;;  %v4813_v31 = vpop.eup %2959  ;;  %2979 = vpow2.f32 %v1713_v24  ;;  %v1721_v29 = vmul.f32 1.442695, %v7183_v0  ;;  %v7189_v27 = vsub.f32 %v7188_v19, %v4167_v12  ;;  %v7191_v24 = vld [vmem:[#allocation84_spill] sm:$0xff] }
 0x2c0   : > { %7181 = vst [vmem:[#allocation40_spill] sm:$0xff] %v4813_v31  ;;  %v4818_v63 = vpop.eup %2961  ;;  %2981 = vpow2.f32 %v1715_v16  ;;  %v1723_v7 = vmul.f32 1.442695, %v7186_v22  ;;  %v7192_v32 = vsub.f32 %v7191_v24, %v4163_v28  ;;  %v7194_v16 = vld [vmem:[#allocation86_spill] sm:$0xff] }
 0x2c1   : > { %7184 = vst [vmem:[#allocation41_spill] sm:$0xff] %v4818_v63  ;;  %v4823_v33 = vpop.eup %2963  ;;  %2983 = vpow2.f32 %v1717_v37  ;;  %v1725_v13 = vmul.f32 1.442695, %v7189_v27  ;;  %v7195_v41 = vsub.f32 %v7194_v16, %v4167_v12  ;;  %v7197_v37 = vld [vmem:[#allocation88_spill] sm:$0xff] }
 0x2c2   : > { %7187 = vst [vmem:[#allocation44_spill] sm:$0xff] %v4823_v33  ;;  %v4828_v30 = vpop.eup %2965  ;;  %2985 = vpow2.f32 %v1719_v51  ;;  %v1727_v0 = vmul.f32 1.442695, %v7192_v32  ;;  %v7198_v19 = vsub.f32 %v7197_v37, %v4163_v28  ;;  %v7200_v51 = vld [vmem:[#allocation89_spill] sm:$0xff] }
 0x2c3   : > { %7190 = vst [vmem:[#allocation46_spill] sm:$0xff] %v4828_v30  ;;  %v4833_v21 = vpop.eup %2967  ;;  %2987 = vpow2.f32 %v1721_v29  ;;  %v1729_v22 = vmul.f32 1.442695, %v7195_v41  ;;  %v7201_v24 = vsub.f32 %v7200_v51, %v4167_v12  ;;  %v7203_v29 = vld [vmem:[#allocation92_spill] sm:$0xff]  ;;  %v7210_v51 = vld [vmem:[#allocation97_spill] sm:$0xff] }
 0x2c4   : > { %7193 = vst [vmem:[#allocation48_spill] sm:$0xff] %v4833_v21  ;;  %v4838_v53 = vpop.eup %2969  ;;  %2989 = vpow2.f32 %v1723_v7  ;;  %v1731_v27 = vmul.f32 1.442695, %v7198_v19  ;;  %v7204_v16 = vsub.f32 %v7203_v29, %v4163_v28  ;;  %v7208_v19 = vld [vmem:[#allocation96_spill] sm:$0xff] }
 0x2c5   : > { %7196 = vst [vmem:[#allocation49_spill] sm:$0xff] %v4838_v53  ;;  %v4843_v30 = vpop.eup %2971  ;;  %2991 = vpow2.f32 %v1725_v13  ;;  %v1733_v32 = vmul.f32 1.442695, %v7201_v24  ;;  %v7205_v53 = vld [vmem:[#allocation94_spill] sm:$0xff]  ;;  %v7209_v13 = vsub.f32 %v7208_v19, %v4163_v28  ;;  %v7211_v24 = vsub.f32 %v7210_v51, %v4167_v12 }
 0x2c6   : > { %7199 = vst [vmem:[#allocation52_spill] sm:$0xff] %v4843_v30  ;;  %v4848_v63 = vpop.eup %2973  ;;  %2993 = vpow2.f32 %v1727_v0  ;;  %v1735_v41 = vmul.f32 1.442695, %v7204_v16  ;;  %v7206_v7 = vsub.f32 %v7205_v53, %v4167_v12  ;;  %v7212_v0 = vld [vmem:[#allocation100_spill] sm:$0xff]  ;;  %v7215_v53 = vld [vmem:[#allocation102_spill] sm:$0xff] }
 0x2c7   : > { %7202 = vst [vmem:[#allocation54_spill] sm:$0xff] %v4848_v63  ;;  %v4856_v37 = vpop.eup %2975  ;;  %2995 = vpow2.f32 %v1729_v22  ;;  %v1739_v30 = vmul.f32 1.442695, %v7209_v13  ;;  %v1741_v63 = vmul.f32 1.442695, %v7211_v24  ;;  %v7213_v33 = vsub.f32 %v7212_v0, %v4163_v28  ;;  %v7217_v22 = vld [vmem:[#allocation104_spill] sm:$0xff] }
 0x2c8   : > { %v1737_v21 = vmul.f32 1.442695, %v7206_v7  ;;  %7207 = vst [vmem:[#allocation56_spill] sm:$0xff] %v4856_v37  ;;  %v4867_v16 = vpop.eup %2977  ;;  %2997 = vpow2.f32 %v1731_v27  ;;  %v7216_v7 = vsub.f32 %v7215_v53, %v4167_v12  ;;  %v7218_v48 = vsub.f32 %v7217_v22, %v4163_v28  ;;  %v7219_v13 = vld [vmem:[#allocation105_spill] sm:$0xff]  ;;  %v7222_v0 = vld [vmem:[#allocation108_spill] sm:$0xff]  ;;  %v7224_v27 = vld [vmem:[#allocation110_spill] sm:$0xff] }
 0x2c9   : > { %v1743_v29 = vmul.f32 1.442695, %v7213_v33  ;;  %7214 = vst [vmem:[#allocation57_spill] sm:$0xff] %v4867_v16  ;;  %v7220_v45 = vsub.f32 %v7219_v13, %v4167_v12  ;;  %v4878_v24 = vpop.eup %2979  ;;  %2999 = vpow2.f32 %v1733_v32  ;;  %v7223_v33 = vsub.f32 %v7222_v0, %v4163_v28  ;;  %v7231_v0 = vld [vmem:[#allocation116_spill] sm:$0xff] }
 0x2ca   : > { %v1745_v37 = vmul.f32 1.442695, %v7216_v7  ;;  %v1747_v19 = vmul.f32 1.442695, %v7218_v48  ;;  %7221 = vst [vmem:[#allocation60_spill] sm:$0xff] %v4878_v24  ;;  %v7225_v31 = vsub.f32 %v7224_v27, %v4167_v12  ;;  %v1993_v7 = vadd.f32 %v4608_v14, %v4598_v43  ;;  %v4888_v22 = vpop.eup %2981  ;;  %v7227_v48 = vld [vmem:[#allocation112_spill] sm:$0xff] }
 0x2cb   : > { %v1749_v51 = vmul.f32 1.442695, %v7220_v45  ;;  %v1751_v16 = vmul.f32 1.442695, %v7223_v33  ;;  %7226 = vst [vmem:[#allocation62_spill] sm:$0xff] %v4888_v22  ;;  %3001 = vpow2.f32 %v1735_v41  ;;  %v7228_v45 = vsub.f32 %v7227_v48, %v4163_v28  ;;  %v7229_v24 = vld [vmem:[#allocation113_spill] sm:$0xff]  ;;  %v4899_v27 = vpop.eup %2983 }
 0x2cc   : > { %v1753_v53 = vmul.f32 1.442695, %v7225_v31  ;;  %v7230_v32 = vsub.f32 %v7229_v24, %v4167_v12  ;;  %v7232_v33 = vsub.f32 %v7231_v0, %v4163_v28  ;;  %7233 = vst [vmem:[#allocation64_spill] sm:$0xff] %v4899_v27  ;;  %3003 = vpow2.f32 %v1737_v21  ;;  %v7234_v31 = vld [vmem:[#allocation118_spill] sm:$0xff]  ;;  %v7236_v41 = vld [vmem:[#allocation120_spill] sm:$0xff]  ;;  %v4910_v24 = vpop.eup %2985 }
 0x2cd   : > { %v1755_v13 = vmul.f32 1.442695, %v7228_v45  ;;  %v7235_v46 = vsub.f32 %v7234_v31, %v4167_v12  ;;  %v7237_v40 = vsub.f32 %v7236_v41, %v4163_v28  ;;  %v1994_v45 = vadd.f32 %v4618_v57, %v1993_v7  ;;  %7238 = vst [vmem:[#allocation65_spill] sm:$0xff] %v4910_v24  ;;  %v7241_v21 = vld [vmem:[#allocation122_spill] sm:$0xff]  ;;  %v4927_v56 = vpop.eup %2987  ;;  %v7246_v7 = vld [vmem:[#allocation125_spill] sm:$0xff] }
 0x2ce   : > { %v1757_v25 = vmul.f32 1.442695, %v7230_v32  ;;  %v1759_v3 = vmul.f32 1.442695, %v7232_v33  ;;  %3005 = vpow2.f32 %v1739_v30  ;;  %v7239_v32 = vld [vmem:[#allocation121_spill] sm:$0xff]  ;;  %v7242_v27 = vsub.f32 %v7241_v21, %v4163_v28  ;;  %7245 = vst [vmem:[#allocation68_spill] sm:$0xff] %v4927_v56  ;;  %v4940_v21 = vpop.eup %2989 }
 0x2cf   : > { %v1761_v22 = vmul.f32 1.442695, %v7235_v46  ;;  %v4907_v48 = vmul.f32 1.442695, %v7237_v40  ;;  %v7240_v0 = vsub.f32 %v7239_v32, %v4167_v12  ;;  %v7243_v46 = vld [vmem:[#allocation123_spill] sm:$0xff]  ;;  %3007 = vpow2.f32 %v1741_v63  ;;  %v7248_v32 = vld [vmem:[#allocation126_spill] sm:$0xff] }
 0x2d0   : > { %v4920_v31 = vmul.f32 1.442695, %v7242_v27  ;;  %v7244_v41 = vsub.f32 %v7243_v46, %v4167_v12  ;;  %v7247_v30 = vsub.f32 %v7246_v7, %v4163_v28  ;;  %v1995_v27 = vadd.f32 %v4628_v54, %v1994_v45  ;;  %7251 = vst [vmem:[#allocation72_spill] sm:$0xff] %v4940_v21  ;;  %v7252_v46 = vld [vmem:[#allocation127_spill] sm:$0xff]  ;;  %v7255_v63 = vld [vmem:[#allocation128_spill] sm:$0xff]  ;;  %v7260_v45 = vld [vmem:[#allocation130_spill] sm:$0xff] }
 0x2d1   : > { %v4915_v33 = vmul.f32 1.442695, %v7240_v0  ;;  %v7249_v0 = vsub.f32 %v7248_v32, %v4167_v12  ;;  %3009 = vpow2.f32 %v1743_v29  ;;  %v7256_v7 = vsub.f32 %v7255_v63, %v4167_v12  ;;  %v7314_v49 = vld [vmem:[#allocation60_spill] sm:$0xff] }
 0x2d2   : > { %v4925_v40 = vmul.f32 1.442695, %v7244_v41  ;;  %v4932_v24 = vmul.f32 1.442695, %v7247_v30  ;;  %v7253_v41 = vsub.f32 %v7252_v46, %v4163_v28  ;;  %v7258_v32 = vsub.f32 %v7257_v38, %v4163_v28  ;;  %v7263_v46 = vld [vmem:[#allocation131_spill] sm:$0xff]  ;;  %v7267_v38 = vld [vmem:[#allocation132_spill] sm:$0xff] }
 0x2d3   : > { %v4937_v52 = vmul.f32 1.442695, %v7249_v0  ;;  %v4950_v30 = vmul.f32 1.442695, %v7256_v7  ;;  %3011 = vpow2.f32 %v1745_v37  ;;  %v7261_v29 = vsub.f32 %v7260_v45, %v4167_v12  ;;  %v7270_v37 = vld [vmem:[#allocation133_spill] sm:$0xff] }
 0x2d4   : > { %v4945_v56 = vmul.f32 1.442695, %v7253_v41  ;;  %v4955_v0 = vmul.f32 1.442695, %v7258_v32  ;;  %v7264_v41 = vsub.f32 %v7263_v46, %v4163_v28  ;;  %v1996_v63 = vadd.f32 %v4638_v58, %v1995_v27  ;;  %v7276_v27 = vld [vmem:[#allocation135_spill] sm:$0xff] }
 0x2d5   : > { %7250 = vst [vmem:[#allocation70_spill] sm:$0xff] %v4937_v52  ;;  %v4957_v52 = vpop.eup %2991  ;;  %v4962_v21 = vmul.f32 1.442695, %v7261_v29  ;;  %3013 = vpow2.f32 %v1747_v19  ;;  %v7268_v32 = vsub.f32 %v7267_v38, %v4167_v12  ;;  %v7271_v45 = vsub.f32 %v7270_v37, %v4163_v28  ;;  %v7279_v38 = vld [vmem:[#allocation136_spill] sm:$0xff] }
 0x2d6   : > { %7254 = vst [vmem:[#allocation73_spill] sm:$0xff] %v4945_v56  ;;  %7259 = vst [vmem:[#allocation76_spill] sm:$0xff] %v4957_v52  ;;  %v4967_v56 = vmul.f32 1.442695, %v7264_v41  ;;  %v4970_v7 = vpop.eup %2993  ;;  %3015 = vpow2.f32 %v1749_v51  ;;  %v7277_v19 = vsub.f32 %v7276_v27, %v4163_v28  ;;  %v1997_v37 = vadd.f32 %v4648_v47, %v1996_v63  ;;  %v7285_v51 = vld [vmem:[#allocation138_spill] sm:$0xff]  ;;  %v7289_v63 = vld [vmem:[#allocation140_spill] sm:$0xff] }
 0x2d7   : > { %7262 = vst [vmem:[#allocation78_spill] sm:$0xff] %v4962_v21  ;;  %7266 = vst [vmem:[#allocation81_spill] sm:$0xff] %v4970_v7  ;;  %v4975_v52 = vmul.f32 1.442695, %v7268_v32  ;;  %v4980_v29 = vmul.f32 1.442695, %v7271_v45  ;;  %v7280_v32 = vsub.f32 %v7279_v38, %v4167_v12  ;;  %3017 = vpow2.f32 %v1751_v16 }
 0x2d8   : > { %7265 = vst [vmem:[#allocation80_spill] sm:$0xff] %v4967_v56  ;;  %v7273_v21 = vld [vmem:[#allocation134_spill] sm:$0xff]  ;;  %v4987_v56 = vpop.eup %2995  ;;  %v4992_v7 = vmul.f32 1.442695, %v7277_v19  ;;  %v7286_v27 = vsub.f32 %v7285_v51, %v4167_v12  ;;  %3019 = vpow2.f32 %v1753_v53  ;;  %v7290_v16 = vsub.f32 %v7289_v63, %v4167_v12 }
 0x2d9   : > { %7269 = vst [vmem:[#allocation84_spill] sm:$0xff] %v4975_v52  ;;  %7272 = vst [vmem:[#allocation86_spill] sm:$0xff] %v4980_v29  ;;  %v7274_v46 = vsub.f32 %v7273_v21, %v4167_v12  ;;  %v4997_v52 = vmul.f32 1.442695, %v7280_v32  ;;  %v5000_v45 = vpop.eup %2997  ;;  %v7282_v21 = vld [vmem:[#allocation137_spill] sm:$0xff]  ;;  %v1998_v51 = vadd.f32 %v4658_v20, %v1997_v37  ;;  %3021 = vpow2.f32 %v1755_v13 }
 0x2da   : > { %7278 = vst [vmem:[#allocation89_spill] sm:$0xff] %v4992_v7  ;;  %v5010_v19 = vmul.f32 1.442695, %v7286_v27  ;;  %v7287_v7 = vld [vmem:[#allocation139_spill] sm:$0xff]  ;;  %v5022_v29 = vmul.f32 1.442695, %v7290_v16  ;;  %v2239_v53 = vpack.c.bf16 %v4613_v62, %v4603_v60  ;;  %3023 = vpow2.f32 %v1757_v25 }
 0x2db   : > { %v4985_v41 = vmul.f32 1.442695, %v7274_v46  ;;  %7281 = vst [vmem:[#allocation92_spill] sm:$0xff] %v4997_v52  ;;  %v7283_v46 = vsub.f32 %v7282_v21, %v4163_v28  ;;  %v7288_v38 = vsub.f32 %v7287_v7, %v4163_v28  ;;  %v5017_v52 = vpop.eup %2999  ;;  %v7291_v21 = vld [vmem:[#allocation141_spill] sm:$0xff]  ;;  %v2094_v7 = vadd.f32 %v4613_v62, %v4603_v60 }
 0x2dc   : > { %v5030_v27 = vpop.eup %3001  ;;  %v1999_v16 = vadd.f32 %v4668_v1, %v1998_v51  ;;  %v2241_v37 = vpack.c.bf16 %v4633_v23, %v4623_v17  ;;  %v2240_v13 = vpack.c.bf16 %v4628_v54, %v4618_v57  ;;  %3025 = vpow2.f32 %v1759_v3  ;;  %2364 = vmatprep.subr.bf16.mxu1 %v2239_v53  ;;  %v7298_v51 = vld [vmem:[#allocation25_spill] sm:$0xff] }
 0x2dd   : > { %7275 = vst [vmem:[#allocation88_spill] sm:$0xff] %v4985_v41  ;;  %v5005_v41 = vmul.f32 1.442695, %v7283_v46  ;;  %v5015_v32 = vmul.f32 1.442695, %v7288_v38  ;;  %v7292_v46 = vsub.f32 %v7291_v21, %v4163_v28  ;;  %v2238_v38 = vpack.c.bf16 %v4608_v14, %v4598_v43  ;;  %v5038_v63 = vpop.eup %3003  ;;  %v7303_v3 = vld [vmem:[#allocation33_spill] sm:$0xff] }
 0x2de   : > { %v5045_v21 = vpop.eup %3005  ;;  %v2243_v43 = vpack.c.bf16 %v4653_v42, %v4643_v39  ;;  %v2242_v25 = vpack.c.bf16 %v4648_v47, %v4638_v58  ;;  %3027 = vpow2.f32 %v1761_v22  ;;  %v2000_v14 = vadd.f32 %v4678_v4, %v1999_v16  ;;  %v7313_v8 = vld [vmem:[#allocation78_spill] sm:$0xff] }
 0x2df   : > { %7284 = vst [vmem:[#allocation94_spill] sm:$0xff] %v5005_v41  ;;  %v5027_v41 = vmul.f32 1.442695, %v7292_v46  ;;  %v2095_v46 = vadd.f32 %v4623_v17, %v2094_v7  ;;  %v5052_v60 = vpop.eup %3007  ;;  %2365 = vmatpush1.bf16.msra.mxu1 %v2238_v38  ;;  %v2245_v62 = vpack.c.bf16 %v4673_v2, %v4663_v61  ;;  %3029 = vpow2.f32 %v4907_v48 }
 0x2e0   : > { %v5059_v57 = vpop.eup %3009  ;;  %2366 = vmatprep.subr.bf16.mxu1 %v2241_v37  ;;  %3031 = vpow2.f32 %v4915_v33  ;;  %v2001_v22 = vadd.f32 %v4688_v9, %v2000_v14  ;;  %v7295_v33 = vld [vmem:[#allocation70_spill] sm:$0xff]  ;;  %v7322_v14 = vld [vmem:[#allocation72_spill] sm:$0xff] }
 0x2e1   : > { %v2096_v17 = vadd.f32 %v4633_v23, %v2095_v46  ;;  %v5067_v47 = vpop.eup %3011  ;;  %3033 = vpow2.f32 %v4920_v31  ;;  %v7324_v31 = vpack.c.bf16 %v4668_v1, %v4658_v20 }
 0x2e2   : > { %v5075_v23 = vpop.eup %3013  ;;  %3035 = vpow2.f32 %v4925_v40  ;;  %v2002_v16 = vadd.f32 %v4698_v44, %v2001_v22  ;;  %v7293_v40 = vld [vmem:[#allocation17_spill] sm:$0xff]  ;;  %v7319_v22 = vld [vmem:[#allocation68_spill] sm:$0xff] }
 0x2e3   : > { %v2097_v7 = vadd.f32 %v4643_v39, %v2096_v17  ;;  %v5083_v38 = vpop.eup %3015  ;;  %2367 = vmatpush1.bf16.msra.mxu1 %v2240_v13  ;;  %3037 = vpow2.f32 %v4932_v24  ;;  %v7294_v17 = vld [vmem:[#allocation22_spill] sm:$0xff] }
 0x2e4   : > { %v5091_v39 = vpop.eup %3017  ;;  %2368 = vmatprep.subr.bf16.mxu1 %v2243_v43  ;;  %3039 = vpow2.f32 %v7295_v33  ;;  %v2003_v37 = vadd.f32 %v4708_v55, %v2002_v16  ;;  %v7299_v24 = vld [vmem:[#allocation30_spill] sm:$0xff]  ;;  %v7300_v43 = vld [vmem:[#allocation73_spill] sm:$0xff] }
 0x2e5   : > { %v2098_v46 = vadd.f32 %v4653_v42, %v2097_v7  ;;  %v5099_v13 = vpop.eup %3019  ;;  %3041 = vpow2.f32 %v7300_v43  ;;  %v7316_v43 = vld [vmem:[#allocation57_spill] sm:$0xff] }
 0x2e6   : > { %v5107_v42 = vpop.eup %3021  ;;  %3043 = vpow2.f32 %v4950_v30  ;;  %v2004_v16 = vadd.f32 %v4718_v26, %v2003_v37  ;;  %v7321_v33 = vld [vmem:[#allocation65_spill] sm:$0xff]  ;;  %v7326_v37 = vld [vmem:[#allocation86_spill] sm:$0xff] }
 0x2e7   : > { %v2099_v7 = vadd.f32 %v4663_v61, %v2098_v46  ;;  %v5115_v5 = vpop.eup %3023  ;;  %2369 = vmatpush1.bf16.msra.mxu1 %v2242_v25  ;;  %3045 = vpow2.f32 %v4955_v0  ;;  %v7317_v0 = vld [vmem:[#allocation62_spill] sm:$0xff] }
 0x2e8   : > { %v5123_v61 = vpop.eup %3025  ;;  %2370 = vmatprep.subr.bf16.mxu1 %v2245_v62  ;;  %3047 = vpow2.f32 %v7313_v8  ;;  %v2005_v53 = vadd.f32 %v4728_v50, %v2004_v16  ;;  %v7318_v62 = vld [vmem:[#allocation80_spill] sm:$0xff] }
 0x2e9   : > { %v2100_v46 = vadd.f32 %v4673_v2, %v2099_v7  ;;  %v5131_v25 = vpop.eup %3027  ;;  %3049 = vpow2.f32 %v7318_v62  ;;  %v7323_v16 = vld [vmem:[#allocation84_spill] sm:$0xff]  ;;  %v7334_v62 = vld [vmem:[#allocation94_spill] sm:$0xff] }
 0x2ea   : > { %v5139_v2 = vpop.eup %3029  ;;  %3051 = vpow2.f32 %v7323_v16  ;;  %v2006_v58 = vadd.f32 %v4738_v34, %v2005_v53  ;;  %v7327_v16 = vpack.c.bf16 %v4693_v11, %v4683_v6 }
 0x2eb   : > { %v2101_v7 = vadd.f32 %v4683_v6, %v2100_v46  ;;  %v5147_v30 = vpop.eup %3031  ;;  %2371 = vmatpush1.bf16.msra.mxu1 %v7324_v31  ;;  %v7325_v46 = vld [vmem:[#allocation81_spill] sm:$0xff]  ;;  %3053 = vpow2.f32 %v7326_v37  ;;  %v7329_v31 = vld [vmem:[#allocation88_spill] sm:$0xff] }
 0x2ec   : > { %v5158_v54 = vpop.eup %3033  ;;  %2372 = vmatprep.subr.bf16.mxu1 %v7327_v16  ;;  %3055 = vpow2.f32 %v7329_v31  ;;  %v2007_v48 = vadd.f32 %v4748_v36, %v2006_v58  ;;  %v7332_v58 = vld [vmem:[#allocation92_spill] sm:$0xff] }
 0x2ed   : > { %v2102_v8 = vadd.f32 %v4693_v11, %v2101_v7  ;;  %v5169_v53 = vpop.eup %3035  ;;  %v7330_v11 = vld [vmem:[#allocation89_spill] sm:$0xff]  ;;  %v7333_v7 = vpack.c.bf16 %v4688_v9, %v4678_v4 }
 0x2ee   : > { %7328 = vst [vmem:[#allocation96_spill] sm:$0xff] %v5169_v53  ;;  %v5177_v6 = vpop.eup %3037  ;;  %3057 = vpow2.f32 %v7330_v11  ;;  %v2008_v37 = vadd.f32 %v7293_v40, %v2007_v48 }
 0x2ef   : > { %v2103_v16 = vadd.f32 %v4703_v18, %v2102_v8  ;;  %v5185_v20 = vpop.eup %3039  ;;  %3059 = vpow2.f32 %v7332_v58  ;;  %2373 = vmatpush1.bf16.msra.mxu1 %v7333_v7  ;;  %v7335_v58 = vpack.c.bf16 %v4713_v10, %v4703_v18  ;;  %v7337_v7 = vld [vmem:[#allocation142_spill] sm:$0xff]  ;;  %v7339_v18 = vld [vmem:[#allocation143_spill] sm:$0xff] }
 0x2f0   : > { %7331 = vst [vmem:[#allocation97_spill] sm:$0xff] %v5185_v20  ;;  %v5196_v1 = vpop.eup %3041  ;;  %3061 = vpow2.f32 %v7334_v62  ;;  %v7338_v8 = vsub.f32 %v7337_v7, %v4167_v12  ;;  %v7344_v20 = vpack.c.bf16 %v4708_v55, %v4698_v44  ;;  %v7355_v44 = vld [vmem:[#allocation148_spill] sm:$0xff] }
 0x2f1   : > { %v2104_v31 = vadd.f32 %v4713_v10, %v2103_v16  ;;  %2374 = vmatprep.subr.bf16.mxu1 %v7335_v58  ;;  %v5207_v48 = vpop.eup %3043  ;;  %3063 = vpow2.f32 %v5010_v19  ;;  %v2009_v16 = vadd.f32 %v7294_v17, %v2008_v37  ;;  %v7340_v10 = vsub.f32 %v7339_v18, %v4163_v28  ;;  %v7342_v19 = vld [vmem:[#allocation144_spill] sm:$0xff] }
 0x2f2   : > { %7336 = vst [vmem:[#allocation100_spill] sm:$0xff] %v5207_v48  ;;  %v1805_v62 = vmul.f32 1.442695, %v7338_v8  ;;  %v5214_v11 = vpop.eup %3045  ;;  %3065 = vpow2.f32 %v5015_v32  ;;  %v7343_v7 = vsub.f32 %v7342_v19, %v4167_v12 }
 0x2f3   : > { %v1807_v58 = vmul.f32 1.442695, %v7340_v10  ;;  %v2105_v9 = vadd.f32 %v4723_v35, %v2104_v31  ;;  %v5221_v4 = vpop.eup %3047  ;;  %3067 = vpow2.f32 %v5022_v29  ;;  %v2010_v37 = vadd.f32 %v7298_v51, %v2009_v16  ;;  %2375 = vmatpush1.bf16.msra.mxu1 %v7344_v20  ;;  %v7345_v31 = vld [vmem:[#allocation145_spill] sm:$0xff]  ;;  %v7349_v20 = vld [vmem:[#allocation146_spill] sm:$0xff] }
 0x2f4   : > { %7341 = vst [vmem:[#allocation102_spill] sm:$0xff] %v5221_v4  ;;  %v1809_v8 = vmul.f32 1.442695, %v7343_v7  ;;  %v5233_v18 = vpop.eup %3049  ;;  %3069 = vpow2.f32 %v5027_v41  ;;  %v7346_v29 = vsub.f32 %v7345_v31, %v4163_v28  ;;  %v7347_v16 = vpack.c.bf16 %v4733_v59, %v4723_v35 }
 0x2f5   : > { %v2106_v19 = vadd.f32 %v4733_v59, %v2105_v9  ;;  %v5245_v55 = vpop.eup %3051  ;;  %3071 = vpow2.f32 %v1805_v62  ;;  %v7350_v7 = vsub.f32 %v7349_v20, %v4167_v12  ;;  %v2011_v32 = vadd.f32 %v7299_v24, %v2010_v37  ;;  %v7352_v9 = vld [vmem:[#allocation147_spill] sm:$0xff] }
 0x2f6   : > { %v1811_v10 = vmul.f32 1.442695, %v7346_v29  ;;  %2376 = vmatprep.subr.bf16.mxu1 %v7347_v16  ;;  %7348 = vst [vmem:[#allocation104_spill] sm:$0xff] %v5245_v55  ;;  %v5251_v31 = vpop.eup %3053  ;;  %3073 = vpow2.f32 %v1807_v58  ;;  %v7353_v29 = vsub.f32 %v7352_v9, %v4163_v28  ;;  %v7356_v62 = vsub.f32 %v7355_v44, %v4167_v12  ;;  %v7378_v55 = vld [vmem:[#allocation24_spill] sm:$0xff] }
 0x2f7   : > { %v1813_v41 = vmul.f32 1.442695, %v7350_v7  ;;  %7351 = vst [vmem:[#allocation105_spill] sm:$0xff] %v5251_v31  ;;  %v2107_v59 = vadd.f32 %v4743_v15, %v2106_v19  ;;  %v5257_v16 = vpop.eup %3055  ;;  %3075 = vpow2.f32 %v1809_v8  ;;  %v2012_v20 = vadd.f32 %v7303_v3, %v2011_v32  ;;  %v7359_v19 = vld [vmem:[#allocation149_spill] sm:$0xff]  ;;  %v7364_v32 = vld [vmem:[#allocation150_spill] sm:$0xff] }
 0x2f8   : > { %v1815_v35 = vmul.f32 1.442695, %v7353_v29  ;;  %7354 = vst [vmem:[#allocation108_spill] sm:$0xff] %v5257_v16  ;;  %v1817_v4 = vmul.f32 1.442695, %v7356_v62  ;;  %v7357_v37 = vpack.c.bf16 %v4728_v50, %v4718_v26  ;;  %v5268_v7 = vpop.eup %3057  ;;  %3077 = vpow2.f32 %v1811_v10  ;;  %v7361_v29 = vld [vmem:[#allocation16_spill] sm:$0xff] }
 0x2f9   : > { %7358 = vst [vmem:[#allocation110_spill] sm:$0xff] %v5268_v7  ;;  %v7360_v9 = vsub.f32 %v7359_v19, %v4163_v28  ;;  %v2108_v48 = vadd.f32 %v7361_v29, %v2107_v59  ;;  %v7362_v44 = vpack.c.bf16 %v7361_v29, %v4743_v15  ;;  %v5279_v50 = vpop.eup %3059  ;;  %3079 = vpow2.f32 %v1813_v41  ;;  %v7368_v59 = vld [vmem:[#allocation151_spill] sm:$0xff]  ;;  %v7370_v29 = vld [vmem:[#allocation20_spill] sm:$0xff] }
 0x2fa   : > { %2377 = vmatpush1.bf16.msra.mxu1 %v7357_v37  ;;  %7363 = vst [vmem:[#allocation112_spill] sm:$0xff] %v5279_v50  ;;  %v7365_v62 = vsub.f32 %v7364_v32, %v4167_v12  ;;  %v7366_v37 = vld [vmem:[#allocation38_spill] sm:$0xff]  ;;  %v5285_v19 = vpop.eup %3061  ;;  %3081 = vpow2.f32 %v1815_v35  ;;  %v7372_v26 = vld [vmem:[#allocation152_spill] sm:$0xff]  ;;  %v7374_v32 = vld [vmem:[#allocation41_spill] sm:$0xff] }
 0x2fb   : > { %v1819_v8 = vmul.f32 1.442695, %v7360_v9  ;;  %2378 = vmatprep.subr.bf16.mxu1 %v7362_v44  ;;  %v2013_v58 = vadd.f32 %v7366_v37, %v2012_v20  ;;  %7367 = vst [vmem:[#allocation113_spill] sm:$0xff] %v5285_v19  ;;  %v7369_v9 = vsub.f32 %v7368_v59, %v4163_v28  ;;  %v2109_v44 = vadd.f32 %v7370_v29, %v2108_v48  ;;  %v5291_v53 = vpop.eup %3063  ;;  %v7376_v48 = vld [vmem:[#allocation153_spill] sm:$0xff]  ;;  %v7395_v50 = vld [vmem:[#allocation32_spill] sm:$0xff] }
 0x2fc   : > { %v1821_v10 = vmul.f32 1.442695, %v7365_v62  ;;  %7371 = vst [vmem:[#allocation116_spill] sm:$0xff] %v5291_v53  ;;  %3083 = vpow2.f32 %v1817_v4  ;;  %v7373_v41 = vsub.f32 %v7372_v26, %v4167_v12  ;;  %v7375_v20 = vpack.c.bf16 %v4748_v36, %v4738_v34  ;;  %v5302_v59 = vpop.eup %3065  ;;  %v7389_v36 = vld [vmem:[#allocation156_spill] sm:$0xff] }
 0x2fd   : > { %v1823_v15 = vmul.f32 1.442695, %v7369_v9  ;;  %v2014_v62 = vadd.f32 %v7374_v32, %v2013_v58  ;;  %3085 = vpow2.f32 %v1819_v8  ;;  %v7377_v9 = vsub.f32 %v7376_v48, %v4163_v28  ;;  %v5313_v34 = vpop.eup %3067  ;;  %v7381_v58 = vld [vmem:[#allocation154_spill] sm:$0xff] }
 0x2fe   : > { %v1825_v16 = vmul.f32 1.442695, %v7373_v41  ;;  %2379 = vmatpush1.bf16.msra.mxu1 %v7375_v20  ;;  %v2110_v31 = vadd.f32 %v7378_v55, %v2109_v44  ;;  %v7379_v26 = vpack.c.bf16 %v7378_v55, %v7370_v29  ;;  %7380 = vst [vmem:[#allocation118_spill] sm:$0xff] %v5313_v34  ;;  %3087 = vpow2.f32 %v1821_v10  ;;  %v7383_v20 = vld [vmem:[#allocation46_spill] sm:$0xff]  ;;  %v5319_v48 = vpop.eup %3069  ;;  %v7385_v44 = vld [vmem:[#allocation155_spill] sm:$0xff]  ;;  %v7387_v29 = vld [vmem:[#allocation28_spill] sm:$0xff] }
 0x2ff   : > { %v1827_v4 = vmul.f32 1.442695, %v7377_v9  ;;  %v7382_v41 = vsub.f32 %v7381_v58, %v4167_v12  ;;  %v2015_v35 = vadd.f32 %v7383_v20, %v2014_v62  ;;  %7384 = vst [vmem:[#allocation120_spill] sm:$0xff] %v5319_v48  ;;  %3089 = vpow2.f32 %v1823_v15  ;;  %v5325_v19 = vpop.eup %3071  ;;  %v7391_v58 = vld [vmem:[#allocation49_spill] sm:$0xff] }
 0x300   : > { %2380 = vmatprep.subr.bf16.mxu1 %v7379_v26  ;;  %v7386_v9 = vsub.f32 %v7385_v44, %v4163_v28  ;;  %v2111_v26 = vadd.f32 %v7387_v29, %v2110_v31  ;;  %7388 = vst [vmem:[#allocation121_spill] sm:$0xff] %v5325_v19  ;;  %3091 = vpow2.f32 %v1825_v16  ;;  %v7390_v10 = vsub.f32 %v7389_v36, %v4167_v12  ;;  %v5336_v44 = vpop.eup %3073  ;;  %v7393_v31 = vld [vmem:[#allocation157_spill] sm:$0xff] }
 0x301   : > { %v1829_v8 = vmul.f32 1.442695, %v7382_v41  ;;  %v2016_v41 = vadd.f32 %v7391_v58, %v2015_v35  ;;  %v7392_v62 = vpack.c.bf16 %v7294_v17, %v7293_v40  ;;  %3093 = vpow2.f32 %v1827_v4  ;;  %v5347_v17 = vpop.eup %3075  ;;  %v7398_v35 = vld [vmem:[#allocation158_spill] sm:$0xff]  ;;  %v7405_v40 = vld [vmem:[#allocation160_spill] sm:$0xff] }
 0x302   : > { %v1831_v55 = vmul.f32 1.442695, %v7386_v9  ;;  %v1833_v53 = vmul.f32 1.442695, %v7390_v10  ;;  %v7394_v9 = vsub.f32 %v7393_v31, %v4163_v28  ;;  %v2112_v7 = vadd.f32 %v7395_v50, %v2111_v26  ;;  %7397 = vst [vmem:[#allocation122_spill] sm:$0xff] %v5347_v17  ;;  %v5353_v31 = vpop.eup %3077  ;;  %v7401_v26 = vld [vmem:[#allocation159_spill] sm:$0xff] }
 0x303   : > { %2381 = vmatpush1.bf16.msra.mxu1 %v7392_v62  ;;  %v7396_v36 = vpack.c.bf16 %v7395_v50, %v7387_v29  ;;  %3095 = vpow2.f32 %v1829_v8  ;;  %v7399_v10 = vsub.f32 %v7398_v35, %v4167_v12  ;;  %v7400_v62 = vld [vmem:[#allocation54_spill] sm:$0xff]  ;;  %v7403_v29 = vld [vmem:[#allocation36_spill] sm:$0xff]  ;;  %v5359_v48 = vpop.eup %3079  ;;  %v7406_v8 = vsub.f32 %v7405_v40, %v4167_v12 }
 0x304   : > { %v1835_v16 = vmul.f32 1.442695, %v7394_v9  ;;  %v2017_v15 = vadd.f32 %v7400_v62, %v2016_v41  ;;  %3097 = vpow2.f32 %v1831_v55  ;;  %v7402_v9 = vsub.f32 %v7401_v26, %v4163_v28  ;;  %7404 = vst [vmem:[#allocation123_spill] sm:$0xff] %v5359_v48 }
 0x305   : > { %2382 = vmatprep.subr.bf16.mxu1 %v7396_v36  ;;  %v1837_v4 = vmul.f32 1.442695, %v7399_v10  ;;  %v2113_v36 = vadd.f32 %v7403_v29, %v2112_v7  ;;  %3099 = vpow2.f32 %v1833_v53  ;;  %v1841_v19 = vmul.f32 1.442695, %v7406_v8  ;;  %v5370_v10 = vpop.eup %3081  ;;  %v7408_v7 = vld [vmem:[#allocation161_spill] sm:$0xff] }
 0x306   : > { %v1839_v50 = vmul.f32 1.442695, %v7402_v9  ;;  %v2018_v35 = vadd.f32 %v7316_v43, %v2017_v15  ;;  %v7407_v41 = vpack.c.bf16 %v7299_v24, %v7298_v51  ;;  %3101 = vpow2.f32 %v1835_v16  ;;  %v7410_v9 = vld [vmem:[#allocation40_spill] sm:$0xff]  ;;  %v5381_v24 = vpop.eup %3083  ;;  %v7413_v15 = vld [vmem:[#allocation162_spill] sm:$0xff] }
 0x307   : > { %v7409_v26 = vsub.f32 %v7408_v7, %v4163_v28  ;;  %v2114_v34 = vadd.f32 %v7410_v9, %v2113_v36  ;;  %v7411_v40 = vpack.c.bf16 %v7410_v9, %v7403_v29  ;;  %7412 = vst [vmem:[#allocation125_spill] sm:$0xff] %v5381_v24  ;;  %3103 = vpow2.f32 %v1837_v4  ;;  %v5387_v7 = vpop.eup %3085  ;;  %v7415_v36 = vld [vmem:[#allocation163_spill] sm:$0xff]  ;;  %v7417_v9 = vld [vmem:[#allocation44_spill] sm:$0xff] }
 0x308   : > { %2383 = vmatpush1.bf16.msra.mxu1 %v7407_v41  ;;  %v7414_v8 = vsub.f32 %v7413_v15, %v4167_v12  ;;  %v2019_v41 = vadd.f32 %v7317_v0, %v2018_v35  ;;  %3105 = vpow2.f32 %v1839_v50  ;;  %v5393_v55 = vpop.eup %3087  ;;  %v7419_v51 = vld [vmem:[#allocation164_spill] sm:$0xff]  ;;  %v7421_v35 = vpack.c.bf16 %v7366_v37, %v7303_v3 }
 0x309   : > { %v1843_v53 = vmul.f32 1.442695, %v7409_v26  ;;  %2384 = vmatprep.subr.bf16.mxu1 %v7411_v40  ;;  %v7416_v26 = vsub.f32 %v7415_v36, %v4163_v28  ;;  %v2115_v40 = vadd.f32 %v7417_v9, %v2114_v34  ;;  %7418 = vst [vmem:[#allocation126_spill] sm:$0xff] %v5393_v55  ;;  %3107 = vpow2.f32 %v1841_v19  ;;  %v7422_v34 = vld [vmem:[#allocation165_spill] sm:$0xff]  ;;  %v7432_v3 = vld [vmem:[#allocation168_spill] sm:$0xff] }
 0x30a   : > { %v1845_v16 = vmul.f32 1.442695, %v7414_v8  ;;  %v7420_v4 = vsub.f32 %v7419_v51, %v4167_v12  ;;  %v2020_v15 = vadd.f32 %v7321_v33, %v2019_v41  ;;  %v5404_v8 = vpop.eup %3089  ;;  %v7423_v36 = vsub.f32 %v7422_v34, %v4163_v28  ;;  %v7426_v41 = vld [vmem:[#allocation166_spill] sm:$0xff] }
 0x30b   : > { %v1847_v29 = vmul.f32 1.442695, %v7416_v26  ;;  %3109 = vpow2.f32 %v1843_v53  ;;  %v7424_v26 = vld [vmem:[#allocation48_spill] sm:$0xff]  ;;  %v5415_v37 = vpop.eup %3091 }
 0x30c   : > { %v1849_v48 = vmul.f32 1.442695, %v7420_v4  ;;  %2385 = vmatpush1.bf16.msra.mxu1 %v7421_v35  ;;  %v1851_v19 = vmul.f32 1.442695, %v7423_v36  ;;  %v2116_v17 = vadd.f32 %v7424_v26, %v2115_v40  ;;  %v7425_v51 = vpack.c.bf16 %v7424_v26, %v7417_v9  ;;  %v5421_v34 = vpop.eup %3093  ;;  %v7428_v40 = vld [vmem:[#allocation167_spill] sm:$0xff]  ;;  %v7430_v26 = vld [vmem:[#allocation52_spill] sm:$0xff] }
 0x30d   : > { %3111 = vpow2.f32 %v1845_v16  ;;  %v7427_v4 = vsub.f32 %v7426_v41, %v4167_v12  ;;  %v2021_v35 = vadd.f32 %v7322_v14, %v2020_v15  ;;  %v7429_v36 = vsub.f32 %v7428_v40, %v4163_v28  ;;  %v5427_v50 = vpop.eup %3095 }
 0x30e   : > { %2386 = vmatprep.subr.bf16.mxu1 %v7425_v51  ;;  %3113 = vpow2.f32 %v1847_v29  ;;  %v2117_v51 = vadd.f32 %v7430_v26, %v2116_v17  ;;  %7431 = vst [vmem:[#allocation127_spill] sm:$0xff] %v5427_v50  ;;  %v7433_v16 = vsub.f32 %v7432_v3, %v4167_v12  ;;  %v7434_v15 = vpack.c.bf16 %v7383_v20, %v7374_v32  ;;  %v7435_v17 = vld [vmem:[#allocation169_spill] sm:$0xff]  ;;  %v7444_v29 = vld [vmem:[#allocation172_spill] sm:$0xff] }
 0x30f   : > { %v1853_v53 = vmul.f32 1.442695, %v7427_v4  ;;  %v1855_v9 = vmul.f32 1.442695, %v7429_v36  ;;  %3115 = vpow2.f32 %v1849_v48  ;;  %v2022_v41 = vadd.f32 %v7325_v46, %v2021_v35  ;;  %v5438_v4 = vpop.eup %3097  ;;  %v7437_v36 = vld [vmem:[#allocation56_spill] sm:$0xff]  ;;  %v7439_v35 = vld [vmem:[#allocation170_spill] sm:$0xff] }
 0x310   : > { %v1857_v55 = vmul.f32 1.442695, %v7433_v16  ;;  %2387 = vmatpush1.bf16.msra.mxu1 %v7434_v15  ;;  %3117 = vpow2.f32 %v1851_v19  ;;  %v7436_v40 = vsub.f32 %v7435_v17, %v4163_v28  ;;  %v2118_v24 = vadd.f32 %v7437_v36, %v2117_v51  ;;  %v5449_v20 = vpop.eup %3099  ;;  %v7441_v51 = vld [vmem:[#allocation171_spill] sm:$0xff] }
 0x311   : > { %v7438_v3 = vpack.c.bf16 %v7437_v36, %v7430_v26  ;;  %3119 = vpow2.f32 %v1853_v53  ;;  %v7440_v16 = vsub.f32 %v7439_v35, %v4167_v12  ;;  %v2023_v15 = vadd.f32 %v5000_v45, %v2022_v41  ;;  %v5455_v17 = vpop.eup %3101 }
 0x312   : > { %v1859_v48 = vmul.f32 1.442695, %v7436_v40  ;;  %3121 = vpow2.f32 %v1855_v9  ;;  %v7442_v40 = vsub.f32 %v7441_v51, %v4163_v28  ;;  %v2119_v36 = vadd.f32 %v7314_v49, %v2118_v24  ;;  %v7447_v24 = vld [vmem:[#allocation173_spill] sm:$0xff] }
 0x313   : > { %2388 = vmatprep.subr.bf16.mxu1 %v7438_v3  ;;  %v1861_v19 = vmul.f32 1.442695, %v7440_v16  ;;  %v5461_v3 = vpop.eup %3103  ;;  %3123 = vpow2.f32 %v1857_v55  ;;  %v7445_v53 = vsub.f32 %v7444_v29, %v4167_v12  ;;  %v2024_v35 = vadd.f32 %v5030_v27, %v2023_v15  ;;  %v7451_v15 = vld [vmem:[#allocation174_spill] sm:$0xff]  ;;  %v7455_v9 = vld [vmem:[#allocation9_spill] sm:$0xff] }
 0x314   : > { %v1863_v26 = vmul.f32 1.442695, %v7442_v40  ;;  %7443 = vst [vmem:[#allocation128_spill] sm:$0xff] %v5461_v3  ;;  %v7446_v41 = vpack.c.bf16 %v7400_v62, %v7391_v58  ;;  %v5472_v16 = vpop.eup %3105  ;;  %3125 = vpow2.f32 %v1859_v48  ;;  %v7448_v51 = vsub.f32 %v7447_v24, %v4163_v28  ;;  %v7449_v40 = vld [vmem:[#allocation64_spill] sm:$0xff] }
 0x315   : > { %v1865_v32 = vmul.f32 1.442695, %v7445_v53  ;;  %v2120_v50 = vadd.f32 %v7449_v40, %v2119_v36  ;;  %v7450_v29 = vpack.c.bf16 %v7449_v40, %v7314_v49  ;;  %v5483_v62 = vpop.eup %3107  ;;  %3127 = vpow2.f32 %v1861_v19  ;;  %v7453_v36 = vld [vmem:[#allocation8_spill] sm:$0xff] }
 0x316   : > { %2389 = vmatpush1.bf16.msra.mxu1 %v7446_v41  ;;  %v1867_v55 = vmul.f32 1.442695, %v7448_v51  ;;  %v7452_v53 = vsub.f32 %v7451_v15, %v4167_v12  ;;  %v2025_v41 = vadd.f32 %v5045_v21, %v2024_v35  ;;  %v5489_v24 = vpop.eup %3109  ;;  %3129 = vpow2.f32 %v1863_v26 }
 0x317   : > { %2390 = vmatprep.subr.bf16.mxu1 %v7450_v29  ;;  %v7454_v51 = vsub.f32 %v7453_v36, %v4163_v28  ;;  %v2121_v40 = vadd.f32 %v7319_v22, %v2120_v50  ;;  %v5495_v29 = vpop.eup %3111  ;;  %3131 = vpow2.f32 %v1865_v32  ;;  %v7456_v19 = vsub.f32 %v7455_v9, %v4167_v12  ;;  %v7458_v50 = vld [vmem:[#allocation10_spill] sm:$0xff] }
 0x318   : > { %v1869_v48 = vmul.f32 1.442695, %v7452_v53  ;;  %v2026_v15 = vadd.f32 %v5059_v57, %v2025_v41  ;;  %v7457_v35 = vpack.c.bf16 %v7317_v0, %v7316_v43  ;;  %v5506_v53 = vpop.eup %3113  ;;  %3133 = vpow2.f32 %v1867_v55  ;;  %v7462_v41 = vld [vmem:[#allocation11_spill] sm:$0xff] }
 0x319   : > { %v1871_v49 = vmul.f32 1.442695, %v7454_v51  ;;  %v1873_v58 = vmul.f32 1.442695, %v7456_v19  ;;  %v7459_v36 = vsub.f32 %v7458_v50, %v4163_v28  ;;  %v7460_v51 = vld [vmem:[#allocation76_spill] sm:$0xff]  ;;  %v5517_v0 = vpop.eup %3115  ;;  %v7463_v19 = vsub.f32 %v7462_v41, %v4167_v12 }
 0x31a   : > { %2391 = vmatpush1.bf16.msra.mxu1 %v7457_v35  ;;  %v2122_v3 = vadd.f32 %v7460_v51, %v2121_v40  ;;  %v7461_v9 = vpack.c.bf16 %v7460_v51, %v7319_v22  ;;  %3135 = vpow2.f32 %v1869_v48  ;;  %v2027_v35 = vadd.f32 %v5075_v23, %v2026_v15  ;;  %v5523_v50 = vpop.eup %3117  ;;  %v7464_v40 = vld [vmem:[#allocation12_spill] sm:$0xff]  ;;  %v7466_v48 = vld [vmem:[#allocation13_spill] sm:$0xff] }
 0x31b   : > { %v1875_v32 = vmul.f32 1.442695, %v7459_v36  ;;  %v1877_v55 = vmul.f32 1.442695, %v7463_v19  ;;  %3137 = vpow2.f32 %v1871_v49  ;;  %v7465_v36 = vsub.f32 %v7464_v40, %v4163_v28 }
 0x31c   : > { %2392 = vmatprep.subr.bf16.mxu1 %v7461_v9  ;;  %v2123_v51 = vadd.f32 %v4987_v56, %v2122_v3  ;;  %v5529_v9 = vpop.eup %3119  ;;  %3139 = vpow2.f32 %v1873_v58  ;;  %v7467_v26 = vsub.f32 %v7466_v48, %v4167_v12  ;;  %v2028_v19 = vadd.f32 %v5091_v39, %v2027_v35  ;;  %v7469_v3 = vld [vmem:[#allocation14_spill] sm:$0xff]  ;;  %v7472_v35 = vld [vmem:[#allocation15_spill] sm:$0xff] }
 0x31d   : > { %v1879_v22 = vmul.f32 1.442695, %v7465_v36  ;;  %v7468_v15 = vpack.c.bf16 %v7322_v14, %v7321_v33  ;;  %v5540_v40 = vpop.eup %3121  ;;  %3141 = vpow2.f32 %v1875_v32  ;;  %v7470_v36 = vsub.f32 %v7469_v3, %v4163_v28 }
 0x31e   : > { %v1881_v41 = vmul.f32 1.442695, %v7467_v26  ;;  %v2124_v43 = vadd.f32 %v5017_v52, %v2123_v51  ;;  %v7471_v26 = vpack.c.bf16 %v5017_v52, %v4987_v56  ;;  %v5551_v33 = vpop.eup %3123  ;;  %3143 = vpow2.f32 %v1877_v55  ;;  %v7474_v51 = vld [vmem:[#allocation18_spill] sm:$0xff]  ;;  %v7477_v55 = vld [vmem:[#allocation19_spill] sm:$0xff] }
 0x31f   : > { %2393 = vmatpush1.bf16.msra.mxu1 %v7468_v15  ;;  %v1883_v58 = vmul.f32 1.442695, %v7470_v36  ;;  %v7473_v48 = vsub.f32 %v7472_v35, %v4167_v12  ;;  %v2029_v15 = vadd.f32 %v5107_v42, %v2028_v19  ;;  %v5558_v3 = vpop.eup %3125  ;;  %3145 = vpow2.f32 %v1879_v22 }
 0x320   : > { %2394 = vmatprep.subr.bf16.mxu1 %v7471_v26  ;;  %v7475_v56 = vsub.f32 %v7474_v51, %v4163_v28  ;;  %v2125_v36 = vadd.f32 %v5038_v63, %v2124_v43  ;;  %v5564_v26 = vpop.eup %3127  ;;  %3147 = vpow2.f32 %v1881_v41  ;;  %v7478_v49 = vsub.f32 %v7477_v55, %v4167_v12  ;;  %v7480_v41 = vld [vmem:[#allocation21_spill] sm:$0xff]  ;;  %v2866_v51 = vld [vmem:[%s5576_s11 + $0x4] ss:$24 sps:$4 sm:$0xff]  }
 0x321   : > { %v1885_v32 = vmul.f32 1.442695, %v7473_v48  ;;  %7476 = vst [vmem:[#allocation129_spill] sm:$0xff] %v5564_v26  ;;  %v2030_v48 = vadd.f32 %v5123_v61, %v2029_v15  ;;  %v7479_v19 = vpack.c.bf16 %v5000_v45, %v7325_v46  ;;  %v5580_v22 = vpop.eup %3129  ;;  %3149 = vpow2.f32 %v1883_v58  ;;  %2396 = vmatprep.mubr.bf16.mxu1 %v2866_v51 }
 0x322   : > { %v1887_v52 = vmul.f32 1.442695, %v7475_v56  ;;  %v1889_v35 = vmul.f32 1.442695, %v7478_v49  ;;  %v7481_v49 = vsub.f32 %v7480_v41, %v4163_v28  ;;  %v2126_v45 = vadd.f32 %v5052_v60, %v2125_v36  ;;  %v5592_v55 = vpop.eup %3131  ;;  %v7485_v36 = vld [vmem:[#allocation26_spill] sm:$0xff] }
 0x323   : > { %2395 = vmatpush1.bf16.msra.mxu1 %v7479_v19  ;;  %v7482_v46 = vpack.c.bf16 %v5052_v60, %v5038_v63  ;;  %3151 = vpow2.f32 %v1885_v32  ;;  %v7483_v19 = vld [vmem:[#allocation23_spill] sm:$0xff]  ;;  %v2031_v41 = vadd.f32 %v5139_v2, %v2030_v48  ;;  %v5599_v14 = vpop.eup %3133  ;;  %v7486_v63 = vsub.f32 %v7485_v36, %v4163_v28  ;;  %v7489_v36 = vld [vmem:[#allocation29_spill] sm:$0xff] }
 0x324   : > { %v1891_v15 = vmul.f32 1.442695, %v7481_v49  ;;  %v7484_v58 = vsub.f32 %v7483_v19, %v4167_v12  ;;  %v2864_v49 = vld [vmem:[%s5576_s11] ss:$24 sps:$4 sm:$0xff]   ;;  %3153 = vpow2.f32 %v1887_v52  ;;  %v5605_v56 = vpop.eup %3135 }
 0x325   : > { %2407 = vmatprep.subr.bf16.mxu1 %v7482_v46  ;;  %v1895_v60 = vmul.f32 1.442695, %v7486_v63  ;;  %v2127_v46 = vadd.f32 %v5067_v47, %v2126_v45  ;;  %3155 = vpow2.f32 %v1889_v35  ;;  %v7487_v32 = vld [vmem:[#allocation27_spill] sm:$0xff]  ;;  %v2032_v48 = vadd.f32 %v5158_v54, %v2031_v41  ;;  %v5613_v26 = vpop.eup %3137 }
 0x326   : > { %v1893_v43 = vmul.f32 1.442695, %v7484_v58  ;;  %v7488_v19 = vsub.f32 %v7487_v32, %v4167_v12  ;;  %2397 = vmatmul.mubr.bf16.vlgmr.msra.gmra.mrb[60].mxu1 %v2864_v49  ;;  %3157 = vpow2.f32 %v1891_v15  ;;  %v7490_v45 = vsub.f32 %v7489_v36, %v4163_v28  ;;  %v5624_v49 = vpop.eup %3139  ;;  %v7493_v32 = vld [vmem:[#allocation31_spill] sm:$0xff] }
 0x327   : > { %v2128_v63 = vadd.f32 %v5083_v38, %v2127_v46  ;;  %v7491_v35 = vpack.c.bf16 %v5045_v21, %v5030_v27  ;;  %7492 = vst [vmem:[#allocation130_spill] sm:$0xff] %v5624_v49  ;;  %v2033_v52 = vadd.f32 %v5177_v6, %v2032_v48  ;;  %v7495_v36 = vpack.c.bf16 %v5083_v38, %v5067_v47  ;;  %v5633_v46 = vpop.eup %3141  ;;  %v7496_v27 = vld [vmem:[#allocation34_spill] sm:$0xff]  ;;  %v7536_v49 = vld [vmem:[#allocation113_spill] sm:$0xff] }
 0x328   : > { %v1897_v58 = vmul.f32 1.442695, %v7488_v19  ;;  %v1899_v51 = vmul.f32 1.442695, %v7490_v45  ;;  %3159 = vpow2.f32 %v1893_v43  ;;  %v7494_v19 = vsub.f32 %v7493_v32, %v4167_v12  ;;  %v5639_v43 = vpop.eup %3143  ;;  %v7499_v32 = vld [vmem:[#allocation35_spill] sm:$0xff] }
 0x329   : > { %2408 = vmatpush1.bf16.msra.mxu1 %v7491_v35  ;;  %3161 = vpow2.f32 %v1895_v60  ;;  %v7497_v21 = vsub.f32 %v7496_v27, %v4163_v28  ;;  %v2129_v35 = vadd.f32 %v5099_v13, %v2128_v63  ;;  %7498 = vst [vmem:[#allocation131_spill] sm:$0xff] %v5639_v43  ;;  %v2034_v41 = vadd.f32 %v5196_v1, %v2033_v52  ;;  %v5647_v38 = vpop.eup %3145  ;;  %v7501_v60 = vld [vmem:[#allocation37_spill] sm:$0xff] }
 0x32a   : > { %v1901_v15 = vmul.f32 1.442695, %v7494_v19  ;;  %2409 = vmatprep.subr.bf16.mxu1 %v7495_v36  ;;  %3163 = vpow2.f32 %v1897_v58  ;;  %v7500_v19 = vsub.f32 %v7499_v32, %v4167_v12  ;;  %v7502_v36 = vsub.f32 %v7501_v60, %v4163_v28  ;;  %v5658_v52 = vpop.eup %3147  ;;  %v7505_v32 = vld [vmem:[#allocation39_spill] sm:$0xff] }
 0x32b   : > { %v1903_v45 = vmul.f32 1.442695, %v7497_v21  ;;  %3165 = vpow2.f32 %v1899_v51  ;;  %v2130_v63 = vadd.f32 %v5115_v5, %v2129_v35  ;;  %v7503_v58 = vpack.c.bf16 %v5075_v23, %v5059_v57  ;;  %7504 = vst [vmem:[#allocation132_spill] sm:$0xff] %v5658_v52  ;;  %v5667_v35 = vpop.eup %3149  ;;  %v7508_v57 = vld [vmem:[#allocation42_spill] sm:$0xff] }
 0x32c   : > { %v1905_v48 = vmul.f32 1.442695, %v7500_v19  ;;  %v1907_v27 = vmul.f32 1.442695, %v7502_v36  ;;  %3167 = vpow2.f32 %v1901_v15  ;;  %v7506_v19 = vsub.f32 %v7505_v32, %v4167_v12  ;;  %v7511_v32 = vld [vmem:[#allocation43_spill] sm:$0xff] }
 0x32d   : > { %2410 = vmatpush1.bf16.msra.mxu1 %v7503_v58  ;;  %v2035_v47 = vadd.f32 %v5214_v11, %v2034_v41  ;;  %v7507_v60 = vpack.c.bf16 %v5115_v5, %v5099_v13  ;;  %3169 = vpow2.f32 %v1903_v45  ;;  %v7509_v23 = vsub.f32 %v7508_v57, %v4163_v28  ;;  %v5673_v15 = vpop.eup %3151  ;;  %v7513_v45 = vld [vmem:[#allocation45_spill] sm:$0xff] }
 0x32e   : > { %v1909_v51 = vmul.f32 1.442695, %v7506_v19  ;;  %v2131_v58 = vadd.f32 %v5131_v25, %v2130_v63  ;;  %7510 = vst [vmem:[#allocation133_spill] sm:$0xff] %v5673_v15  ;;  %3171 = vpow2.f32 %v1905_v48  ;;  %v7512_v19 = vsub.f32 %v7511_v32, %v4167_v12  ;;  %v5681_v13 = vpop.eup %3153  ;;  %v7517_v32 = vld [vmem:[#allocation47_spill] sm:$0xff]  ;;  %v7519_v5 = vld [vmem:[#allocation105_spill] sm:$0xff]  ;;  %v7528_v15 = vld [vmem:[#allocation110_spill] sm:$0xff] }
 0x32f   : > { %2411 = vmatprep.subr.bf16.mxu1 %v7507_v60  ;;  %v1911_v36 = vmul.f32 1.442695, %v7509_v23  ;;  %v2036_v21 = vadd.f32 %v5233_v18, %v2035_v47  ;;  %3173 = vpow2.f32 %v1907_v27  ;;  %v7514_v60 = vsub.f32 %v7513_v45, %v4163_v28  ;;  %v5692_v47 = vpop.eup %3155 }
 0x330   : > { %v1913_v41 = vmul.f32 1.442695, %v7512_v19  ;;  %v2132_v63 = vadd.f32 %v5147_v30, %v2131_v58  ;;  %v7515_v48 = vpack.c.bf16 %v5107_v42, %v5091_v39  ;;  %7516 = vst [vmem:[#allocation134_spill] sm:$0xff] %v5692_v47  ;;  %3175 = vpow2.f32 %v1909_v51  ;;  %v5701_v58 = vpop.eup %3157  ;;  %v7522_v39 = vld [vmem:[#allocation50_spill] sm:$0xff] }
 0x331   : > { %v1915_v57 = vmul.f32 1.442695, %v7514_v60  ;;  %v7518_v19 = vsub.f32 %v7517_v32, %v4167_v12  ;;  %v2037_v43 = vadd.f32 %v7519_v5, %v2036_v21  ;;  %v7520_v45 = vpack.c.bf16 %v5147_v30, %v5131_v25  ;;  %7521 = vst [vmem:[#allocation135_spill] sm:$0xff] %v5701_v58  ;;  %v7526_v32 = vld [vmem:[#allocation51_spill] sm:$0xff] }
 0x332   : > { %2412 = vmatpush1.bf16.msra.mxu1 %v7515_v48  ;;  %3177 = vpow2.f32 %v1911_v36  ;;  %v7523_v42 = vsub.f32 %v7522_v39, %v4163_v28  ;;  %v7524_v48 = vld [vmem:[#allocation96_spill] sm:$0xff]  ;;  %v5707_v51 = vpop.eup %3159  ;;  %v7529_v36 = vld [vmem:[#allocation53_spill] sm:$0xff] }
 0x333   : > { %v1917_v27 = vmul.f32 1.442695, %v7518_v19  ;;  %2413 = vmatprep.subr.bf16.mxu1 %v7520_v45  ;;  %v2133_v23 = vadd.f32 %v7524_v48, %v2132_v63  ;;  %7525 = vst [vmem:[#allocation136_spill] sm:$0xff] %v5707_v51  ;;  %3179 = vpow2.f32 %v1913_v41  ;;  %v7527_v19 = vsub.f32 %v7526_v32, %v4167_v12  ;;  %v5715_v25 = vpop.eup %3161  ;;  %v7531_v39 = vld [vmem:[#allocation97_spill] sm:$0xff] }
 0x334   : > { %v1919_v60 = vmul.f32 1.442695, %v7523_v42  ;;  %v2038_v52 = vadd.f32 %v7528_v15, %v2037_v43  ;;  %3181 = vpow2.f32 %v1915_v57  ;;  %v7530_v45 = vsub.f32 %v7529_v36, %v4163_v28  ;;  %v5726_v32 = vpop.eup %3163 }
 0x335   : > { %v1921_v21 = vmul.f32 1.442695, %v7527_v19  ;;  %v2134_v42 = vadd.f32 %v7531_v39, %v2133_v23  ;;  %v7532_v41 = vpack.c.bf16 %v5139_v2, %v5123_v61  ;;  %7533 = vst [vmem:[#allocation137_spill] sm:$0xff] %v5726_v32  ;;  %3183 = vpow2.f32 %v1917_v27  ;;  %v7534_v19 = vld [vmem:[#allocation55_spill] sm:$0xff]  ;;  %v5735_v23 = vpop.eup %3165  ;;  %v7539_v61 = vld [vmem:[#allocation58_spill] sm:$0xff] }
 0x336   : > { %v1923_v63 = vmul.f32 1.442695, %v7530_v45  ;;  %v7535_v30 = vsub.f32 %v7534_v19, %v4167_v12  ;;  %v2039_v58 = vadd.f32 %v7536_v49, %v2038_v52  ;;  %v7537_v36 = vpack.c.bf16 %v7531_v39, %v7524_v48  ;;  %7538 = vst [vmem:[#allocation138_spill] sm:$0xff] %v5735_v23  ;;  %v2869_v27 = vld [vmem:[%s5576_s11 + $0xc] ss:$24 sps:$4 sm:$0xff]   ;;  %v5742_v51 = vpop.eup %3167 }
 0x337   : > { %2414 = vmatpush1.bf16.msra.mxu1 %v7532_v41  ;;  %3185 = vpow2.f32 %v1919_v60  ;;  %v7540_v2 = vsub.f32 %v7539_v61, %v4163_v28  ;;  %v7541_v41 = vld [vmem:[#allocation100_spill] sm:$0xff]  ;;  %7542 = vst [vmem:[#allocation139_spill] sm:$0xff] %v5742_v51  ;;  %v5750_v60 = vpop.eup %3169  ;;  %2439 = vmatprep.mubr.bf16.mxu1 %v2869_v27 }
 0x338   : > { %v1925_v57 = vmul.f32 1.442695, %v7535_v30  ;;  %2415 = vmatprep.subr.bf16.mxu1 %v7537_v36  ;;  %v2135_v43 = vadd.f32 %v7541_v41, %v2134_v42  ;;  %3187 = vpow2.f32 %v1921_v21  ;;  %v7543_v30 = vld [vmem:[#allocation59_spill] sm:$0xff]  ;;  %v2040_v48 = vadd.f32 %v5302_v59, %v2039_v58  ;;  %v7545_v36 = vld [vmem:[#allocation61_spill] sm:$0xff]  ;;  %v7552_v23 = vld [vmem:[#allocation120_spill] sm:$0xff] }
 0x339   : > { %v1927_v45 = vmul.f32 1.442695, %v7540_v2  ;;  %v7544_v52 = vsub.f32 %v7543_v30, %v4167_v12  ;;  %3189 = vpow2.f32 %v1923_v63  ;;  %v7546_v61 = vsub.f32 %v7545_v36, %v4163_v28  ;;  %v7547_v2 = vld [vmem:[#allocation102_spill] sm:$0xff]  ;;  %v5761_v30 = vpop.eup %3171 }
 0x33a   : > { %v2136_v47 = vadd.f32 %v7547_v2, %v2135_v43  ;;  %v7548_v21 = vpack.c.bf16 %v5177_v6, %v5158_v54  ;;  %7549 = vst [vmem:[#allocation140_spill] sm:$0xff] %v5761_v30  ;;  %3191 = vpow2.f32 %v1925_v57  ;;  %v2041_v36 = vadd.f32 %v7552_v23, %v2040_v48  ;;  %v7554_v54 = vld [vmem:[#allocation66_spill] sm:$0xff] }
 0x33b   : > { %v1929_v19 = vmul.f32 1.442695, %v7544_v52  ;;  %v1931_v42 = vmul.f32 1.442695, %v7546_v61  ;;  %v7550_v52 = vld [vmem:[#allocation63_spill] sm:$0xff]  ;;  %v7553_v43 = vpack.c.bf16 %v7547_v2, %v7541_v41  ;;  %v5770_v61 = vpop.eup %3173  ;;  %3193 = vpow2.f32 %v1927_v45  ;;  %v7560_v45 = vld [vmem:[#allocation69_spill] sm:$0xff] }
 0x33c   : > { %2416 = vmatpush1.bf16.msra.mxu1 %v7548_v21  ;;  %v7551_v63 = vsub.f32 %v7550_v52, %v4167_v12  ;;  %v7555_v6 = vsub.f32 %v7554_v54, %v4163_v28  ;;  %v7556_v21 = vld [vmem:[#allocation104_spill] sm:$0xff]  ;;  %v5776_v57 = vpop.eup %3175  ;;  %v7558_v52 = vld [vmem:[#allocation67_spill] sm:$0xff]  ;;  %v2042_v51 = vadd.f32 %v5336_v44, %v2041_v36 }
 0x33d   : > { %2417 = vmatprep.subr.bf16.mxu1 %v7553_v43  ;;  %v2137_v58 = vadd.f32 %v7556_v21, %v2136_v47  ;;  %7557 = vst [vmem:[#allocation141_spill] sm:$0xff] %v5776_v57  ;;  %3195 = vpow2.f32 %v1929_v19  ;;  %v5784_v2 = vpop.eup %3177  ;;  %v7561_v43 = vsub.f32 %v7560_v45, %v4163_v28  ;;  %v7562_v47 = vld [vmem:[#allocation108_spill] sm:$0xff]  ;;  %v7563_v19 = vpack.c.bf16 %v5214_v11, %v5196_v1  ;;  %v7568_v1 = vld [vmem:[#allocation74_spill] sm:$0xff] }
 0x33e   : > { %v1933_v39 = vmul.f32 1.442695, %v7551_v63  ;;  %v1935_v27 = vmul.f32 1.442695, %v7555_v6  ;;  %v7559_v63 = vsub.f32 %v7558_v52, %v4167_v12  ;;  %3197 = vpow2.f32 %v1931_v42  ;;  %v5795_v36 = vpop.eup %3179 }
 0x33f   : > { %v1939_v54 = vmul.f32 1.442695, %v7561_v43  ;;  %v2138_v6 = vadd.f32 %v7562_v47, %v2137_v58  ;;  %7564 = vst [vmem:[#allocation17_spill] sm:$0xff] %v5795_v36  ;;  %v2043_v32 = vadd.f32 %v5353_v31, %v2042_v51  ;;  %v7567_v45 = vpack.c.bf16 %v7562_v47, %v7556_v21  ;;  %v5804_v58 = vpop.eup %3181 }
 0x340   : > { %v1937_v48 = vmul.f32 1.442695, %v7559_v63  ;;  %2418 = vmatpush1.bf16.msra.mxu1 %v7563_v19  ;;  %3199 = vpow2.f32 %v1933_v39  ;;  %v7565_v63 = vld [vmem:[#allocation71_spill] sm:$0xff]  ;;  %v7569_v11 = vsub.f32 %v7568_v1, %v4163_v28  ;;  %v7570_v19 = vld [vmem:[#allocation112_spill] sm:$0xff]  ;;  %v5810_v39 = vpop.eup %3183 }
 0x341   : > { %v7566_v41 = vsub.f32 %v7565_v63, %v4167_v12  ;;  %2419 = vmatprep.subr.bf16.mxu1 %v7567_v45  ;;  %3201 = vpow2.f32 %v1935_v27  ;;  %v2139_v52 = vadd.f32 %v7570_v19, %v2138_v6  ;;  %7571 = vst [vmem:[#allocation22_spill] sm:$0xff] %v5810_v39  ;;  %v7572_v63 = vld [vmem:[#allocation75_spill] sm:$0xff]  ;;  %v2044_v57 = vadd.f32 %v5370_v10, %v2043_v32  ;;  %v5818_v47 = vpop.eup %3185  ;;  %v7574_v27 = vld [vmem:[#allocation77_spill] sm:$0xff]  ;;  %v7576_v6 = vld [vmem:[#allocation116_spill] sm:$0xff] }
 0x342   : > { %v1943_v43 = vmul.f32 1.442695, %v7569_v11  ;;  %3203 = vpow2.f32 %v1937_v48  ;;  %v7575_v45 = vsub.f32 %v7574_v27, %v4163_v28  ;;  %v7577_v48 = vpack.c.bf16 %v7519_v5, %v5233_v18  ;;  %v5829_v32 = vpop.eup %3187  ;;  %v7582_v18 = vld [vmem:[#allocation82_spill] sm:$0xff] }
 0x343   : > { %v1941_v42 = vmul.f32 1.442695, %v7566_v41  ;;  %v7573_v41 = vsub.f32 %v7572_v63, %v4167_v12  ;;  %3205 = vpow2.f32 %v1939_v54  ;;  %v2140_v11 = vadd.f32 %v7576_v6, %v2139_v52  ;;  %7578 = vst [vmem:[#allocation70_spill] sm:$0xff] %v5829_v32  ;;  %v5838_v52 = vpop.eup %3189 }
 0x344   : > { %v1947_v1 = vmul.f32 1.442695, %v7575_v45  ;;  %2420 = vmatpush1.bf16.msra.mxu1 %v7577_v48  ;;  %v2045_v30 = vadd.f32 %v5387_v7, %v2044_v57  ;;  %v7581_v27 = vpack.c.bf16 %v7576_v6, %v7570_v19  ;;  %v7583_v5 = vsub.f32 %v7582_v18, %v4163_v28  ;;  %v7584_v48 = vld [vmem:[#allocation118_spill] sm:$0xff] }
 0x345   : > { %v1945_v51 = vmul.f32 1.442695, %v7573_v41  ;;  %3207 = vpow2.f32 %v1941_v42  ;;  %v7579_v41 = vld [vmem:[#allocation79_spill] sm:$0xff]  ;;  %v2141_v63 = vadd.f32 %v7584_v48, %v2140_v11  ;;  %v5844_v42 = vpop.eup %3191  ;;  %v7590_v11 = vld [vmem:[#allocation121_spill] sm:$0xff] }
 0x346   : > { %v7580_v21 = vsub.f32 %v7579_v41, %v4167_v12  ;;  %2421 = vmatprep.subr.bf16.mxu1 %v7581_v27  ;;  %3209 = vpow2.f32 %v1943_v43  ;;  %v1951_v45 = vmul.f32 1.442695, %v7583_v5  ;;  %7585 = vst [vmem:[#allocation25_spill] sm:$0xff] %v5844_v42  ;;  %v7586_v41 = vld [vmem:[#allocation83_spill] sm:$0xff]  ;;  %v2046_v39 = vadd.f32 %v5404_v8, %v2045_v30  ;;  %v5852_v6 = vpop.eup %3193  ;;  %v7588_v43 = vld [vmem:[#allocation85_spill] sm:$0xff] }
 0x347   : > { %3211 = vpow2.f32 %v1945_v51  ;;  %v7589_v27 = vsub.f32 %v7588_v43, %v4163_v28  ;;  %v2142_v5 = vadd.f32 %v7590_v11, %v2141_v63  ;;  %v7591_v51 = vpack.c.bf16 %v7536_v49, %v7528_v15  ;;  %v5863_v30 = vpop.eup %3195  ;;  %v7596_v49 = vld [vmem:[#allocation90_spill] sm:$0xff] }
 0x348   : > { %v1949_v54 = vmul.f32 1.442695, %v7580_v21  ;;  %v7587_v21 = vsub.f32 %v7586_v41, %v4167_v12  ;;  %3213 = vpow2.f32 %v1947_v1  ;;  %7592 = vst [vmem:[#allocation30_spill] sm:$0xff] %v5863_v30  ;;  %v2047_v36 = vadd.f32 %v5421_v34, %v2046_v39  ;;  %v5872_v63 = vpop.eup %3197 }
 0x349   : > { %v1955_v18 = vmul.f32 1.442695, %v7589_v27  ;;  %2422 = vmatpush1.bf16.msra.mxu1 %v7591_v51  ;;  %v7595_v43 = vpack.c.bf16 %v7590_v11, %v7584_v48  ;;  %v7597_v15 = vsub.f32 %v7596_v49, %v4163_v28  ;;  %v7598_v51 = vld [vmem:[#allocation122_spill] sm:$0xff] }
 0x34a   : > { %v1953_v57 = vmul.f32 1.442695, %v7587_v21  ;;  %3215 = vpow2.f32 %v1949_v54  ;;  %v7593_v21 = vld [vmem:[#allocation87_spill] sm:$0xff]  ;;  %v2143_v41 = vadd.f32 %v7598_v51, %v2142_v5  ;;  %v5878_v54 = vpop.eup %3199  ;;  %v2048_v42 = vadd.f32 %v5438_v4, %v2047_v36 }
 0x34b   : > { %v7594_v19 = vsub.f32 %v7593_v21, %v4167_v12  ;;  %2423 = vmatprep.subr.bf16.mxu1 %v7595_v43  ;;  %3217 = vpow2.f32 %v1951_v45  ;;  %v1959_v27 = vmul.f32 1.442695, %v7597_v15  ;;  %7599 = vst [vmem:[#allocation73_spill] sm:$0xff] %v5878_v54  ;;  %v7600_v21 = vld [vmem:[#allocation91_spill] sm:$0xff]  ;;  %v5886_v11 = vpop.eup %3201  ;;  %v7602_v45 = vld [vmem:[#allocation93_spill] sm:$0xff] }
 0x34c   : > { %3219 = vpow2.f32 %v1953_v57  ;;  %v7603_v43 = vsub.f32 %v7602_v45, %v4163_v28  ;;  %v7604_v5 = vld [vmem:[#allocation123_spill] sm:$0xff]  ;;  %v7605_v57 = vpack.c.bf16 %v7552_v23, %v5302_v59  ;;  %v5897_v36 = vpop.eup %3203  ;;  %v2049_v32 = vadd.f32 %v5455_v17, %v2048_v42  ;;  %v7609_v59 = vld [vmem:[#allocation98_spill] sm:$0xff] }
 0x34d   : > { %v1957_v1 = vmul.f32 1.442695, %v7594_v19  ;;  %v7601_v19 = vsub.f32 %v7600_v21, %v4167_v12  ;;  %3221 = vpow2.f32 %v1955_v18  ;;  %v2144_v15 = vadd.f32 %v7604_v5, %v2143_v41  ;;  %v5906_v41 = vpop.eup %3205 }
 0x34e   : > { %v1963_v49 = vmul.f32 1.442695, %v7603_v43  ;;  %2424 = vmatpush1.bf16.msra.mxu1 %v7605_v57  ;;  %v7608_v45 = vpack.c.bf16 %v7604_v5, %v7598_v51  ;;  %v7610_v23 = vsub.f32 %v7609_v59, %v4163_v28  ;;  %v7611_v57 = vld [vmem:[#allocation125_spill] sm:$0xff]  ;;  %v2050_v54 = vadd.f32 %v5472_v16, %v2049_v32 }
 0x34f   : > { %v1961_v39 = vmul.f32 1.442695, %v7601_v19  ;;  %3223 = vpow2.f32 %v1957_v1  ;;  %v7606_v19 = vld [vmem:[#allocation95_spill] sm:$0xff]  ;;  %v2145_v21 = vadd.f32 %v7611_v57, %v2144_v15  ;;  %v5912_v1 = vpop.eup %3207  ;;  %v7617_v15 = vld [vmem:[#allocation126_spill] sm:$0xff] }
 0x350   : > { %v7607_v48 = vsub.f32 %v7606_v19, %v4167_v12  ;;  %2425 = vmatprep.subr.bf16.mxu1 %v7608_v45  ;;  %3225 = vpow2.f32 %v1959_v27  ;;  %v1967_v43 = vmul.f32 1.442695, %v7610_v23  ;;  %7612 = vst [vmem:[#allocation33_spill] sm:$0xff] %v5912_v1  ;;  %v7613_v19 = vld [vmem:[#allocation99_spill] sm:$0xff]  ;;  %v5920_v5 = vpop.eup %3209  ;;  %v7615_v27 = vld [vmem:[#allocation101_spill] sm:$0xff]  ;;  %v2051_v30 = vadd.f32 %v5489_v24, %v2050_v54 }
 0x351   : > { %3227 = vpow2.f32 %v1961_v39  ;;  %v7616_v45 = vsub.f32 %v7615_v27, %v4163_v28  ;;  %v2146_v23 = vadd.f32 %v7617_v15, %v2145_v21  ;;  %v7618_v39 = vpack.c.bf16 %v5353_v31, %v5336_v44  ;;  %v5931_v32 = vpop.eup %3211  ;;  %v7622_v44 = vld [vmem:[#allocation106_spill] sm:$0xff] }
 0x352   : > { %v1965_v18 = vmul.f32 1.442695, %v7607_v48  ;;  %v7614_v48 = vsub.f32 %v7613_v19, %v4167_v12  ;;  %3229 = vpow2.f32 %v1963_v49  ;;  %v7621_v27 = vpack.c.bf16 %v7617_v15, %v7611_v57  ;;  %v5940_v21 = vpop.eup %3213 }
 0x353   : > { %v1971_v59 = vmul.f32 1.442695, %v7616_v45  ;;  %2426 = vmatpush1.bf16.msra.mxu1 %v7618_v39  ;;  %v7623_v31 = vsub.f32 %v7622_v44, %v4163_v28  ;;  %v2147_v39 = vadd.f32 %v5415_v37, %v2146_v23  ;;  %v2052_v19 = vadd.f32 %v5506_v53, %v2051_v30  ;;  %v7629_v23 = vld [vmem:[#allocation127_spill] sm:$0xff] }
 0x354   : > { %v1969_v42 = vmul.f32 1.442695, %v7614_v48  ;;  %3231 = vpow2.f32 %v1965_v18  ;;  %v7619_v48 = vld [vmem:[#allocation103_spill] sm:$0xff]  ;;  %2427 = vmatprep.subr.bf16.mxu1 %v7621_v27  ;;  %v5946_v18 = vpop.eup %3215 }
 0x355   : > { %v7620_v51 = vsub.f32 %v7619_v48, %v4167_v12  ;;  %3233 = vpow2.f32 %v1967_v43  ;;  %v1975_v45 = vmul.f32 1.442695, %v7623_v31  ;;  %7624 = vst [vmem:[#allocation78_spill] sm:$0xff] %v5946_v18  ;;  %v7625_v48 = vld [vmem:[#allocation107_spill] sm:$0xff]  ;;  %v5954_v15 = vpop.eup %3217  ;;  %v7627_v43 = vld [vmem:[#allocation109_spill] sm:$0xff]  ;;  %v2148_v31 = vadd.f32 %v7629_v23, %v2147_v39 }
 0x356   : > { %3235 = vpow2.f32 %v1969_v42  ;;  %v7628_v27 = vsub.f32 %v7627_v43, %v4163_v28  ;;  %v7630_v42 = vpack.c.bf16 %v5387_v7, %v5370_v10  ;;  %v5965_v30 = vpop.eup %3219  ;;  %v2053_v1 = vadd.f32 %v5523_v50, %v2052_v19  ;;  %v7634_v10 = vld [vmem:[#allocation114_spill] sm:$0xff] }
 0x357   : > { %v1973_v49 = vmul.f32 1.442695, %v7620_v51  ;;  %v7626_v51 = vsub.f32 %v7625_v48, %v4167_v12  ;;  %3237 = vpow2.f32 %v1971_v59  ;;  %v7633_v43 = vpack.c.bf16 %v7629_v23, %v5415_v37  ;;  %v5974_v39 = vpop.eup %3221 }
 0x358   : > { %v1979_v44 = vmul.f32 1.442695, %v7628_v27  ;;  %2428 = vmatpush1.bf16.msra.mxu1 %v7630_v42  ;;  %v7635_v7 = vsub.f32 %v7634_v10, %v4163_v28  ;;  %v2149_v42 = vadd.f32 %v5449_v20, %v2148_v31  ;;  %v2054_v48 = vadd.f32 %v5540_v40, %v2053_v1  ;;  %v7640_v31 = vld [vmem:[#allocation128_spill] sm:$0xff] }
 0x359   : > { %v1977_v54 = vmul.f32 1.442695, %v7626_v51  ;;  %3239 = vpow2.f32 %v1973_v49  ;;  %v7631_v51 = vld [vmem:[#allocation111_spill] sm:$0xff]  ;;  %2429 = vmatprep.subr.bf16.mxu1 %v7633_v43  ;;  %v5980_v49 = vpop.eup %3223 }
 0x35a   : > { %v7632_v57 = vsub.f32 %v7631_v51, %v4167_v12  ;;  %3241 = vpow2.f32 %v1975_v45  ;;  %v1983_v27 = vmul.f32 1.442695, %v7635_v7  ;;  %v7636_v51 = vld [vmem:[#allocation115_spill] sm:$0xff]  ;;  %v5988_v23 = vpop.eup %3225  ;;  %v7638_v45 = vld [vmem:[#allocation117_spill] sm:$0xff]  ;;  %v2150_v7 = vadd.f32 %v7640_v31, %v2149_v42 }
 0x35b   : > { %3243 = vpow2.f32 %v1977_v54  ;;  %v7639_v43 = vsub.f32 %v7638_v45, %v4163_v28  ;;  %v7641_v54 = vpack.c.bf16 %v5421_v34, %v5404_v8  ;;  %v5999_v1 = vpop.eup %3227  ;;  %v2055_v18 = vadd.f32 %v5558_v3, %v2054_v48 }
 0x35c   : > { %v1981_v59 = vmul.f32 1.442695, %v7632_v57  ;;  %v7637_v57 = vsub.f32 %v7636_v51, %v4167_v12  ;;  %3245 = vpow2.f32 %v1979_v44  ;;  %v2325_v51 = vpack.c.bf16 %v5980_v49, %v5965_v30  ;;  %v6008_v42 = vpop.eup %3229 }
 0x35d   : > { %v1987_v10 = vmul.f32 1.442695, %v7639_v43  ;;  %2430 = vmatpush1.bf16.msra.mxu1 %v7641_v54  ;;  %v7644_v28 = vpack.c.bf16 %v7640_v31, %v5449_v20  ;;  %v2151_v8 = vadd.f32 %v5483_v62, %v2150_v7  ;;  %v7645_v20 = vpack.c.bf16 %v5455_v17, %v5438_v4 }
 0x35e   : > { %v1985_v19 = vmul.f32 1.442695, %v7637_v57  ;;  %3247 = vpow2.f32 %v1981_v59  ;;  %v7642_v57 = vld [vmem:[#allocation119_spill] sm:$0xff]  ;;  %v6011_v34 = vpop.eup %3231  ;;  %v2056_v59 = vadd.f32 %v5580_v22, %v2055_v18 }
 0x35f   : > { %v7643_v37 = vsub.f32 %v7642_v57, %v4167_v12  ;;  %2431 = vmatprep.subr.bf16.mxu1 %v7644_v28  ;;  %3249 = vpow2.f32 %v1983_v27  ;;  %v2326_v12 = vpack.c.bf16 %v6008_v42, %v5988_v23  ;;  %v2152_v48 = vadd.f32 %v5495_v29, %v2151_v8 }
 0x360   : > { %3251 = vpow2.f32 %v1985_v19  ;;  %v2327_v27 = vpack.c.bf16 %v6011_v34, %v5999_v1  ;;  %v2057_v18 = vadd.f32 %v5599_v14, %v2056_v59  ;;  %v7646_v19 = vpack.c.bf16 %v5495_v29, %v5483_v62 }
 0x361   : > { %v1989_v44 = vmul.f32 1.442695, %v7643_v37  ;;  %v6016_v37 = vpop.eup %3233  ;;  %3253 = vpow2.f32 %v1987_v10  ;;  %2432 = vmatpush1.bf16.msra.mxu1 %v7645_v20  ;;  %v2153_v10 = vadd.f32 %v5517_v0, %v2152_v48  ;;  %v7647_v57 = vpack.c.bf16 %v5489_v24, %v5472_v16 }
 0x362   : > { %v6024_v45 = vpop.eup %3235  ;;  %2433 = vmatprep.subr.bf16.mxu1 %v7646_v19  ;;  %v2058_v4 = vadd.f32 %v5613_v26, %v2057_v18  ;;  %v7648_v28 = vpack.c.bf16 %v5529_v9, %v5517_v0  ;;  %v7649_v18 = vld [vmem:[#allocation129_spill] sm:$0xff]  ;;  %v7650_v0 = vpack.c.bf16 %v5523_v50, %v5506_v53  ;;  %v2867_v50 = vld [vmem:[%s5576_s11 + $0x8] ss:$24 sps:$4 sm:$0xff]   ;;  %v7654_v24 = vpack.c.bf16 %v5605_v56, %v5592_v55 }
 0x363   : > { %3255 = vpow2.f32 %v1989_v44  ;;  %v6030_v43 = vpop.eup %3237  ;;  %v2154_v54 = vadd.f32 %v5529_v9, %v2153_v10 }
 0x364   : > { %v6033_v31 = vpop.eup %3239  ;;  %v2059_v44 = vadd.f32 %v5633_v46, %v2058_v4 }
 0x365   : > { %v6038_v7 = vpop.eup %3241  ;;  %2434 = vmatpush1.bf16.msra.mxu1 %v7647_v57  ;;  %v2329_v62 = vpack.c.bf16 %v6033_v31, %v6024_v45  ;;  %v2155_v59 = vadd.f32 %v5551_v33, %v2154_v54  ;;  %v7651_v54 = vpack.c.bf16 %v7649_v18, %v5551_v33 }
 0x366   : > { %v6046_v29 = vpop.eup %3243  ;;  %2435 = vmatprep.subr.bf16.mxu1 %v7648_v28  ;;  %v2060_v16 = vadd.f32 %v5647_v38, %v2059_v44 }
 0x367   : > { %v6052_v8 = vpop.eup %3245  ;;  %v2156_v19 = vadd.f32 %v7649_v18, %v2155_v59  ;;  %v2872_v18 = vld [vmem:[%s5576_s11 + $0x14] ss:$24 sps:$4 sm:$0xff]  }
 0x368   : > { %v6055_v48 = vpop.eup %3247  ;;  %v2061_v4 = vadd.f32 %v5667_v35, %v2060_v16  ;;  %v7652_v16 = vpack.c.bf16 %v5558_v3, %v5540_v40  ;;  %v7657_v40 = vpack.c.bf16 %v5599_v14, %v5580_v22  ;;  %v7658_v3 = vld [vmem:[#allocation138_spill] sm:$0xff] }
 0x369   : > { %v6060_v20 = vpop.eup %3249  ;;  %2436 = vmatpush1.bf16.msra.mxu1 %v7650_v0  ;;  %v2157_v44 = vadd.f32 %v5592_v55, %v2156_v19 }
 0x36a   : > { %v6068_v10 = vpop.eup %3251  ;;  %2437 = vmatprep.subr.bf16.mxu1 %v7651_v54  ;;  %v2062_v53 = vadd.f32 %v5681_v13, %v2061_v4  ;;  %v7653_v54 = vld [vmem:[#allocation135_spill] sm:$0xff]  ;;  %v7655_v4 = vld [vmem:[#allocation130_spill] sm:$0xff] }
 0x36b   : > { %v6074_v57 = vpop.eup %3253  ;;  %v2158_v0 = vadd.f32 %v5605_v56, %v2157_v44  ;;  %v7656_v44 = vld [vmem:[#allocation131_spill] sm:$0xff]  ;;  %v7660_v56 = vld [vmem:[#allocation132_spill] sm:$0xff] }
 0x36c   : > { %v2063_v19 = vadd.f32 %v7653_v54, %v2062_v53  ;;  %v7659_v53 = vpack.c.bf16 %v7656_v44, %v7655_v4 }
 0x36d   : > { %v6077_v28 = vpop.eup %3255  ;;  %2438 = vmatpush1.bf16.msra.mxu1 %v7652_v16  ;;  %v2159_v9 = vadd.f32 %v7655_v4, %v2158_v0  ;;  %v7661_v0 = vld [vmem:[#allocation133_spill] sm:$0xff]  ;;  %v7665_v4 = vld [vmem:[#allocation136_spill] sm:$0xff] }
 0x36e   : > { %v2333_v33 = vpack.c.bf16 %v6077_v28, %v6068_v10  ;;  %2450 = vmatprep.subr.bf16.mxu1 %v7654_v24  ;;  %v2064_v59 = vadd.f32 %v5715_v25, %v2063_v19  ;;  %v7663_v22 = vpack.c.bf16 %v7661_v0, %v7660_v56 }
 0x36f   : > { %v2160_v17 = vadd.f32 %v7656_v44, %v2159_v9  ;;  %v7662_v9 = vpack.c.bf16 %v5633_v46, %v5613_v26  ;;  %v7666_v44 = vpack.c.bf16 %v5667_v35, %v5647_v38  ;;  %v7668_v46 = vld [vmem:[#allocation137_spill] sm:$0xff]  ;;  %v7672_v35 = vld [vmem:[#allocation140_spill] sm:$0xff] }
 0x370   : > { %2440 = vmatmul.mubr.bf16.vlgmr.msra.gmra.mrb[60].mxu1 %v2867_v50  ;;  %v2065_v16 = vadd.f32 %v7658_v3, %v2064_v59  ;;  %v7664_v50 = vld [vmem:[#allocation134_spill] sm:$0xff] }
 0x371   : > { %2451 = vmatpush1.bf16.msra.mxu1 %v7657_v40  ;;  %2482 = vmatprep.mubr.bf16.mxu1 %v2872_v18  ;;  %v2161_v55 = vadd.f32 %v7660_v56, %v2160_v17  ;;  %v7667_v26 = vpack.c.bf16 %v7665_v4, %v7664_v50  ;;  %v7669_v56 = vld [vmem:[#allocation139_spill] sm:$0xff] }
 0x372   : > { %2452 = vmatprep.subr.bf16.mxu1 %v7659_v53  ;;  %v2066_v24 = vadd.f32 %v5750_v60, %v2065_v16  ;;  %v7671_v38 = vpack.c.bf16 %v7669_v56, %v7668_v46 }
 0x373   : > { %v2162_v19 = vadd.f32 %v7661_v0, %v2161_v55 }
 0x374   : > { %v2067_v14 = vadd.f32 %v5770_v61, %v2066_v24  ;;  %v7670_v24 = vpack.c.bf16 %v7653_v54, %v5681_v13  ;;  %v7676_v54 = vld [vmem:[#allocation17_spill] sm:$0xff] }
 0x375   : > { %2453 = vmatpush1.bf16.msra.mxu1 %v7662_v9  ;;  %v2163_v59 = vadd.f32 %v7664_v50, %v2162_v19  ;;  %v7674_v50 = vpack.c.bf16 %v7658_v3, %v5715_v25  ;;  %v7680_v3 = vld [vmem:[#allocation70_spill] sm:$0xff] }
 0x376   : > { %2454 = vmatprep.subr.bf16.mxu1 %v7663_v22  ;;  %v2068_v18 = vadd.f32 %v5784_v2, %v2067_v14  ;;  %v7673_v14 = vld [vmem:[#allocation141_spill] sm:$0xff] }
 0x377   : > { %v2164_v17 = vadd.f32 %v7665_v4, %v2163_v59  ;;  %v7675_v13 = vpack.c.bf16 %v7673_v14, %v7672_v35 }
 0x378   : > { %v2069_v40 = vadd.f32 %v5804_v58, %v2068_v18 }
 0x379   : > { %2455 = vmatpush1.bf16.msra.mxu1 %v7666_v44  ;;  %v2165_v16 = vadd.f32 %v7668_v46, %v2164_v17  ;;  %v7677_v17 = vld [vmem:[#allocation22_spill] sm:$0xff] }
 0x37a   : > { %2456 = vmatprep.subr.bf16.mxu1 %v7667_v26  ;;  %v2070_v53 = vadd.f32 %v5818_v47, %v2069_v40  ;;  %v7678_v40 = vpack.c.bf16 %v5770_v61, %v5750_v60  ;;  %v7679_v25 = vpack.c.bf16 %v7677_v17, %v7676_v54  ;;  %v7684_v61 = vld [vmem:[#allocation30_spill] sm:$0xff] }
 0x37b   : > { %v2166_v55 = vadd.f32 %v7669_v56, %v2165_v16 }
 0x37c   : > { %v2071_v0 = vadd.f32 %v5838_v52, %v2070_v53  ;;  %v7681_v53 = vld [vmem:[#allocation25_spill] sm:$0xff] }
 0x37d   : > { %2457 = vmatpush1.bf16.msra.mxu1 %v7670_v24  ;;  %v2167_v19 = vadd.f32 %v7672_v35, %v2166_v55  ;;  %v7682_v55 = vpack.c.bf16 %v5804_v58, %v5784_v2  ;;  %v7683_v60 = vpack.c.bf16 %v7681_v53, %v7680_v3  ;;  %v7685_v35 = vld [vmem:[#allocation73_spill] sm:$0xff] }
 0x37e   : > { %2458 = vmatprep.subr.bf16.mxu1 %v7671_v38  ;;  %v2072_v9 = vadd.f32 %v5852_v6, %v2071_v0  ;;  %v7687_v2 = vpack.c.bf16 %v7685_v35, %v7684_v61 }
 0x37f   : > { %v2168_v22 = vadd.f32 %v7673_v14, %v2167_v19 }
 0x380   : > { %v2073_v59 = vadd.f32 %v5872_v63, %v2072_v9  ;;  %v7686_v9 = vpack.c.bf16 %v5838_v52, %v5818_v47 }
 0x381   : > { %2459 = vmatpush1.bf16.msra.mxu1 %v7674_v50  ;;  %v2169_v18 = vadd.f32 %v7676_v54, %v2168_v22  ;;  %v7688_v50 = vld [vmem:[#allocation33_spill] sm:$0xff] }
 0x382   : > { %2460 = vmatprep.subr.bf16.mxu1 %v7675_v13  ;;  %v2074_v4 = vadd.f32 %v5886_v11, %v2073_v59  ;;  %v7689_v13 = vpack.c.bf16 %v5872_v63, %v5852_v6  ;;  %v7690_v47 = vpack.c.bf16 %v7688_v50, %v5897_v36 }
 0x383   : > { %v2170_v44 = vadd.f32 %v7677_v17, %v2169_v18 }
 0x384   : > { %v2075_v26 = vadd.f32 %v5906_v41, %v2074_v4  ;;  %v7691_v4 = vld [vmem:[#allocation78_spill] sm:$0xff] }
 0x385   : > { %2461 = vmatpush1.bf16.msra.mxu1 %v7678_v40  ;;  %v2171_v46 = vadd.f32 %v7680_v3, %v2170_v44  ;;  %v7692_v44 = vpack.c.bf16 %v5906_v41, %v5886_v11  ;;  %v7693_v6 = vpack.c.bf16 %v7691_v4, %v5931_v32 }
 0x386   : > { %2462 = vmatprep.subr.bf16.mxu1 %v7679_v25  ;;  %v2076_v16 = vadd.f32 %v5920_v5, %v2075_v26  ;;  %v7694_v25 = vpack.c.bf16 %v5940_v21, %v5920_v5 }
 0x387   : > { %v2172_v56 = vadd.f32 %v7681_v53, %v2171_v46  ;;  %v7695_v46 = vpack.c.bf16 %v5974_v39, %v5954_v15  ;;  %v7702_v53 = vpack.c.bf16 %v6074_v57, %v6060_v20 }
 0x388   : > { %v2077_v24 = vadd.f32 %v5940_v21, %v2076_v16 }
 0x389   : > { %2463 = vmatpush1.bf16.msra.mxu1 %v7682_v55  ;;  %v2173_v0 = vadd.f32 %v7684_v61, %v2172_v56  ;;  %v7703_v61 = vld [vmem:[#allocation175_spill] sm:$0xff] }
 0x38a   : > { %2464 = vmatprep.subr.bf16.mxu1 %v7683_v60  ;;  %v2078_v38 = vadd.f32 %v5954_v15, %v2077_v24 }
 0x38b   : > { %v2174_v19 = vadd.f32 %v7685_v35, %v2173_v0 }
 0x38c   : > { %v2079_v14 = vadd.f32 %v5974_v39, %v2078_v38 }
 0x38d   : > { %2465 = vmatpush1.bf16.msra.mxu1 %v7686_v9  ;;  %v2175_v58 = vadd.f32 %v5897_v36, %v2174_v19  ;;  %v7705_v9 = vld [vmem:[#allocation177_spill] sm:$0xff] }
 0x38e   : > { %2466 = vmatprep.subr.bf16.mxu1 %v7687_v2  ;;  %v2080_v22 = vadd.f32 %v5988_v23, %v2079_v14  ;;  %v7706_v2 = vld [vmem:[#allocation178_spill] sm:$0xff] }
 0x38f   : > { %v2176_v59 = vadd.f32 %v7688_v50, %v2175_v58 }
 0x390   : > { %v2081_v54 = vadd.f32 %v6008_v42, %v2080_v22 }
 0x391   : > { %2467 = vmatpush1.bf16.msra.mxu1 %v7689_v13  ;;  %v2177_v52 = vadd.f32 %v5931_v32, %v2176_v59 }
 0x392   : > { %2468 = vmatprep.subr.bf16.mxu1 %v7690_v47  ;;  %v2082_v18 = vadd.f32 %v6016_v37, %v2081_v54 }
 0x393   : > { %v2178_v17 = vadd.f32 %v7691_v4, %v2177_v52 }
 0x394   : > { %v2083_v40 = vadd.f32 %v6030_v43, %v2082_v18 }
 0x395   : > { %2469 = vmatpush1.bf16.msra.mxu1 %v7692_v44  ;;  %v2179_v63 = vadd.f32 %v5965_v30, %v2178_v17 }
 0x396   : > { %2470 = vmatprep.subr.bf16.mxu1 %v7693_v6  ;;  %v2084_v36 = vadd.f32 %v6038_v7, %v2083_v40 }
 0x397   : > { %v2180_v26 = vadd.f32 %v5980_v49, %v2179_v63 }
 0x398   : > { %v2085_v3 = vadd.f32 %v6052_v8, %v2084_v36 }
 0x399   : > { %2471 = vmatpush1.bf16.msra.mxu1 %v7694_v25  ;;  %v2181_v11 = vadd.f32 %v5999_v1, %v2180_v26  ;;  %v7697_v1 = vpack.c.bf16 %v6055_v48, %v6046_v29 }
 0x39a   : > { %2472 = vmatprep.subr.bf16.mxu1 %v2325_v51  ;;  %v2086_v41 = vadd.f32 %v6060_v20, %v2085_v3  ;;  %v7696_v51 = vpack.c.bf16 %v6030_v43, %v6016_v37 }
 0x39b   : > { %v2182_v32 = vadd.f32 %v6011_v34, %v2181_v11 }
 0x39c   : > { %v2087_v16 = vadd.f32 %v6074_v57, %v2086_v41 }
 0x39d   : > { %2473 = vmatpush1.bf16.msra.mxu1 %v7695_v46  ;;  %v2183_v5 = vadd.f32 %v6024_v45, %v2182_v32  ;;  %v7700_v45 = vld [vmem:[#allocation179_spill] sm:$0xff] }
 0x39e   : > { %2474 = vmatprep.subr.bf16.mxu1 %v2327_v27  ;;  %v2088_v21 = vrot.slane %v2087_v16, 4  ;;  %v7699_v27 = vld [vmem:[#allocation176_spill] sm:$0xff] }
 0x39f   : > { %v2184_v30 = vadd.f32 %v6033_v31, %v2183_v5  ;;  %v7701_v31 = vsub.f32 %v7699_v27, %v7700_v45 }
 0x3a0   : > { %v2089_v15 = vadd.f32 %v2088_v21, %v2087_v16 }
 0x3a1   : > { %2475 = vmatpush1.bf16.msra.mxu1 %v2326_v12  ;;  %v2185_v39 = vadd.f32 %v6046_v29, %v2184_v30  ;;  %v7698_v12 = vpack.c.bf16 %v6052_v8, %v6038_v7  ;;  %v2870_v29 = vld [vmem:[%s5576_s11 + $0x10] ss:$24 sps:$4 sm:$0xff]  }
 0x3a2   : > { %2476 = vmatprep.subr.bf16.mxu1 %v2329_v62  ;;  %v2090_v23 = vrot.slane %v2089_v15, 2  ;;  %v1402_v62 = vmul.f32 1.442695, %v7701_v31 }
 0x3a3   : > { %v2186_v49 = vadd.f32 %v6055_v48, %v2185_v39 }
 0x3a4   : > { %v2091_v37 = vadd.f32 %v2090_v23, %v2089_v15  ;;  %3257 = vpow2.f32 %v1402_v62 }
 0x3a5   : > { %2477 = vmatpush1.bf16.msra.mxu1 %v7696_v51  ;;  %v2187_v42 = vadd.f32 %v6068_v10, %v2186_v49 }
 0x3a6   : > { %2478 = vmatprep.subr.bf16.mxu1 %v7697_v1  ;;  %v2092_v56 = vrot.slane %v2091_v37, 1 }
 0x3a7   : > { %v2188_v34 = vadd.f32 %v6077_v28, %v2187_v42 }
 0x3a8   : > { %v2093_v55 = vadd.f32 %v2092_v56, %v2091_v37 }
 0x3a9   : > { %2479 = vmatpush1.bf16.msra.mxu1 %v7698_v12  ;;  %v2189_v43 = vrot.slane %v2188_v34, 4 }
 0x3aa   : > { %2480 = vmatprep.subr.bf16.mxu1 %v2333_v33  ;;  %v1991_v33 = vld [vmem:[#allocation3] sm:$0x3] }
 0x3ab   : > { %v2190_v48 = vadd.f32 %v2189_v43, %v2188_v34 }
 0x3ad   : > { %2481 = vmatpush1.bf16.msra.mxu1 %v7702_v53  ;;  %v2191_v7 = vrot.slane %v2190_v48, 2 }
 0x3ae   : > { %v3258_v28 = vpop.eup %3257 }
 0x3af   : > { %v2192_v8 = vadd.f32 %v2191_v7, %v2190_v48  ;;  %v1992_v38 = vmul.f32 %v3258_v28, %v1991_v33  ;;  %v2227_v14 = vrot.slane %v3258_v28, %v7705_v9  ;;  %v2231_v58 = vrot.slane %v3258_v28, %v7706_v2 }
 0x3b0   : > { %2483 = vmatmul.mubr.bf16.vlgmr.msra.gmra.mrb[60].mxu1 %v2870_v29 }
 0x3b1   : > { %v2193_v24 = vrot.slane %v2192_v8, 1  ;;  %v2234_v50 = vmul.f32 0.0, %v2227_v14  ;;  %v2235_v13 = vmul.f32 0.0, %v2231_v58 }
 0x3b3   : > { %v2194_v60 = vadd.f32 %v2193_v24, %v2192_v8 }
 0x3b5   : > { %v2197_v10 = vcombine.low %v2093_v55, %v2194_v60 }
 0x3b7   : > { %v2204_v0 = vrot.slane %v2197_v10, %v7703_v61 }
 0x3b9   : > { %v2211_v35 = vrot.slane %v2204_v0, %v7703_v61 }
 0x3bb   : > { %v2213_v20 = vadd.f32 %v2211_v35, %v1992_v38 }
 0x3bd   : > { %2218 = vst.msk [vmem:[#allocation3] sm:$0x3] %vm3964_vm1, %v2213_v20 }
 0x3c4   : > { %v2505_v19 = vld [vmem:[#allocation3] sm:$0x3] }
 0x3c5   : > { %3259 = vrcp.f32 %v2505_v19 }
 0x3cf   : > { %v3260_v22 = vpop.eup %3259 }
 0x3d0   : > { %v2515_v47 = vrot.slane %v3260_v22, %v7705_v9  ;;  %v2519_v4 = vrot.slane %v3260_v22, %v7706_v2 }
 0x483   : > { %v2484_v59 = vpop.f32.mrb[60].mxu1 }
 0x484   : > { %v2493_v54 = vadd.f32 %v2484_v59, %v2234_v50  ;;  %v2486_v52 = vpop.f32.mrb[61].mxu1 }
 0x485   : > { %v2494_v18 = vadd.f32 %v2486_v52, %v2235_v13  ;;  %v2488_v17 = vpop.f32.mrb[62].mxu1 }
 0x486   : > { %v2522_v44 = vmul.f32 %v2515_v47, %v2493_v54  ;;  %v2495_v40 = vadd.f32 %v2488_v17, %v2234_v50  ;;  %v2490_v6 = vpop.f32.mrb[63].mxu1 }
 0x487   : > { %v2523_v63 = vmul.f32 %v2519_v4, %v2494_v18  ;;  %v2496_v36 = vadd.f32 %v2490_v6, %v2235_v13 }
 0x488   : > { %2526 = vst [vmem:[%s269_s21] sm:$0xff] %v2522_v44  ;;  %v2524_v26 = vmul.f32 %v2515_v47, %v2495_v40 }
 0x489   : > { %2527 = vst [vmem:[%s269_s21 + $0x8] sm:$0xff] %v2523_v63  ;;  %v2525_v25 = vmul.f32 %v2519_v4, %v2496_v36 }
 0x48a   : > { %2528 = vst [vmem:[%s269_s21 + $0x10] sm:$0xff] %v2524_v26 }
 0x48b   : > { %2529 = vst [vmem:[%s269_s21 + $0x18] sm:$0xff] %v2525_v25 }
 0x48c   : > { %3274 = shalt.err (!%p3271_p5)
}
 0x48d   : > { %s3275_s7 = scalar_lea.hbm %s6262_s29, 512  ;;  %s3279_s10 = scalar_lea.hbm %s6315_s3, 1024 }
 0x48e   : > { %p3276_p6 = scmp.ne.s32.totalorder %s6262_s29, %s3275_s7  ;;  %p3280_p10 = scmp.lt.u32.totalorder %s6262_s29, %s6315_s3 }
 0x48f   : > { %p3281_p11 = scmp.lt.u32.totalorder %s3279_s10, %s3275_s7  ;;  %p3283_p13 = scmp.lt.u32.totalorder %s3275_s7, %s6262_s29 }
 0x490   : > { %p3277_p7 = pnand %p3276_p6, %p3408_p4 }
 0x491   : > { %p3282_p12 = por %p3281_p11, %p3280_p10 }
 0x492   : > { %p3278_p9 = pneg %p3277_p7 }
 0x493   : > { %p3284_p0 = por %p3283_p13, %p3282_p12 }
 0x495   : > { %p3285_p1 = pnand %p3284_p0, %p3278_p9 }
 0x497   : > { %3288 = shalt.err (!%p3285_p1)
}
 0x498   : > { %s3346_s19 = smov 256   ;;  %s3347_s21 = smov 16  }
 0x499   : > { %2779 = dma.vmem_to_hbm [thread:$0]  (%p3408_p4), %s6257_s23, 512, %s6262_s29, %s6266_s15, %s3346_s19, %s3346_s19, %s3347_s21  }
 0x49a PF: > { %p2785_p2 = scmp.ge.s32.totalorder %s3339_s17, 2  ;;  %s2564_s26 = sand.u32 1, %s3319_s12  }
 0x49b   : > { %s2565_s27 = scalar_lea.sflag [#allocation6], %s2564_s26 }
 0x49c   : > { %p2782_p3 = pnand %p2785_p2, %p3415_p8 }
 0x49e   : > { %3314 = dma.done.wait (!%p2782_p3), %s2565_s27, 512  }
 0x49f   : > { %3316 = vsyncadd (!%p2782_p3), %s2565_s27, 4294966784  ;;  %s16_s17 = sadd.s32 1, %s3339_s17   ;;  %s7707_s12 = smov %s3323_s13 }
 0x4a0   : > { %p13_p5 = scmp.ge.s32.totalorder %s16_s17, 4   ;;  %s7708_s13 = smov %s3327_s14 }
 0x4a1   : > { %s7709_s14 = smov %s3421_s25  ;;  %s7710_s15 = smov %s3335_s16 }
 0x4a2   : > { %s7711_s16 = smov %s7713_s20  ;;  %15 = sbr.rel (!%p13_p5) target bundleno = 4 (0x4), region = 81 }
 0x4a9   :  { %2570 = vsyncpa [#allocation6], 1 }
 0x4aa   :  { %2572 = vsyncpa [#allocation6 + $0x1], 1 }

</bundles_post_ra>
